<compile_context>
chip_gen: v7x
topology: tpu7x:2x2x1
jax: 0.10.0
libtpu: 0.0.40
codegen_flags: <defaults>
</compile_context>

<pallas_src>
import jax
import jax.numpy as jnp
from jax.experimental import pallas as pl
from jax.experimental.pallas import tpu as pltpu

EMBEDDING_SIZE = 32        # small, consistent with the module's `embedding_size`
FEAT_CH = 2048             # Inception-v3 Mixed_7c / pooled feature width
PATCH = 4                  # stand-in backbone patch size (stride == PATCH)


# ---------------------------------------------------------------------------
# Fused kernel: patchify-matmul backbone tile + lane-dense packed-NCHW spatial
#               writeback + Encoder head (pool -> ReLU -> partial Linear).
#
# Grid: (batch tiles, channel tiles), both "parallel" (no cross-step state).
#
#   x_ref  : (Bt*S, Kp)          bf16   im2col patches for this batch tile
#   wp_ref : (Kp, tile_n)        bf16   patchify weights (channel-permuted slice)
#   bp_ref : (1, tile_n)         f32    patchify bias    (channel-permuted slice)
#   wl_ref : (tile_n, E)         f32    Linear weight slice (channel-permuted W.T)
#   emb_ref: (1, Bt, E)          f32    per-channel-tile Linear partial
#   sp_ref : (Bt, tile_n//2, 2S) f32    packed NCHW spatial output (lane-dense)
#
# Channel permutation: kernel channel q = k*(tile_n//2) + p within a tile maps
# to real channel 2p + k.  Stacking the two lane-halves of the feature tile
# along the sublane axis and transposing therefore yields 128-lane rows that
# hold real channels (2p, 2p+1) back to back == exact NCHW byte order.
# ---------------------------------------------------------------------------
def _encoder_kernel(x_ref, wp_ref, bp_ref, wl_ref, emb_ref, sp_ref):
    bt, half, two_s = sp_ref.shape
    s = two_s // 2

    # Stand-in backbone: patchify conv as a matmul (bf16 operands, f32 acc).
    feat = jnp.dot(x_ref[...], wp_ref[...],
                   preferred_element_type=jnp.float32) + bp_ref[...]   # (Bt*S, tile_n)

    # Per-sample: pack + transpose for the lane-dense NCHW spatial store, and
    # spatial-sum for the pooled feature.  All ops are plain 2-D, statically
    # sliced and tile-aligned (Bt <= 8, each iteration is consumed by its
    # store, so vreg pressure stays bounded).
    pooled_rows = []
    for b in range(bt):
        fb = feat[b * s:(b + 1) * s, :]                                 # (S, tile_n)
        zb = jnp.concatenate([fb[:, :half], fb[:, half:]], axis=0)      # (2S, half)
        sp_ref[b, :, :] = zb.T.astype(sp_ref.dtype)                     # (half, 2S)
        pooled_rows.append(jnp.sum(fb, axis=0, keepdims=True))          # (1, tile_n)

    # Fused Encoder head for this channel tile:
    #   global average pool -> ReLU -> partial Linear (summed in the wrapper).
    pooled = jnp.concatenate(pooled_rows, axis=0) * (1.0 / s)           # (Bt, tile_n)
    emb_ref[0] = jnp.dot(jnp.maximum(pooled, 0.0), wl_ref[...],
                         preferred_element_type=jnp.float32)            # (Bt, E)


def _channel_perm(n_ch, tile_n):
    """kernel-channel -> real-channel permutation for the packed NCHW layout."""
    half = tile_n // 2
    q = jnp.arange(n_ch)
    j = q // tile_n
    r = q % tile_n
    k = r // half
    p = r % half
    return j * tile_n + 2 * p + k


# ---------------------------------------------------------------------------
# Full Encoder forward (eval mode).
# ---------------------------------------------------------------------------
def encoder_forward(img, params, *, tile_n=1024, spatial_dtype=jnp.float32):
    """img: (B, 3, H, W) NCHW float32.  Returns (embedding, spatial NCHW)."""
    B, C, H, W = img.shape
    Hp, Wp = H // PATCH, W // PATCH
    S = Hp * Wp
    N = FEAT_CH
    E = params["w_lin_t"].shape[1]
    assert N % tile_n == 0 and tile_n % 2 == 0
    nj = N // tile_n
    half = tile_n // 2

    # Bounded batch tile: VMEM footprint independent of B.  Batch is padded up
    # to a multiple of Bt (pad rows are zeros; sliced off after the call).
    Bt = min(8, B)
    B_pad = pl.cdiv(B, Bt) * Bt

    # im2col for the patchify stand-in backbone (tiny glue tensor), with the
    # contraction dim zero-padded to a full 128-lane width (unmasked LHS vld).
    K = C * PATCH * PATCH
    K_pad = max(128, pl.cdiv(K, 128) * 128)
    x = jnp.transpose(img, (0, 2, 3, 1)).reshape(B, Hp, PATCH, Wp, PATCH, C)
    x = jnp.transpose(x, (0, 1, 3, 2, 4, 5)).reshape(B * S, K)
    x = jnp.pad(x, ((0, (B_pad - B) * S), (0, K_pad - K)))
    x_bf = x.astype(jnp.bfloat16)

    # Channel-permuted weights (so the in-kernel half-split pack writes true
    # NCHW).  bf16 patchify operands for the MXU; head weights stay f32.
    perm = _channel_perm(N, tile_n)
    wp_bf = jnp.pad(params["w_patch"][:, perm],
                    ((0, K_pad - K), (0, 0))).astype(jnp.bfloat16)
    bp = params["b_patch"][:, perm]
    wl = params["w_lin_t"][perm, :]

    grid = (B_pad // Bt, nj)

    emb_parts, sp_packed = pl.pallas_call(
        _encoder_kernel,
        out_shape=(
            jax.ShapeDtypeStruct((nj, B_pad, E), jnp.float32),           # Linear partials
            jax.ShapeDtypeStruct((B_pad, N // 2, 2 * S), spatial_dtype),  # packed NCHW
        ),
        grid=grid,
        in_specs=[
            pl.BlockSpec((Bt * S, K_pad), lambda i, j: (i, 0)),   # im2col patches
            pl.BlockSpec((K_pad, tile_n), lambda i, j: (0, j)),   # patchify weights
            pl.BlockSpec((1, tile_n), lambda i, j: (0, j)),       # patchify bias
            pl.BlockSpec((tile_n, E), lambda i, j: (j, 0)),       # Linear weight slice
        ],
        out_specs=(
            pl.BlockSpec((1, Bt, E), lambda i, j: (j, i, 0)),
            pl.BlockSpec((Bt, half, 2 * S), lambda i, j: (i, j, 0)),
        ),
        compiler_params=pltpu.CompilerParams(
            dimension_semantics=("parallel", "parallel")),
    )(x_bf, wp_bf, bp, wl)

    # Head finalize (trivial): sum channel-tile partials, add bias; dropout(0)
    # is the identity.
    embedding = jnp.sum(emb_parts, axis=0)[:B] + params["b_lin"]          # (B, E)

    # Packed (B, N//2, 2S) has exact NCHW byte order -> pure reshape, no
    # transpose pass over the big tensor.
    spatial = sp_packed[:B].reshape(B, N, Hp, Wp)
    return embedding, spatial


def init_params(key):
    k1, k2, k3, k4 = jax.random.split(key, 4)
    kdim = 3 * PATCH * PATCH
    # stand-in backbone projection
    w_patch = jax.random.uniform(
        k1, (kdim, FEAT_CH), jnp.float32,
        minval=-1.0 / jnp.sqrt(kdim), maxval=1.0 / jnp.sqrt(kdim))
    b_patch = jax.random.uniform(
        k2, (1, FEAT_CH), jnp.float32,
        minval=-1.0 / jnp.sqrt(kdim), maxval=1.0 / jnp.sqrt(kdim))
    # nn.Linear(2048, embedding_size): weight (E, 2048), bias (E,)
    bound = 1.0 / jnp.sqrt(FEAT_CH)
    w_lin = jax.random.uniform(k3, (EMBEDDING_SIZE, FEAT_CH), jnp.float32,
                               minval=-bound, maxval=bound)
    b_lin = jax.random.uniform(k4, (1, EMBEDDING_SIZE), jnp.float32,
                               minval=-bound, maxval=bound)
    return {
        "w_patch": w_patch,
        "b_patch": b_patch,
        "w_lin_t": w_lin.T,          # (2048, E) for x @ W.T
        "b_lin": b_lin,              # (1, E)
    }


if __name__ == "__main__":
    key = jax.random.PRNGKey(0)
    pkey, xkey = jax.random.split(key)
    params = init_params(pkey)

    # small image; spatial feature map ends up (B, 2048, 8, 8) like Mixed_7c
    img = jax.random.normal(xkey, (2, 3, 32, 32), jnp.float32)

    embedding, spatial = jax.jit(encoder_forward)(img, params)
    jax.block_until_ready((embedding, spatial))

    assert embedding.shape == (2, EMBEDDING_SIZE)
    assert spatial.shape == (2, FEAT_CH, 8, 8)
    assert bool(jnp.all(jnp.isfinite(embedding)))
    assert bool(jnp.all(jnp.isfinite(spatial)))

    # ---- plain-JAX reference (same bf16-rounded operands, f32 math) ----
    B, C, H, W = img.shape
    Hp, Wp = H // PATCH, W // PATCH
    S = Hp * Wp
    xr = jnp.transpose(img, (0, 2, 3, 1)).reshape(B, Hp, PATCH, Wp, PATCH, C)
    xr = jnp.transpose(xr, (0, 1, 3, 2, 4, 5)).reshape(B * S, PATCH * PATCH * C)
    xf = xr.astype(jnp.bfloat16).astype(jnp.float32)
    wf = params["w_patch"].astype(jnp.bfloat16).astype(jnp.float32)
    feat_ref = xf @ wf + params["b_patch"]                         # (B*S, 2048)
    spatial_ref = jnp.transpose(feat_ref.reshape(B, Hp, Wp, FEAT_CH),
                                (0, 3, 1, 2))                      # (B, 2048, 8, 8)
    assert bool(jnp.allclose(spatial, spatial_ref, atol=2e-2, rtol=2e-2))

    pooled_ref = jnp.maximum(jnp.mean(feat_ref.reshape(B, S, FEAT_CH), axis=1), 0.0)
    emb_ref = pooled_ref @ params["w_lin_t"] + params["b_lin"]
    assert bool(jnp.allclose(embedding, emb_ref, atol=1e-3, rtol=1e-3))

    print("KERNEL_OK")
</pallas_src>

<mosaic_0001>
module attributes {stable_mosaic.version = 11 : i64} {
  func.func private @main(%arg0: i32) attributes {dimension_semantics = [#tpu.dimension_semantics<core_parallel>], iteration_bounds = array<i64: 2>, tpu.core_type = #tpu.core_type<sc_scalar_subcore>, window_params = []} {
    return
  }
}

module attributes {stable_mosaic.version = 11 : i64} {
  func.func private @main(%arg0: i32) attributes {dimension_semantics = [#tpu.dimension_semantics<core_parallel>], iteration_bounds = array<i64: 2>, tpu.core_type = #tpu.core_type<sc_scalar_subcore>, window_params = []} {
    return
  }
}

module attributes {stable_mosaic.version = 11 : i64} {
  func.func @_encoder_kernel(%arg0: i32, %arg1: i32, %arg2: memref<128x128xbf16, #tpu.memory_space<vmem>>, %arg3: memref<128x1024xbf16, #tpu.memory_space<vmem>>, %arg4: memref<1x1024xf32, #tpu.memory_space<vmem>>, %arg5: memref<1024x32xf32, #tpu.memory_space<vmem>>, %arg6: memref<1x2x32xf32, #tpu.memory_space<vmem>>, %arg7: memref<2x512x128xf32, #tpu.memory_space<vmem>>) attributes {dimension_semantics = [#tpu.dimension_semantics<parallel>, #tpu.dimension_semantics<parallel>], iteration_bounds = array<i64: 1, 2>, scalar_prefetch = 0 : i64, scratch_operands = 0 : i64, tpu.core_type = #tpu.core_type<tc>, window_params = [{transform_indices = @transform_0, window_bounds = array<i64: 128, 128>}, {transform_indices = @transform_1, window_bounds = array<i64: 128, 1024>}, {transform_indices = @transform_2, window_bounds = array<i64: 1, 1024>}, {transform_indices = @transform_3, window_bounds = array<i64: 1024, 32>}, {transform_indices = @transform_4, window_bounds = array<i64: 1, 2, 32>}, {transform_indices = @transform_5, window_bounds = array<i64: 2, 512, 128>}]} {
    %c0 = arith.constant 0 : index
    %c0_0 = arith.constant 0 : index
    %0 = vector.load %arg2[%c0, %c0_0] : memref<128x128xbf16, #tpu.memory_space<vmem>>, vector<128x128xbf16>
    %c0_1 = arith.constant 0 : index
    %c0_2 = arith.constant 0 : index
    %1 = vector.load %arg3[%c0_1, %c0_2] : memref<128x1024xbf16, #tpu.memory_space<vmem>>, vector<128x1024xbf16>
    %cst = arith.constant dense<0.000000e+00> : vector<128x1024xf32>
    %2 = tpu.matmul %0, %1, %cst {dimension_numbers = #tpu.dot_dimension_numbers<[1], [0], [0], [1], [0, 0, 1, 1], [], []>} : vector<128x128xbf16>, vector<128x1024xbf16>, vector<128x1024xf32> -> vector<128x1024xf32>
    %c0_3 = arith.constant 0 : index
    %c0_4 = arith.constant 0 : index
    %3 = vector.load %arg4[%c0_3, %c0_4] : memref<1x1024xf32, #tpu.memory_space<vmem>>, vector<1x1024xf32>
    %4 = vector.broadcast %3 : vector<1x1024xf32> to vector<128x1024xf32>
    %5 = arith.addf %2, %4 : vector<128x1024xf32>
    %6 = vector.extract_strided_slice %5 {offsets = [0, 0], sizes = [64, 1024], strides = [1, 1]} : vector<128x1024xf32> to vector<64x1024xf32>
    %7 = vector.extract_strided_slice %6 {offsets = [0, 0], sizes = [64, 512], strides = [1, 1]} : vector<64x1024xf32> to vector<64x512xf32>
    %8 = vector.extract_strided_slice %6 {offsets = [0, 512], sizes = [64, 512], strides = [1, 1]} : vector<64x1024xf32> to vector<64x512xf32>
    %9 = tpu.concatenate %7, %8 in 0 : vector<64x512xf32>, vector<64x512xf32> -> vector<128x512xf32>
    %10 = tpu.transpose %9, [1, 0] : vector<128x512xf32> -> vector<512x128xf32>
    %c0_5 = arith.constant 0 : index
    %c0_6 = arith.constant 0 : index
    %c0_7 = arith.constant 0 : index
    %11 = vector.load %arg7[%c0_5, %c0_6, %c0_7] : memref<2x512x128xf32, #tpu.memory_space<vmem>>, vector<1x512x128xf32>
    %12 = vector.shape_cast %11 : vector<1x512x128xf32> to vector<512x128xf32>
    %13 = vector.shape_cast %10 : vector<512x128xf32> to vector<1x512x128xf32>
    tpu.vector_store %arg7[%c0_5, %c0_6, %c0_7], %13 {strides = array<i32>} : memref<2x512x128xf32, #tpu.memory_space<vmem>>, vector<1x512x128xf32>,
    %cst_8 = arith.constant dense<0.000000e+00> : vector<1024xf32>
    %14 = vector.multi_reduction <add>, %6, %cst_8 [0] : vector<64x1024xf32> to vector<1024xf32>
    %15 = vector.shape_cast %14 : vector<1024xf32> to vector<1x1024xf32>
    %16 = vector.extract_strided_slice %5 {offsets = [64, 0], sizes = [64, 1024], strides = [1, 1]} : vector<128x1024xf32> to vector<64x1024xf32>
    %17 = vector.extract_strided_slice %16 {offsets = [0, 0], sizes = [64, 512], strides = [1, 1]} : vector<64x1024xf32> to vector<64x512xf32>
    %18 = vector.extract_strided_slice %16 {offsets = [0, 512], sizes = [64, 512], strides = [1, 1]} : vector<64x1024xf32> to vector<64x512xf32>
    %19 = tpu.concatenate %17, %18 in 0 : vector<64x512xf32>, vector<64x512xf32> -> vector<128x512xf32>
    %20 = tpu.transpose %19, [1, 0] : vector<128x512xf32> -> vector<512x128xf32>
    %c1 = arith.constant 1 : index
    %c0_9 = arith.constant 0 : index
    %c0_10 = arith.constant 0 : index
    %21 = vector.load %arg7[%c1, %c0_9, %c0_10] : memref<2x512x128xf32, #tpu.memory_space<vmem>>, vector<1x512x128xf32>
    %22 = vector.shape_cast %21 : vector<1x512x128xf32> to vector<512x128xf32>
    %23 = vector.shape_cast %20 : vector<512x128xf32> to vector<1x512x128xf32>
    tpu.vector_store %arg7[%c1, %c0_9, %c0_10], %23 {strides = array<i32>} : memref<2x512x128xf32, #tpu.memory_space<vmem>>, vector<1x512x128xf32>,
    %cst_11 = arith.constant dense<0.000000e+00> : vector<1024xf32>
    %24 = vector.multi_reduction <add>, %16, %cst_11 [0] : vector<64x1024xf32> to vector<1024xf32>
    %25 = vector.shape_cast %24 : vector<1024xf32> to vector<1x1024xf32>
    %26 = tpu.concatenate %15, %25 in 0 : vector<1x1024xf32>, vector<1x1024xf32> -> vector<2x1024xf32>
    %cst_12 = arith.constant 1.562500e-02 : f32
    %27 = vector.broadcast %cst_12 : f32 to vector<2x1024xf32>
    %28 = arith.mulf %26, %27 : vector<2x1024xf32>
    %cst_13 = arith.constant 0.000000e+00 : f32
    %29 = vector.broadcast %cst_13 : f32 to vector<2x1024xf32>
    %30 = arith.maximumf %28, %29 : vector<2x1024xf32>
    %c0_14 = arith.constant 0 : index
    %c0_15 = arith.constant 0 : index
    %31 = vector.load %arg5[%c0_14, %c0_15] : memref<1024x32xf32, #tpu.memory_space<vmem>>, vector<1024x32xf32>
    %cst_16 = arith.constant dense<0.000000e+00> : vector<2x32xf32>
    %32 = tpu.matmul %30, %31, %cst_16 {dimension_numbers = #tpu.dot_dimension_numbers<[1], [0], [0], [1], [0, 0, 1, 1], [], []>} : vector<2x1024xf32>, vector<1024x32xf32>, vector<2x32xf32> -> vector<2x32xf32>
    %c0_17 = arith.constant 0 : index
    %c0_18 = arith.constant 0 : index
    %c0_19 = arith.constant 0 : index
    %33 = vector.load %arg6[%c0_17, %c0_18, %c0_19] : memref<1x2x32xf32, #tpu.memory_space<vmem>>, vector<1x2x32xf32>
    %34 = vector.shape_cast %33 : vector<1x2x32xf32> to vector<2x32xf32>
    %35 = vector.shape_cast %32 : vector<2x32xf32> to vector<1x2x32xf32>
    tpu.vector_store %arg6[%c0_17, %c0_18, %c0_19], %35 {strides = array<i32>} : memref<1x2x32xf32, #tpu.memory_space<vmem>>, vector<1x2x32xf32>,
    return
  }
  func.func @transform_0(%arg0: i32, %arg1: i32) -> (i32, i32) {
    %c0_i32 = arith.constant 0 : i32
    %c0_i32_0 = arith.constant 0 : i32
    return %arg0, %c0_i32 : i32, i32
  }
  func.func @transform_1(%arg0: i32, %arg1: i32) -> (i32, i32) {
    %c0_i32 = arith.constant 0 : i32
    %c0_i32_0 = arith.constant 0 : i32
    return %c0_i32, %arg1 : i32, i32
  }
  func.func @transform_2(%arg0: i32, %arg1: i32) -> (i32, i32) {
    %c0_i32 = arith.constant 0 : i32
    %c0_i32_0 = arith.constant 0 : i32
    return %c0_i32, %arg1 : i32, i32
  }
  func.func @transform_3(%arg0: i32, %arg1: i32) -> (i32, i32) {
    %c0_i32 = arith.constant 0 : i32
    %c0_i32_0 = arith.constant 0 : i32
    return %arg1, %c0_i32 : i32, i32
  }
  func.func @transform_4(%arg0: i32, %arg1: i32) -> (i32, i32, i32) {
    %c0_i32 = arith.constant 0 : i32
    %c0_i32_0 = arith.constant 0 : i32
    return %arg1, %arg0, %c0_i32 : i32, i32, i32
  }
  func.func @transform_5(%arg0: i32, %arg1: i32) -> (i32, i32, i32) {
    %c0_i32 = arith.constant 0 : i32
    %c0_i32_0 = arith.constant 0 : i32
    return %arg0, %arg1, %c0_i32 : i32, i32, i32
  }
}

</mosaic_0001>

<bundles_post_ra>
// kernel: encoder_forward.1
= control target key start
LH: loop header
LB: loop body
LE: loop exit
PB: predicated region body
PF: predicated region fallthrough
CT: control target
= control target key end

     0   :  { %11 = vsyncpa [#allocation4], 0  ;;  %s5472_s0 = inlined_call_operand.vmem [shape: bf16[128,128], index: 0, kind: input, shape index: {}]   ;;  %s5473_s1 = inlined_call_operand.vmem [shape: bf16[128,2048], index: 1, kind: input, shape index: {}]   ;;  %s5474_s2 = inlined_call_operand.hbm [shape: f32[1,2048], index: 2, kind: input, shape index: {}]   ;;  %s5475_s3 = inlined_call_operand.hbm [shape: f32[2048,32], index: 3, kind: input, shape index: {}]   ;;  %s5476_s4 = inlined_call_operand.vmem [shape: f32[2,2,32], index: 4, kind: output, shape index: {0}]   ;;  %s5477_s5 = inlined_call_operand.vmem [shape: f32[2,1024,128], index: 5, kind: output, shape index: {1}]  }
   0x1   :  { %13 = vsyncpa [#allocation4 + $0x1], 0 }
   0x2   :  { %14 = vsyncpa [#allocation6], 0 }
   0x3   :  { %16 = vsyncpa [#allocation6 + $0x1], 0  ;;  %s3840_s18 = smov 0   ;;  %s3842_s19 = smov 0  }
   0x4   :  { %s3844_s20 = smov 0   ;;  %s3846_s21 = smov 0  }
   0x5   :  { %s3848_s22 = smov 0   ;;  %s3850_s23 = smov 0  }
   0x6 LB: > { %s3197_s24 = sadd.s32 4294967295, %s3803_s23   ;;  %s31_s25 = sadd.s32 1, %s3799_s22  ;;  %s3803_s23 = sphi %s3850_s23, %s22_s23   ;;  %s3799_s22 = sphi %s3848_s22, %s5629_s22   ;;  %s3795_s21 = sphi %s3846_s21, %s5628_s21   ;;  %s3791_s20 = sphi %s3844_s20, %s5627_s20   ;;  %s3787_s19 = sphi %s3842_s19, %s5626_s19   ;;  %s3783_s18 = sphi %s3840_s18, %s5625_s18  }
   0x7   : > { %p32_p0 = scmp.ge.s32.totalorder %s31_s25, 2  ;;  %s67_s26 = sadd.s32 1, %s3791_s20 }
   0x8   : > { %p74_p1 = scmp.ne.s32.totalorder %s3791_s20, %s3787_s19  ;;  %p75_p2 = scmp.eq.s32.totalorder %s3803_s23, 0 }
   0x9   : > { %s5631_s25 = smov (%p32_p0, %s31_s25), 0  ;;  %p106_p4 = scmp.ne.s32.totalorder %s3787_s19, %s3783_s18 }
   0xa   : > { %p3876_p3 = por %p75_p2, %p74_p1  ;;  %s64_s28 = ssub.s32 %s3799_s22, %s5631_s25 }
   0xb   : > { %p107_p5 = scmp.eq.s32.totalorder %s3197_s24, 0  ;;  %p65_p6 = scmp.eq.s32.totalorder %s64_s28, 0 }
   0xc   : > { %p186_p7 = scmp.eq.s32.totalorder %s3197_s24, 1  ;;  %p3201_p10 = scmp.ge.s32.totalorder %s3803_s23, 2 }
   0xd   : > { %p3883_p8 = por %p107_p5, %p106_p4 }
   0xe   : > { %s3888_s30 = scalar_select %p65_p6, %s3791_s20, %s67_s26  }
   0xf   : > { %p3890_p9 = por %p186_p7, %p74_p1  ;;  %217 = sbr.rel (%p3201_p10) target bundleno = 109 (0x6d), region = 20 }
  0x11   : > { %s5526_s6 = scalar_select %p3890_p9, 1, 0 }
  0x16   : > { %220 = sbr.rel (!%p3876_p3) target bundleno = 58 (0x3a), region = 24  ;;  %s222_s7 = sand.u32 (%p3876_p3), 1, %s3791_s20  }
  0x17   : > { %s3358_s8 = sshll.u32 (%p3876_p3), %s3799_s22, 5  ;;  %s3202_s9 = sshll.u32 (%p3876_p3), %s222_s7, 9 }
  0x18   : > { %s3902_s12 = scalar_lea.vmem (%p3876_p3), %s5473_s1, %s3358_s8  ;;  %s3907_s13 = scalar_lea.vmem (%p3876_p3), [#allocation2], %s3202_s9 }
  0x19   : > { %v240_v0 = vld [vmem:[%s3902_s12] sm:$0xff] (%p3876_p3)  ;;  %v242_v1 = vld [vmem:[%s3902_s12 + $0x8] sm:$0xff] (%p3876_p3)  ;;  %v244_v2 = vld [vmem:[%s3902_s12 + $0x10] sm:$0xff] (%p3876_p3) }
  0x1a   : > { %241 = vst [vmem:[%s3907_s13] sm:$0xff] (%p3876_p3), %v240_v0  ;;  %243 = vst [vmem:[%s3907_s13 + $0x8] sm:$0xff] (%p3876_p3), %v242_v1  ;;  %v246_v3 = vld [vmem:[%s3902_s12 + $0x18] sm:$0xff] (%p3876_p3)  ;;  %v248_v4 = vld [vmem:[%s3902_s12 + $0x40] sm:$0xff] (%p3876_p3) }
  0x1b   : > { %245 = vst [vmem:[%s3907_s13 + $0x10] sm:$0xff] (%p3876_p3), %v244_v2  ;;  %v250_v5 = vld [vmem:[%s3902_s12 + $0x48] sm:$0xff] (%p3876_p3)  ;;  %247 = vst [vmem:[%s3907_s13 + $0x18] sm:$0xff] (%p3876_p3), %v246_v3  ;;  %v252_v6 = vld [vmem:[%s3902_s12 + $0x50] sm:$0xff] (%p3876_p3) }
  0x1c   : > { %249 = vst [vmem:[%s3907_s13 + $0x20] sm:$0xff] (%p3876_p3), %v248_v4  ;;  %251 = vst [vmem:[%s3907_s13 + $0x28] sm:$0xff] (%p3876_p3), %v250_v5  ;;  %v254_v7 = vld [vmem:[%s3902_s12 + $0x58] sm:$0xff] (%p3876_p3)  ;;  %v256_v8 = vld [vmem:[%s3902_s12 + $0x80] sm:$0xff] (%p3876_p3) }
  0x1d   : > { %253 = vst [vmem:[%s3907_s13 + $0x30] sm:$0xff] %v252_v6  ;;  %255 = vst [vmem:[%s3907_s13 + $0x38] sm:$0xff] %v254_v7  ;;  %v258_v9 = vld [vmem:[%s3902_s12 + $0x88] sm:$0xff]  ;;  %v260_v10 = vld [vmem:[%s3902_s12 + $0x90] sm:$0xff] }
  0x1e   : > { %257 = vst [vmem:[%s3907_s13 + $0x40] sm:$0xff] %v256_v8  ;;  %v262_v11 = vld [vmem:[%s3902_s12 + $0x98] sm:$0xff]  ;;  %259 = vst [vmem:[%s3907_s13 + $0x48] sm:$0xff] %v258_v9  ;;  %v264_v12 = vld [vmem:[%s3902_s12 + $0xc0] sm:$0xff] }
  0x1f   : > { %261 = vst [vmem:[%s3907_s13 + $0x50] sm:$0xff] %v260_v10  ;;  %263 = vst [vmem:[%s3907_s13 + $0x58] sm:$0xff] %v262_v11  ;;  %v266_v13 = vld [vmem:[%s3902_s12 + $0xc8] sm:$0xff]  ;;  %v268_v14 = vld [vmem:[%s3902_s12 + $0xd0] sm:$0xff] }
  0x20   : > { %265 = vst [vmem:[%s3907_s13 + $0x60] sm:$0xff] %v264_v12  ;;  %267 = vst [vmem:[%s3907_s13 + $0x68] sm:$0xff] %v266_v13  ;;  %v270_v15 = vld [vmem:[%s3902_s12 + $0xd8] sm:$0xff]  ;;  %v272_v16 = vld [vmem:[%s3902_s12 + $0x100] sm:$0xff] }
  0x21   : > { %269 = vst [vmem:[%s3907_s13 + $0x70] sm:$0xff] %v268_v14  ;;  %v274_v17 = vld [vmem:[%s3902_s12 + $0x108] sm:$0xff]  ;;  %271 = vst [vmem:[%s3907_s13 + $0x78] sm:$0xff] %v270_v15  ;;  %v276_v18 = vld [vmem:[%s3902_s12 + $0x110] sm:$0xff] }
  0x22   : > { %273 = vst [vmem:[%s3907_s13 + $0x80] sm:$0xff] %v272_v16  ;;  %275 = vst [vmem:[%s3907_s13 + $0x88] sm:$0xff] %v274_v17  ;;  %v278_v19 = vld [vmem:[%s3902_s12 + $0x118] sm:$0xff]  ;;  %v280_v20 = vld [vmem:[%s3902_s12 + $0x140] sm:$0xff] }
  0x23   : > { %277 = vst [vmem:[%s3907_s13 + $0x90] sm:$0xff] %v276_v18  ;;  %279 = vst [vmem:[%s3907_s13 + $0x98] sm:$0xff] %v278_v19  ;;  %v282_v21 = vld [vmem:[%s3902_s12 + $0x148] sm:$0xff]  ;;  %v284_v22 = vld [vmem:[%s3902_s12 + $0x150] sm:$0xff] }
  0x24   : > { %281 = vst [vmem:[%s3907_s13 + $0xa0] sm:$0xff] %v280_v20  ;;  %v286_v23 = vld [vmem:[%s3902_s12 + $0x158] sm:$0xff]  ;;  %283 = vst [vmem:[%s3907_s13 + $0xa8] sm:$0xff] %v282_v21  ;;  %v288_v24 = vld [vmem:[%s3902_s12 + $0x180] sm:$0xff] }
  0x25   : > { %285 = vst [vmem:[%s3907_s13 + $0xb0] sm:$0xff] %v284_v22  ;;  %287 = vst [vmem:[%s3907_s13 + $0xb8] sm:$0xff] %v286_v23  ;;  %v290_v25 = vld [vmem:[%s3902_s12 + $0x188] sm:$0xff]  ;;  %v292_v26 = vld [vmem:[%s3902_s12 + $0x190] sm:$0xff] }
  0x26   : > { %289 = vst [vmem:[%s3907_s13 + $0xc0] sm:$0xff] %v288_v24  ;;  %291 = vst [vmem:[%s3907_s13 + $0xc8] sm:$0xff] %v290_v25  ;;  %v294_v27 = vld [vmem:[%s3902_s12 + $0x198] sm:$0xff]  ;;  %v296_v28 = vld [vmem:[%s3902_s12 + $0x1c0] sm:$0xff] }
  0x27   : > { %293 = vst [vmem:[%s3907_s13 + $0xd0] sm:$0xff] %v292_v26  ;;  %v298_v29 = vld [vmem:[%s3902_s12 + $0x1c8] sm:$0xff]  ;;  %295 = vst [vmem:[%s3907_s13 + $0xd8] sm:$0xff] %v294_v27  ;;  %v300_v30 = vld [vmem:[%s3902_s12 + $0x1d0] sm:$0xff] }
  0x28   : > { %297 = vst [vmem:[%s3907_s13 + $0xe0] sm:$0xff] %v296_v28  ;;  %299 = vst [vmem:[%s3907_s13 + $0xe8] sm:$0xff] %v298_v29  ;;  %v302_v31 = vld [vmem:[%s3902_s12 + $0x1d8] sm:$0xff]  ;;  %v304_v32 = vld [vmem:[%s3902_s12 + $0x200] sm:$0xff] }
  0x29   : > { %301 = vst [vmem:[%s3907_s13 + $0xf0] sm:$0xff] %v300_v30  ;;  %303 = vst [vmem:[%s3907_s13 + $0xf8] sm:$0xff] %v302_v31  ;;  %v306_v33 = vld [vmem:[%s3902_s12 + $0x208] sm:$0xff]  ;;  %v308_v34 = vld [vmem:[%s3902_s12 + $0x210] sm:$0xff] }
  0x2a   : > { %305 = vst [vmem:[%s3907_s13 + $0x100] sm:$0xff] %v304_v32  ;;  %v310_v35 = vld [vmem:[%s3902_s12 + $0x218] sm:$0xff]  ;;  %307 = vst [vmem:[%s3907_s13 + $0x108] sm:$0xff] %v306_v33  ;;  %v312_v36 = vld [vmem:[%s3902_s12 + $0x240] sm:$0xff] }
  0x2b   : > { %309 = vst [vmem:[%s3907_s13 + $0x110] sm:$0xff] %v308_v34  ;;  %311 = vst [vmem:[%s3907_s13 + $0x118] sm:$0xff] %v310_v35  ;;  %v314_v37 = vld [vmem:[%s3902_s12 + $0x248] sm:$0xff]  ;;  %v316_v38 = vld [vmem:[%s3902_s12 + $0x250] sm:$0xff] }
  0x2c   : > { %313 = vst [vmem:[%s3907_s13 + $0x120] sm:$0xff] %v312_v36  ;;  %315 = vst [vmem:[%s3907_s13 + $0x128] sm:$0xff] %v314_v37  ;;  %v318_v39 = vld [vmem:[%s3902_s12 + $0x258] sm:$0xff]  ;;  %v320_v40 = vld [vmem:[%s3902_s12 + $0x280] sm:$0xff] }
  0x2d   : > { %317 = vst [vmem:[%s3907_s13 + $0x130] sm:$0xff] %v316_v38  ;;  %v322_v41 = vld [vmem:[%s3902_s12 + $0x288] sm:$0xff]  ;;  %319 = vst [vmem:[%s3907_s13 + $0x138] sm:$0xff] %v318_v39  ;;  %v324_v42 = vld [vmem:[%s3902_s12 + $0x290] sm:$0xff] }
  0x2e   : > { %321 = vst [vmem:[%s3907_s13 + $0x140] sm:$0xff] %v320_v40  ;;  %323 = vst [vmem:[%s3907_s13 + $0x148] sm:$0xff] %v322_v41  ;;  %v326_v43 = vld [vmem:[%s3902_s12 + $0x298] sm:$0xff]  ;;  %v328_v44 = vld [vmem:[%s3902_s12 + $0x2c0] sm:$0xff] }
  0x2f   : > { %325 = vst [vmem:[%s3907_s13 + $0x150] sm:$0xff] %v324_v42  ;;  %327 = vst [vmem:[%s3907_s13 + $0x158] sm:$0xff] %v326_v43  ;;  %v330_v45 = vld [vmem:[%s3902_s12 + $0x2c8] sm:$0xff]  ;;  %v332_v46 = vld [vmem:[%s3902_s12 + $0x2d0] sm:$0xff] }
  0x30   : > { %329 = vst [vmem:[%s3907_s13 + $0x160] sm:$0xff] %v328_v44  ;;  %v334_v47 = vld [vmem:[%s3902_s12 + $0x2d8] sm:$0xff]  ;;  %331 = vst [vmem:[%s3907_s13 + $0x168] sm:$0xff] %v330_v45  ;;  %v336_v48 = vld [vmem:[%s3902_s12 + $0x300] sm:$0xff] }
  0x31   : > { %333 = vst [vmem:[%s3907_s13 + $0x170] sm:$0xff] %v332_v46  ;;  %335 = vst [vmem:[%s3907_s13 + $0x178] sm:$0xff] %v334_v47  ;;  %v338_v49 = vld [vmem:[%s3902_s12 + $0x308] sm:$0xff]  ;;  %v340_v50 = vld [vmem:[%s3902_s12 + $0x310] sm:$0xff] }
  0x32   : > { %337 = vst [vmem:[%s3907_s13 + $0x180] sm:$0xff] %v336_v48  ;;  %339 = vst [vmem:[%s3907_s13 + $0x188] sm:$0xff] %v338_v49  ;;  %v342_v51 = vld [vmem:[%s3902_s12 + $0x318] sm:$0xff]  ;;  %v344_v52 = vld [vmem:[%s3902_s12 + $0x340] sm:$0xff] }
  0x33   : > { %341 = vst [vmem:[%s3907_s13 + $0x190] sm:$0xff] %v340_v50  ;;  %v346_v53 = vld [vmem:[%s3902_s12 + $0x348] sm:$0xff]  ;;  %343 = vst [vmem:[%s3907_s13 + $0x198] sm:$0xff] %v342_v51  ;;  %v348_v54 = vld [vmem:[%s3902_s12 + $0x350] sm:$0xff] }
  0x34   : > { %345 = vst [vmem:[%s3907_s13 + $0x1a0] sm:$0xff] %v344_v52  ;;  %347 = vst [vmem:[%s3907_s13 + $0x1a8] sm:$0xff] %v346_v53  ;;  %v350_v55 = vld [vmem:[%s3902_s12 + $0x358] sm:$0xff]  ;;  %v352_v56 = vld [vmem:[%s3902_s12 + $0x380] sm:$0xff] }
  0x35   : > { %349 = vst [vmem:[%s3907_s13 + $0x1b0] sm:$0xff] %v348_v54  ;;  %351 = vst [vmem:[%s3907_s13 + $0x1b8] sm:$0xff] %v350_v55  ;;  %v354_v57 = vld [vmem:[%s3902_s12 + $0x388] sm:$0xff]  ;;  %v356_v58 = vld [vmem:[%s3902_s12 + $0x390] sm:$0xff] }
  0x36   : > { %353 = vst [vmem:[%s3907_s13 + $0x1c0] sm:$0xff] %v352_v56  ;;  %v358_v59 = vld [vmem:[%s3902_s12 + $0x398] sm:$0xff]  ;;  %355 = vst [vmem:[%s3907_s13 + $0x1c8] sm:$0xff] %v354_v57  ;;  %v360_v60 = vld [vmem:[%s3902_s12 + $0x3c0] sm:$0xff] }
  0x37   : > { %357 = vst [vmem:[%s3907_s13 + $0x1d0] sm:$0xff] %v356_v58  ;;  %359 = vst [vmem:[%s3907_s13 + $0x1d8] sm:$0xff] %v358_v59  ;;  %v362_v61 = vld [vmem:[%s3902_s12 + $0x3c8] sm:$0xff]  ;;  %v364_v62 = vld [vmem:[%s3902_s12 + $0x3d0] sm:$0xff] }
  0x38   : > { %361 = vst [vmem:[%s3907_s13 + $0x1e0] sm:$0xff] %v360_v60  ;;  %363 = vst [vmem:[%s3907_s13 + $0x1e8] sm:$0xff] %v362_v61  ;;  %v366_v63 = vld [vmem:[%s3902_s12 + $0x3d8] sm:$0xff] }
  0x39   : > { %365 = vst [vmem:[%s3907_s13 + $0x1f0] sm:$0xff] %v364_v62  ;;  %367 = vst [vmem:[%s3907_s13 + $0x1f8] sm:$0xff] %v366_v63 }
  0x3a PF: > { %s4035_s14 = sand.u32 1, %s3791_s20   ;;  %s3359_s15 = sshll.u32 %s3799_s22, 7 }
  0x3b   : > { %s3205_s16 = sshll.u32 %s4035_s14, 3  ;;  %s4042_s24 = scalar_lea.hbm %s5474_s2, %s3359_s15 }
  0x3c   : > { %s378_s26 = scalar_lea.vmem [#allocation3], %s3205_s16  ;;  %s3208_s7 = sshll.u32 %s4035_s14, 10 }
  0x3d   : > { %s386_s28 = sshll.u32 %s378_s26, 4  ;;  %s375_s8 = scalar_lea.sflag [#allocation4], %s4035_s14  ;;  %s4044_s28 = int_to_ptr.vmem [resolvable:$true] %s386_s28 }
  0x3e   : > { %s3693_s9 = scalar_lea.hbm %s4042_s24, 128  ;;  %s3697_s12 = scalar_lea.hbm %s5474_s2, 256 }
  0x3f   : > { %p3694_p11 = scmp.ne.s32.totalorder %s4042_s24, %s3693_s9  ;;  %p3698_p0 = scmp.lt.u32.totalorder %s4042_s24, %s5474_s2 }
  0x40   : > { %p3699_p1 = scmp.lt.u32.totalorder %s3697_s12, %s3693_s9  ;;  %p3701_p4 = scmp.lt.u32.totalorder %s3693_s9, %s4042_s24 }
  0x41   : > { %p3695_p12 = pnand %p3694_p11, %p3876_p3 }
  0x42   : > { %p3700_p2 = por %p3699_p1, %p3698_p0 }
  0x43   : > { %p3696_p13 = pneg %p3695_p12 }
  0x44   : > { %p3702_p5 = por %p3701_p4, %p3700_p2 }
  0x46   : > { %p3703_p6 = pnand %p3702_p5, %p3696_p13 }
  0x48   : > { %3706 = shalt.err (!%p3703_p6)
}
  0x49   : > { %s3707_s16 = scalar_lea.vmem %s4044_s28, 128  ;;  %s3805_s17 = smov [#allocation3]  }
  0x4a   : > { %p3708_p7 = scmp.ne.s32.totalorder %s4044_s28, %s3707_s16  ;;  %s3711_s18 = sshll.u32 %s3805_s17, 4  ;;  %s3712_s18 = int_to_ptr.vmem [resolvable:$false] %s3711_s18 }
  0x4b   : > { %s3713_s26 = scalar_lea.vmem %s3712_s18, 256  ;;  %p3714_p12 = scmp.lt.s32.totalorder %s4044_s28, %s3712_s18 }
  0x4c   : > { %p3709_p10 = pnand %p3708_p7, %p3876_p3  ;;  %p3715_p9 = scmp.lt.s32.totalorder %s3713_s26, %s3707_s16 }
  0x4e   : > { %p3710_p11 = pneg %p3709_p10  ;;  %p3716_p0 = por %p3715_p9, %p3714_p12 }
  0x50   : > { %p3717_p1 = pnand %p3716_p0, %p3710_p11 }
  0x52   : > { %3720 = shalt.err (!%p3717_p1)
}
  0x53   : > { %3630 = dma.hbm_to_vmem [thread:$0]  (%p3876_p3), %s4042_s24, 128, %s4044_s28, %s375_s8  }
  0x54   : > { %s3360_s9 = sshll.u32 %s3799_s22, 14  ;;  %s397_s13 = scalar_lea.vmem [#allocation5], %s3208_s7 }
  0x55   : > { %s4073_s12 = scalar_lea.hbm %s5475_s3, %s3360_s9  ;;  %s404_s15 = sshll.u32 %s397_s13, 4  ;;  %s4077_s15 = int_to_ptr.vmem [resolvable:$true] %s404_s15 }
  0x56   : > { %s394_s16 = scalar_lea.sflag [#allocation6], %s4035_s14  ;;  %s3721_s17 = scalar_lea.hbm %s4073_s12, 16384 }
  0x57   : > { %p3722_p9 = scmp.ne.s32.totalorder %s4073_s12, %s3721_s17  ;;  %s3725_s8 = scalar_lea.hbm %s5475_s3, 32768 }
  0x58   : > { %p3726_p4 = scmp.lt.u32.totalorder %s4073_s12, %s5475_s3  ;;  %p3727_p5 = scmp.lt.u32.totalorder %s3725_s8, %s3721_s17 }
  0x59   : > { %p3723_p13 = pnand %p3722_p9, %p3876_p3  ;;  %p3729_p7 = scmp.lt.u32.totalorder %s3721_s17, %s4073_s12 }
  0x5a   : > { %p3728_p6 = por %p3727_p5, %p3726_p4 }
  0x5b   : > { %p3724_p2 = pneg %p3723_p13 }
  0x5c   : > { %p3730_p10 = por %p3729_p7, %p3728_p6 }
  0x5e   : > { %p3731_p11 = pnand %p3730_p10, %p3724_p2 }
  0x60   : > { %3734 = shalt.err (!%p3731_p11)
}
  0x61   : > { %s3735_s7 = scalar_lea.vmem %s4077_s15, 16384  ;;  %s3806_s9 = smov [#allocation5]  }
  0x62   : > { %p3736_p12 = scmp.ne.s32.totalorder %s4077_s15, %s3735_s7  ;;  %s3739_s10 = sshll.u32 %s3806_s9, 4  ;;  %s3740_s10 = int_to_ptr.vmem [resolvable:$false] %s3739_s10 }
  0x63   : > { %s3741_s11 = scalar_lea.vmem %s3740_s10, 32768  ;;  %p3742_p9 = scmp.lt.s32.totalorder %s4077_s15, %s3740_s10 }
  0x64   : > { %p3737_p0 = pnand %p3736_p12, %p3876_p3  ;;  %p3743_p13 = scmp.lt.s32.totalorder %s3741_s11, %s3735_s7 }
  0x66   : > { %p3738_p1 = pneg %p3737_p0  ;;  %p3744_p4 = por %p3743_p13, %p3742_p9 }
  0x68   : > { %p3745_p5 = pnand %p3744_p4, %p3738_p1 }
  0x6a   : > { %3748 = shalt.err (!%p3745_p5)
}
  0x6b   : > { %s3807_s13 = smov 128   ;;  %s3808_s17 = smov 8  }
  0x6c   : > { %3631 = dma.hbm_to_vmem [thread:$0]  (%p3876_p3), %s4073_s12, 16384, %s4077_s15, %s394_s16, %s3807_s13, %s3807_s13, %s3808_s17  }
  0x6d PF: > { %p3211_p2 = scmp.ge.s32.totalorder %s3803_s23, 1  ;;  %p412_p6 = scmp.lt.s32.totalorder %s3803_s23, 3 }
  0x6f   : > { %p413_p7 = pnand %p3211_p2, %p412_p6 }
  0x71   : > { %416 = sbr.rel (%p413_p7) target bundleno = 804 (0x324), region = 55 }
  0x78   : > { %s4106_s24 = sand.u32 1, %s3787_s19  }
  0x79   : > { %s3212_s28 = sshll.u32 %s4106_s24, 9  ;;  %s3213_s8 = sshll.u32 %s4106_s24, 3 }
  0x7a   : > { %s4110_s18 = scalar_lea.vmem [#allocation2], %s3212_s28  ;;  %s426_s27 = scalar_lea.sflag [#allocation4], %s4106_s24 }
  0x7b   : > { %s4113_s14 = scalar_lea.vmem [#allocation3], %s3213_s8 }
  0x7c   : > { %3774 = dma.done.wait (%p3883_p8), %s426_s27, 128  }
  0x7d   : > { %3776 = vsyncadd (%p3883_p8), %s426_s27, 4294967168  ;;  %s3214_s12 = sshll.u32 %s4106_s24, 10  ;;  %s435_s15 = scalar_lea.sflag [#allocation6], %s4106_s24 }
  0x7e   : > { %s4123_s16 = scalar_lea.vmem [#allocation5], %s3214_s12 }
  0x7f   : > { %3778 = dma.done.wait (%p3883_p8), %s435_s15, 16384  }
  0x80   : > { %3780 = vsyncadd (%p3883_p8), %s435_s15, 4294950912  ;;  %v3809_v0 = vmov 0   ;;  %v520_v1 = vld [vmem:[%s4110_s18] sm:$0xff]  ;;  %v521_v3 = vld [vmem:[%s4110_s18 + $0x8] sm:$0xff]  ;;  %vm2039_vm0 = vcmask 1040384   ;;  %p494_p3 = scmp.lt.s32.totalorder %s3795_s21, 1 }
  0x81   : > { %1026 = vmatprep.mubr.bf16.mxu0 %v3809_v0  ;;  %1139 = vmatprep.mubr.bf16.mxu1 %v3809_v0  ;;  %v524_v2 = vld [vmem:[%s4110_s18 + $0x20] sm:$0xff]  ;;  %v525_v5 = vld [vmem:[%s4110_s18 + $0x28] sm:$0xff]  ;;  %v522_v62 = vld [vmem:[%s4110_s18 + $0x10] sm:$0xff]  ;;  %vm2472_vm1 = vcmask 254976   ;;  %p5624_p8 = scmp.ne.s32.totalorder %s5526_s6, 0 }
  0x82   : > { %v3226_v4 = vcombine.high %v520_v1, %v524_v2  ;;  %v3225_v6 = vcombine.low %v520_v1, %v524_v2  ;;  %v528_v7 = vld [vmem:[%s4110_s18 + $0x40] sm:$0xff]  ;;  %v3228_v9 = vcombine.high %v521_v3, %v525_v5  ;;  %v3227_v10 = vcombine.low %v521_v3, %v525_v5  ;;  %v529_v12 = vld [vmem:[%s4110_s18 + $0x48] sm:$0xff]  ;;  %v526_v1 = vld [vmem:[%s4110_s18 + $0x30] sm:$0xff]  ;;  %s495_s24 = scalar_select %p494_p3, %s3795_s21, 1 }
  0x83   : > { %v532_v8 = vld [vmem:[%s4110_s18 + $0x60] sm:$0xff]  ;;  %v533_v13 = vld [vmem:[%s4110_s18 + $0x68] sm:$0xff]  ;;  %v523_v2 = vld [vmem:[%s4110_s18 + $0x18] sm:$0xff]  ;;  %s3361_s11 = sshll.u32 (%p5624_p8), %s3795_s21, 9 }
  0x84   : > { %v3234_v11 = vcombine.high %v528_v7, %v532_v8  ;;  %v536_v14 = vld [vmem:[%s4110_s18 + $0x80] sm:$0xff]  ;;  %994 = vmatprep.subr.bf16.mxu0 %v3226_v4  ;;  %v3236_v15 = vcombine.high %v529_v12, %v533_v13  ;;  %v537_v17 = vld [vmem:[%s4110_s18 + $0x88] sm:$0xff]  ;;  %1107 = vmatprep.subr.bf16.mxu1 %v3228_v9  ;;  %v3233_v19 = vcombine.low %v528_v7, %v532_v8  ;;  %v527_v3 = vld [vmem:[%s4110_s18 + $0x38] sm:$0xff]  ;;  %s5199_s28 = scalar_lea.vmem (%p5624_p8), %s5477_s5, %s3361_s11 }
  0x85   : > { %v540_v16 = vld [vmem:[%s4110_s18 + $0xa0] sm:$0xff]  ;;  %v541_v18 = vld [vmem:[%s4110_s18 + $0xa8] sm:$0xff]  ;;  %995 = vmatpush1.bf16.msra.mxu0 %v3225_v6  ;;  %1108 = vmatpush1.bf16.msra.mxu1 %v3227_v10  ;;  %v3235_v20 = vcombine.low %v529_v12, %v533_v13  ;;  %v3230_v6 = vcombine.high %v522_v62, %v526_v1  ;;  %v3232_v7 = vcombine.high %v523_v2, %v527_v3  ;;  %v530_v9 = vld [vmem:[%s4110_s18 + $0x50] sm:$0xff] }
  0x86   : > { %996 = vmatprep.subr.bf16.mxu0 %v3234_v11  ;;  %v3242_v21 = vcombine.high %v536_v14, %v540_v16  ;;  %1109 = vmatprep.subr.bf16.mxu1 %v3236_v15  ;;  %v3244_v22 = vcombine.high %v537_v17, %v541_v18  ;;  %v544_v23 = vld [vmem:[%s4110_s18 + $0xc0] sm:$0xff]  ;;  %v545_v25 = vld [vmem:[%s4110_s18 + $0xc8] sm:$0xff]  ;;  %v3241_v27 = vcombine.low %v536_v14, %v540_v16  ;;  %v534_v10 = vld [vmem:[%s4110_s18 + $0x70] sm:$0xff] }
  0x87   : > { %v548_v24 = vld [vmem:[%s4110_s18 + $0xe0] sm:$0xff]  ;;  %v549_v26 = vld [vmem:[%s4110_s18 + $0xe8] sm:$0xff]  ;;  %v3243_v28 = vcombine.low %v537_v17, %v541_v18  ;;  %v3229_v11 = vcombine.low %v522_v62, %v526_v1  ;;  %v531_v12 = vld [vmem:[%s4110_s18 + $0x58] sm:$0xff]  ;;  %v3238_v14 = vcombine.high %v530_v9, %v534_v10  ;;  %v3231_v17 = vcombine.low %v523_v2, %v527_v3 }
  0x88   : > { %v3250_v29 = vcombine.high %v544_v23, %v548_v24  ;;  %v3252_v30 = vcombine.high %v545_v25, %v549_v26  ;;  %v552_v31 = vld [vmem:[%s4110_s18 + $0x100] sm:$0xff]  ;;  %v553_v33 = vld [vmem:[%s4110_s18 + $0x108] sm:$0xff]  ;;  %v3249_v35 = vcombine.low %v544_v23, %v548_v24  ;;  %v3251_v36 = vcombine.low %v545_v25, %v549_v26  ;;  %v535_v13 = vld [vmem:[%s4110_s18 + $0x78] sm:$0xff] }
  0x89   : > { %997 = vmatpush1.bf16.msra.mxu0 %v3233_v19  ;;  %1110 = vmatpush1.bf16.msra.mxu1 %v3235_v20  ;;  %v556_v32 = vld [vmem:[%s4110_s18 + $0x120] sm:$0xff]  ;;  %v557_v34 = vld [vmem:[%s4110_s18 + $0x128] sm:$0xff]  ;;  %v538_v15 = vld [vmem:[%s4110_s18 + $0x90] sm:$0xff]  ;;  %v3240_v18 = vcombine.high %v531_v12, %v535_v13  ;;  %v3237_v19 = vcombine.low %v530_v9, %v534_v10  ;;  %v3239_v23 = vcombine.low %v531_v12, %v535_v13 }
  0x8a   : > { %998 = vmatprep.subr.bf16.mxu0 %v3242_v21  ;;  %1111 = vmatprep.subr.bf16.mxu1 %v3244_v22  ;;  %v3258_v37 = vcombine.high %v552_v31, %v556_v32  ;;  %v560_v38 = vld [vmem:[%s4110_s18 + $0x140] sm:$0xff]  ;;  %v3260_v39 = vcombine.high %v553_v33, %v557_v34  ;;  %v561_v41 = vld [vmem:[%s4110_s18 + $0x148] sm:$0xff]  ;;  %v3257_v43 = vcombine.low %v552_v31, %v556_v32  ;;  %v542_v16 = vld [vmem:[%s4110_s18 + $0xb0] sm:$0xff] }
  0x8b   : > { %v564_v40 = vld [vmem:[%s4110_s18 + $0x160] sm:$0xff]  ;;  %v565_v42 = vld [vmem:[%s4110_s18 + $0x168] sm:$0xff]  ;;  %v3259_v44 = vcombine.low %v553_v33, %v557_v34  ;;  %v539_v20 = vld [vmem:[%s4110_s18 + $0x98] sm:$0xff]  ;;  %v3246_v22 = vcombine.high %v538_v15, %v542_v16 }
  0x8c   : > { %v3266_v45 = vcombine.high %v560_v38, %v564_v40  ;;  %v3268_v46 = vcombine.high %v561_v41, %v565_v42  ;;  %v568_v47 = vld [vmem:[%s4110_s18 + $0x180] sm:$0xff]  ;;  %v569_v49 = vld [vmem:[%s4110_s18 + $0x188] sm:$0xff]  ;;  %v3265_v51 = vcombine.low %v560_v38, %v564_v40  ;;  %v3267_v52 = vcombine.low %v561_v41, %v565_v42  ;;  %v543_v21 = vld [vmem:[%s4110_s18 + $0xb8] sm:$0xff] }
  0x8d   : > { %999 = vmatpush1.bf16.msra.mxu0 %v3241_v27  ;;  %1112 = vmatpush1.bf16.msra.mxu1 %v3243_v28  ;;  %v572_v48 = vld [vmem:[%s4110_s18 + $0x1a0] sm:$0xff]  ;;  %v573_v50 = vld [vmem:[%s4110_s18 + $0x1a8] sm:$0xff]  ;;  %v546_v25 = vld [vmem:[%s4110_s18 + $0xd0] sm:$0xff]  ;;  %v3248_v27 = vcombine.high %v539_v20, %v543_v21  ;;  %v3247_v32 = vcombine.low %v539_v20, %v543_v21 }
  0x8e   : > { %1000 = vmatprep.subr.bf16.mxu0 %v3250_v29  ;;  %1113 = vmatprep.subr.bf16.mxu1 %v3252_v30  ;;  %v3274_v53 = vcombine.high %v568_v47, %v572_v48  ;;  %v3276_v54 = vcombine.high %v569_v49, %v573_v50  ;;  %v576_v55 = vld [vmem:[%s4110_s18 + $0x1c0] sm:$0xff]  ;;  %v577_v57 = vld [vmem:[%s4110_s18 + $0x1c8] sm:$0xff]  ;;  %v3273_v59 = vcombine.low %v568_v47, %v572_v48  ;;  %v550_v26 = vld [vmem:[%s4110_s18 + $0xf0] sm:$0xff] }
  0x8f   : > { %v580_v56 = vld [vmem:[%s4110_s18 + $0x1e0] sm:$0xff]  ;;  %v581_v58 = vld [vmem:[%s4110_s18 + $0x1e8] sm:$0xff]  ;;  %v3275_v60 = vcombine.low %v569_v49, %v573_v50  ;;  %v547_v28 = vld [vmem:[%s4110_s18 + $0xd8] sm:$0xff]  ;;  %v3245_v30 = vcombine.low %v538_v15, %v542_v16  ;;  %v3254_v31 = vcombine.high %v546_v25, %v550_v26  ;;  %v3253_v38 = vcombine.low %v546_v25, %v550_v26 }
  0x90   : > { %v3282_v61 = vcombine.high %v576_v55, %v580_v56  ;;  %v3284_v63 = vcombine.high %v577_v57, %v581_v58  ;;  %v3281_v4 = vcombine.low %v576_v55, %v580_v56  ;;  %v3283_v5 = vcombine.low %v577_v57, %v581_v58  ;;  %v4170_v8 = vld [vmem:[%s5472_s0] sm:$0xff]   ;;  %v4187_v24 = vld [vmem:[%s5472_s0 + $0x8] sm:$0xff]   ;;  %v551_v29 = vld [vmem:[%s4110_s18 + $0xf8] sm:$0xff] }
  0x91   : > { %1001 = vmatpush1.bf16.msra.mxu0 %v3249_v35  ;;  %1114 = vmatpush1.bf16.msra.mxu1 %v3251_v36  ;;  %v554_v33 = vld [vmem:[%s4110_s18 + $0x110] sm:$0xff]  ;;  %v3256_v35 = vcombine.high %v547_v28, %v551_v29  ;;  %v555_v36 = vld [vmem:[%s4110_s18 + $0x118] sm:$0xff]  ;;  %v3255_v40 = vcombine.low %v547_v28, %v551_v29  ;;  %v3690_v9 = vld [vmem:[%s5472_s0 + $0x28] sm:$0xff]  }
  0x92   : > { %1002 = vmatprep.subr.bf16.mxu0 %v3258_v37  ;;  %1115 = vmatprep.subr.bf16.mxu1 %v3260_v39  ;;  %v558_v34 = vld [vmem:[%s4110_s18 + $0x130] sm:$0xff]  ;;  %v559_v37 = vld [vmem:[%s4110_s18 + $0x138] sm:$0xff]  ;;  %v2115_v26 = vld [vmem:[%s4123_s16 + $0x198] sm:$0xff] }
  0x93   : > { %v3262_v39 = vcombine.high %v554_v33, %v558_v34  ;;  %v4204_v41 = vld [vmem:[%s5472_s0 + $0x10] sm:$0xff]   ;;  %v3261_v47 = vcombine.low %v554_v33, %v558_v34  ;;  %v3263_v49 = vcombine.low %v555_v36, %v559_v37  ;;  %v3688_v58 = vld [vmem:[%s5472_s0 + $0x18] sm:$0xff]   ;;  %v2067_v28 = vld [vmem:[%s4123_s16 + $0x18] sm:$0xff] }
  0x94   : > { %v562_v42 = vld [vmem:[%s4110_s18 + $0x150] sm:$0xff]  ;;  %v579_v62 = vld [vmem:[%s4110_s18 + $0x1d8] sm:$0xff] }
  0x95   : > { %1003 = vmatpush1.bf16.msra.mxu0 %v3257_v43  ;;  %1116 = vmatpush1.bf16.msra.mxu1 %v3259_v44  ;;  %v566_v43 = vld [vmem:[%s4110_s18 + $0x170] sm:$0xff]  ;;  %v3264_v44 = vcombine.high %v555_v36, %v559_v37  ;;  %v2081_v12 = vld [vmem:[%s4123_s16 + $0x88] sm:$0xff] }
  0x96   : > { %1004 = vmatprep.subr.bf16.mxu0 %v3266_v45  ;;  %1117 = vmatprep.subr.bf16.mxu1 %v3268_v46  ;;  %v563_v45 = vld [vmem:[%s4110_s18 + $0x158] sm:$0xff]  ;;  %v3270_v48 = vcombine.high %v562_v42, %v566_v43  ;;  %v570_v50 = vld [vmem:[%s4110_s18 + $0x190] sm:$0xff]  ;;  %v3269_v55 = vcombine.low %v562_v42, %v566_v43 }
  0x97   : > { %v567_v46 = vld [vmem:[%s4110_s18 + $0x178] sm:$0xff]  ;;  %v3691_v10 = vld [vmem:[%s5472_s0 + $0x30] sm:$0xff]  }
  0x98   : > { %v3271_v57 = vcombine.low %v563_v45, %v567_v46  ;;  %v2112_v13 = vld [vmem:[%s4123_s16 + $0x180] sm:$0xff]  ;;  %v2113_v15 = vld [vmem:[%s4123_s16 + $0x188] sm:$0xff] }
  0x99   : > { %1005 = vmatpush1.bf16.msra.mxu0 %v3265_v51  ;;  %1118 = vmatpush1.bf16.msra.mxu1 %v3267_v52  ;;  %v574_v51 = vld [vmem:[%s4110_s18 + $0x1b0] sm:$0xff]  ;;  %v3272_v52 = vcombine.high %v563_v45, %v567_v46  ;;  %v2086_v46 = vld [vmem:[%s4123_s16 + $0xb0] sm:$0xff] }
  0x9a   : > { %1006 = vmatprep.subr.bf16.mxu0 %v3274_v53  ;;  %1119 = vmatprep.subr.bf16.mxu1 %v3276_v54  ;;  %v571_v53 = vld [vmem:[%s4110_s18 + $0x198] sm:$0xff]  ;;  %v3278_v56 = vcombine.high %v570_v50, %v574_v51  ;;  %v3277_v1 = vcombine.low %v570_v50, %v574_v51  ;;  %v2064_v16 = vld [vmem:[%s4123_s16] sm:$0xff]  ;;  %v2119_v50 = vld [vmem:[%s4123_s16 + $0x1b8] sm:$0xff] }
  0x9b   : > { %v575_v54 = vld [vmem:[%s4110_s18 + $0x1b8] sm:$0xff]  ;;  %v2096_v20 = vld [vmem:[%s4123_s16 + $0x100] sm:$0xff]  ;;  %v2070_v51 = vld [vmem:[%s4123_s16 + $0x30] sm:$0xff] }
  0x9c   : > { %v3279_v3 = vcombine.low %v571_v53, %v575_v54  ;;  %v2084_v34 = vld [vmem:[%s4123_s16 + $0xa0] sm:$0xff] }
  0x9d   : > { %1007 = vmatpush1.bf16.msra.mxu0 %v3273_v59  ;;  %1120 = vmatpush1.bf16.msra.mxu1 %v3275_v60  ;;  %v578_v59 = vld [vmem:[%s4110_s18 + $0x1d0] sm:$0xff] }
  0x9e   : > { %1008 = vmatprep.subr.bf16.mxu0 %v3282_v61  ;;  %1121 = vmatprep.subr.bf16.mxu1 %v3284_v63  ;;  %v582_v60 = vld [vmem:[%s4110_s18 + $0x1f0] sm:$0xff]  ;;  %v3280_v61 = vcombine.high %v571_v53, %v575_v54  ;;  %v583_v63 = vld [vmem:[%s4110_s18 + $0x1f8] sm:$0xff] }
  0x9f   : > { %v3286_v2 = vcombine.high %v578_v59, %v582_v60  ;;  %v2116_v36 = vld [vmem:[%s4123_s16 + $0x1a0] sm:$0xff] }
  0xa0   : > { %v2100_v43 = vld [vmem:[%s4123_s16 + $0x120] sm:$0xff] }
  0xa1   : > { %1009 = vmatpush1.bf16.msra.mxu0 %v3281_v4  ;;  %1122 = vmatpush1.bf16.msra.mxu1 %v3283_v5  ;;  %v3288_v4 = vcombine.high %v579_v62, %v583_v63  ;;  %v3285_v5 = vcombine.low %v578_v59, %v582_v60  ;;  %v2089_v59 = vld [vmem:[%s4123_s16 + $0xc8] sm:$0xff]  ;;  %v2120_v60 = vld [vmem:[%s4123_s16 + $0x1c0] sm:$0xff] }
  0xa2   : > { %1220 = vmatprep.subr.bf16.mxu0 %v3230_v6  ;;  %1333 = vmatprep.subr.bf16.mxu1 %v3232_v7  ;;  %v3287_v6 = vcombine.low %v579_v62, %v583_v63  ;;  %v3689_v7 = vld [vmem:[%s5472_s0 + $0x20] sm:$0xff]   ;;  %v2121_v62 = vld [vmem:[%s4123_s16 + $0x1c8] sm:$0xff]  ;;  %v2072_v63 = vld [vmem:[%s4123_s16 + $0x40] sm:$0xff] }
  0xa4   : > { %1027 = vmatmul.mubr.bf16.vlgmr.msra.gmra.mrb[0].mxu0 %v4170_v8  ;;  %1140 = vmatmul.mubr.bf16.vlgmr.msra.gmra.mrb[0].mxu1 %v4170_v8 }
  0xa5   : > { %1221 = vmatpush1.bf16.msra.mxu0 %v3229_v11  ;;  %1036 = vmatprep.mubr.bf16.mxu0 %v3809_v0  ;;  %v3692_v11 = vld [vmem:[%s5472_s0 + $0x38] sm:$0xff]  }
  0xa6   : > { %1149 = vmatprep.mubr.bf16.mxu1 %v3809_v0  ;;  %1222 = vmatprep.subr.bf16.mxu0 %v3238_v14 }
  0xa7   : > { %1334 = vmatpush1.bf16.msra.mxu1 %v3231_v17  ;;  %v2065_v17 = vld [vmem:[%s4123_s16 + $0x8] sm:$0xff] }
  0xa8   : > { %1335 = vmatprep.subr.bf16.mxu1 %v3240_v18  ;;  %v3534_v18 = vpack.c.bf16 %v2113_v15, %v2112_v13  ;;  %v2075_v13 = vld [vmem:[%s4123_s16 + $0x58] sm:$0xff] }
  0xa9   : > { %1223 = vmatpush1.bf16.msra.mxu0 %v3237_v19  ;;  %v3504_v19 = vpack.c.bf16 %v2065_v17, %v2064_v16  ;;  %v2106_v16 = vld [vmem:[%s4123_s16 + $0x150] sm:$0xff]  ;;  %v2107_v17 = vld [vmem:[%s4123_s16 + $0x158] sm:$0xff] }
  0xaa   : > { %1224 = vmatprep.subr.bf16.mxu0 %v3246_v22  ;;  %v2082_v22 = vld [vmem:[%s4123_s16 + $0x90] sm:$0xff] }
  0xab   : > { %1336 = vmatpush1.bf16.msra.mxu1 %v3239_v23  ;;  %v2083_v23 = vld [vmem:[%s4123_s16 + $0x98] sm:$0xff] }
  0xac   : > { %1037 = vmatmul.mubr.bf16.gmra.mrb[4].mxu0 %v4187_v24  ;;  %1337 = vmatprep.subr.bf16.mxu1 %v3248_v27  ;;  %v3506_v25 = vpack.c.bf16 %v2083_v23, %v2082_v22  ;;  %v2066_v27 = vld [vmem:[%s4123_s16 + $0x10] sm:$0xff]  ;;  %v2125_v22 = vld [vmem:[%s4123_s16 + $0x1e8] sm:$0xff]  ;;  %v2076_v23 = vld [vmem:[%s4123_s16 + $0x60] sm:$0xff] }
  0xad   : > { %1150 = vmatmul.mubr.bf16.gmra.mrb[4].mxu1 %v4187_v24  ;;  %1046 = vmatprep.mubr.bf16.mxu0 %v3809_v0 }
  0xae   : > { %1159 = vmatprep.mubr.bf16.mxu1 %v3809_v0  ;;  %1225 = vmatpush1.bf16.msra.mxu0 %v3245_v30  ;;  %v3508_v30 = vpack.c.bf16 %v2067_v28, %v2066_v27  ;;  %v2108_v27 = vld [vmem:[%s4123_s16 + $0x160] sm:$0xff]  ;;  %v2109_v28 = vld [vmem:[%s4123_s16 + $0x168] sm:$0xff] }
  0xaf   : > { %1226 = vmatprep.subr.bf16.mxu0 %v3254_v31  ;;  %1338 = vmatpush1.bf16.msra.mxu1 %v3247_v32  ;;  %v2098_v31 = vld [vmem:[%s4123_s16 + $0x110] sm:$0xff]  ;;  %v2099_v32 = vld [vmem:[%s4123_s16 + $0x118] sm:$0xff] }
  0xb0   : > { %1339 = vmatprep.subr.bf16.mxu1 %v3256_v35  ;;  %v3540_v33 = vpack.c.bf16 %v2099_v32, %v2098_v31  ;;  %v2085_v35 = vld [vmem:[%s4123_s16 + $0xa8] sm:$0xff]  ;;  %v2095_v31 = vld [vmem:[%s4123_s16 + $0xf8] sm:$0xff]  ;;  %v2126_v32 = vld [vmem:[%s4123_s16 + $0x1f0] sm:$0xff] }
  0xb1   : > { %v3510_v37 = vpack.c.bf16 %v2085_v35, %v2084_v34  ;;  %v2127_v34 = vld [vmem:[%s4123_s16 + $0x1f8] sm:$0xff]  ;;  %v2078_v35 = vld [vmem:[%s4123_s16 + $0x70] sm:$0xff] }
  0xb2   : > { %1227 = vmatpush1.bf16.msra.mxu0 %v3253_v38  ;;  %v2117_v38 = vld [vmem:[%s4123_s16 + $0x1a8] sm:$0xff] }
  0xb3   : > { %1228 = vmatprep.subr.bf16.mxu0 %v3262_v39  ;;  %1340 = vmatpush1.bf16.msra.mxu1 %v3255_v40  ;;  %v2068_v39 = vld [vmem:[%s4123_s16 + $0x20] sm:$0xff]  ;;  %v2069_v40 = vld [vmem:[%s4123_s16 + $0x28] sm:$0xff] }
  0xb4   : > { %1047 = vmatmul.mubr.bf16.gmra.mrb[8].mxu0 %v4204_v41  ;;  %1341 = vmatprep.subr.bf16.mxu1 %v3264_v44  ;;  %v3512_v42 = vpack.c.bf16 %v2069_v40, %v2068_v39  ;;  %v2101_v44 = vld [vmem:[%s4123_s16 + $0x128] sm:$0xff]  ;;  %v2110_v39 = vld [vmem:[%s4123_s16 + $0x170] sm:$0xff]  ;;  %v2111_v40 = vld [vmem:[%s4123_s16 + $0x178] sm:$0xff] }
  0xb5   : > { %1160 = vmatmul.mubr.bf16.gmra.mrb[8].mxu1 %v4204_v41  ;;  %1056 = vmatprep.mubr.bf16.mxu0 %v3809_v0  ;;  %v3544_v45 = vpack.c.bf16 %v2101_v44, %v2100_v43  ;;  %v2145_v43 = vld [vmem:[%s4123_s16 + $0x288] sm:$0xff]  ;;  %v2176_v44 = vld [vmem:[%s4123_s16 + $0x380] sm:$0xff] }
  0xb6   : > { %1169 = vmatprep.mubr.bf16.mxu1 %v3809_v0  ;;  %1229 = vmatpush1.bf16.msra.mxu0 %v3261_v47  ;;  %v2087_v47 = vld [vmem:[%s4123_s16 + $0xb8] sm:$0xff] }
  0xb7   : > { %1230 = vmatprep.subr.bf16.mxu0 %v3270_v48  ;;  %1342 = vmatpush1.bf16.msra.mxu1 %v3263_v49  ;;  %v2118_v48 = vld [vmem:[%s4123_s16 + $0x1b0] sm:$0xff]  ;;  %v3514_v49 = vpack.c.bf16 %v2087_v47, %v2086_v46  ;;  %v2177_v47 = vld [vmem:[%s4123_s16 + $0x388] sm:$0xff] }
  0xb8   : > { %1343 = vmatprep.subr.bf16.mxu1 %v3272_v52  ;;  %v2071_v52 = vld [vmem:[%s4123_s16 + $0x38] sm:$0xff]  ;;  %v3546_v53 = vpack.c.bf16 %v2119_v50, %v2118_v48  ;;  %v3598_v48 = vpack.c.bf16 %v2177_v47, %v2176_v44 }
  0xb9   : > { %v3516_v54 = vpack.c.bf16 %v2071_v52, %v2070_v51  ;;  %v4339_v51 = vld [vmem:[%s4113_s14] sm:$0xff]  ;;  %s4990_s14 = scalar_lea.vmem [#allocation7], %s3214_s12  ;;  %s3216_s12 = sshll.u32 %s495_s24, 1 }
  0xba   : > { %1231 = vmatpush1.bf16.msra.mxu0 %v3269_v55  ;;  %v2102_v55 = vld [vmem:[%s4123_s16 + $0x130] sm:$0xff]  ;;  %s500_s10 = scalar_lea.vmem %s5476_s4, %s3216_s12 }
  0xbb   : > { %1232 = vmatprep.subr.bf16.mxu0 %v3278_v56  ;;  %1344 = vmatpush1.bf16.msra.mxu1 %v3271_v57  ;;  %v2103_v56 = vld [vmem:[%s4123_s16 + $0x138] sm:$0xff] }
  0xbc   : > { %1057 = vmatmul.mubr.bf16.gmra.mrb[12].mxu0 %v3688_v58  ;;  %1345 = vmatprep.subr.bf16.mxu1 %v3280_v61  ;;  %v3548_v57 = vpack.c.bf16 %v2103_v56, %v2102_v55 }
  0xbd   : > { %1170 = vmatmul.mubr.bf16.gmra.mrb[12].mxu1 %v3688_v58  ;;  %1066 = vmatprep.mubr.bf16.mxu0 %v3809_v0 }
  0xbe   : > { %1179 = vmatprep.mubr.bf16.mxu1 %v3809_v0  ;;  %1233 = vmatpush1.bf16.msra.mxu0 %v3277_v1  ;;  %v2073_v1 = vld [vmem:[%s4123_s16 + $0x48] sm:$0xff] }
  0xbf   : > { %1234 = vmatprep.subr.bf16.mxu0 %v3286_v2  ;;  %1346 = vmatpush1.bf16.msra.mxu1 %v3279_v3  ;;  %v3550_v2 = vpack.c.bf16 %v2121_v62, %v2120_v60  ;;  %v3520_v3 = vpack.c.bf16 %v2073_v1, %v2072_v63 }
  0xc0   : > { %1347 = vmatprep.subr.bf16.mxu1 %v3288_v4  ;;  %v2104_v4 = vld [vmem:[%s4123_s16 + $0x140] sm:$0xff] }
  0xc2   : > { %1235 = vmatpush1.bf16.msra.mxu0 %v3285_v5  ;;  %v2105_v5 = vld [vmem:[%s4123_s16 + $0x148] sm:$0xff] }
  0xc3   : > { %1348 = vmatpush1.bf16.msra.mxu1 %v3287_v6  ;;  %v3552_v6 = vpack.c.bf16 %v2105_v5, %v2104_v4 }
  0xc4   : > { %1067 = vmatmul.mubr.bf16.gmra.mrb[16].mxu0 %v3689_v7  ;;  %3535 = vmatprep.subr.bf16.mxu1 %v3534_v18  ;;  %v3556_v18 = vpack.c.bf16 %v2107_v17, %v2106_v16 }
  0xc5   : > { %1180 = vmatmul.mubr.bf16.gmra.mrb[16].mxu1 %v3689_v7  ;;  %1076 = vmatprep.mubr.bf16.mxu0 %v3809_v0 }
  0xc6   : > { %1189 = vmatprep.mubr.bf16.mxu1 %v3809_v0 }
  0xcc   : > { %1077 = vmatmul.mubr.bf16.gmra.mrb[20].mxu0 %v3690_v9 }
  0xcd   : > { %1190 = vmatmul.mubr.bf16.gmra.mrb[20].mxu1 %v3690_v9  ;;  %1086 = vmatprep.mubr.bf16.mxu0 %v3809_v0 }
  0xce   : > { %1199 = vmatprep.mubr.bf16.mxu1 %v3809_v0 }
  0xd4   : > { %1087 = vmatmul.mubr.bf16.gmra.mrb[24].mxu0 %v3691_v10 }
  0xd5   : > { %1200 = vmatmul.mubr.bf16.gmra.mrb[24].mxu1 %v3691_v10  ;;  %1096 = vmatprep.mubr.bf16.mxu0 %v3809_v0 }
  0xd6   : > { %1209 = vmatprep.mubr.bf16.mxu1 %v3809_v0 }
  0xdc   : > { %1097 = vmatmul.mubr.bf16.gmra.mrb[28].mxu0 %v3692_v11 }
  0xdd   : > { %1210 = vmatmul.mubr.bf16.gmra.mrb[28].mxu1 %v3692_v11  ;;  %1252 = vmatprep.mubr.bf16.mxu0 %v3809_v0 }
  0xde   : > { %1365 = vmatprep.mubr.bf16.mxu1 %v3809_v0 }
  0xe4   : > { %1253 = vmatmul.mubr.bf16.vlgmr.msra.gmra.mrb[32].mxu0 %v4170_v8 }
  0xe5   : > { %1366 = vmatmul.mubr.bf16.vlgmr.msra.gmra.mrb[32].mxu1 %v4170_v8  ;;  %1262 = vmatprep.mubr.bf16.mxu0 %v3809_v0  ;;  %v2080_v8 = vld [vmem:[%s4123_s16 + $0x80] sm:$0xff] }
  0xe6   : > { %1375 = vmatprep.mubr.bf16.mxu1 %v3809_v0  ;;  %v3502_v14 = vpack.c.bf16 %v2081_v12, %v2080_v8  ;;  %v2123_v8 = vld [vmem:[%s4123_s16 + $0x1d8] sm:$0xff]  ;;  %v2074_v12 = vld [vmem:[%s4123_s16 + $0x50] sm:$0xff] }
  0xe7   : > { %v3524_v15 = vpack.c.bf16 %v2075_v13, %v2074_v12 }
  0xe8   : > { %3503 = vmatprep.subr.bf16.mxu0 %v3502_v14 }
  0xe9   : > { %3505 = vmatpush3.bf16.msra.mxu0 %v3504_v19  ;;  %v2092_v19 = vld [vmem:[%s4123_s16 + $0xe0] sm:$0xff] }
  0xea   : > { %3507 = vmatprep.subr.bf16.mxu0 %v3506_v25 }
  0xec   : > { %1263 = vmatmul.mubr.bf16.gmra.mrb[36].mxu0 %v4187_v24 }
  0xed   : > { %1376 = vmatmul.mubr.bf16.gmra.mrb[36].mxu1 %v4187_v24  ;;  %1272 = vmatprep.mubr.bf16.mxu0 %v3809_v0  ;;  %v2114_v24 = vld [vmem:[%s4123_s16 + $0x190] sm:$0xff] }
  0xee   : > { %1385 = vmatprep.mubr.bf16.mxu1 %v3809_v0  ;;  %v3538_v29 = vpack.c.bf16 %v2115_v26, %v2114_v24  ;;  %3509 = vmatpush3.bf16.msra.mxu0 %v3508_v30  ;;  %v2077_v24 = vld [vmem:[%s4123_s16 + $0x68] sm:$0xff]  ;;  %v2094_v30 = vld [vmem:[%s4123_s16 + $0xf0] sm:$0xff] }
  0xef   : > { %3511 = vmatprep.subr.bf16.mxu0 %v3510_v37  ;;  %v3528_v26 = vpack.c.bf16 %v2077_v24, %v2076_v23  ;;  %v3562_v37 = vpack.c.bf16 %v2127_v34, %v2126_v32 }
  0xf2   : > { %3513 = vmatpush3.bf16.msra.mxu0 %v3512_v42  ;;  %v2144_v42 = vld [vmem:[%s4123_s16 + $0x280] sm:$0xff] }
  0xf3   : > { %3515 = vmatprep.subr.bf16.mxu0 %v3514_v49  ;;  %v3566_v46 = vpack.c.bf16 %v2145_v43, %v2144_v42 }
  0xf4   : > { %1273 = vmatmul.mubr.bf16.gmra.mrb[40].mxu0 %v4204_v41 }
  0xf5   : > { %1386 = vmatmul.mubr.bf16.gmra.mrb[40].mxu1 %v4204_v41  ;;  %1282 = vmatprep.mubr.bf16.mxu0 %v3809_v0  ;;  %v3542_v41 = vpack.c.bf16 %v2117_v38, %v2116_v36  ;;  %v2079_v36 = vld [vmem:[%s4123_s16 + $0x78] sm:$0xff] }
  0xf6   : > { %1395 = vmatprep.mubr.bf16.mxu1 %v3809_v0  ;;  %3517 = vmatpush3.bf16.msra.mxu0 %v3516_v54  ;;  %v3532_v38 = vpack.c.bf16 %v2079_v36, %v2078_v35 }
  0xfc   : > { %1283 = vmatmul.mubr.bf16.gmra.mrb[44].mxu0 %v3688_v58 }
  0xfd   : > { %1396 = vmatmul.mubr.bf16.gmra.mrb[44].mxu1 %v3688_v58  ;;  %1292 = vmatprep.mubr.bf16.mxu0 %v3809_v0  ;;  %v2088_v58 = vld [vmem:[%s4123_s16 + $0xc0] sm:$0xff] }
  0xfe   : > { %1405 = vmatprep.mubr.bf16.mxu1 %v3809_v0  ;;  %v3518_v61 = vpack.c.bf16 %v2089_v59, %v2088_v58 }
 0x100   : > { %3519 = vmatprep.subr.bf16.mxu0 %v3518_v61 }
 0x101   : > { %3521 = vmatpush3.bf16.msra.mxu0 %v3520_v3 }
 0x104   : > { %1293 = vmatmul.mubr.bf16.gmra.mrb[48].mxu0 %v3689_v7 }
 0x105   : > { %1406 = vmatmul.mubr.bf16.gmra.mrb[48].mxu1 %v3689_v7  ;;  %1302 = vmatprep.mubr.bf16.mxu0 %v3809_v0  ;;  %v2090_v7 = vld [vmem:[%s4123_s16 + $0xd0] sm:$0xff] }
 0x106   : > { %1415 = vmatprep.mubr.bf16.mxu1 %v3809_v0 }
 0x10c   : > { %1303 = vmatmul.mubr.bf16.gmra.mrb[52].mxu0 %v3690_v9 }
 0x10d   : > { %1416 = vmatmul.mubr.bf16.gmra.mrb[52].mxu1 %v3690_v9  ;;  %1312 = vmatprep.mubr.bf16.mxu0 %v3809_v0  ;;  %v2091_v9 = vld [vmem:[%s4123_s16 + $0xd8] sm:$0xff] }
 0x10e   : > { %1425 = vmatprep.mubr.bf16.mxu1 %v3809_v0 }
 0x114   : > { %1313 = vmatmul.mubr.bf16.gmra.mrb[56].mxu0 %v3691_v10 }
 0x115   : > { %1426 = vmatmul.mubr.bf16.gmra.mrb[56].mxu1 %v3691_v10  ;;  %1322 = vmatprep.mubr.bf16.mxu0 %v3809_v0  ;;  %v2122_v10 = vld [vmem:[%s4123_s16 + $0x1d0] sm:$0xff] }
 0x116   : > { %1435 = vmatprep.mubr.bf16.mxu1 %v3809_v0  ;;  %v2097_v0 = vld [vmem:[%s4123_s16 + $0x108] sm:$0xff]  ;;  %v3554_v14 = vpack.c.bf16 %v2123_v8, %v2122_v10 }
 0x117   : > { %v3536_v21 = vpack.c.bf16 %v2097_v0, %v2096_v20  ;;  %v2093_v20 = vld [vmem:[%s4123_s16 + $0xe8] sm:$0xff]  ;;  %v2124_v0 = vld [vmem:[%s4123_s16 + $0x1e0] sm:$0xff] }
 0x118   : > { %v3558_v25 = vpack.c.bf16 %v2125_v22, %v2124_v0 }
 0x119   : > { %3537 = vmatpush3.bf16.msra.mxu1 %v3536_v21  ;;  %v3526_v21 = vpack.c.bf16 %v2093_v20, %v2092_v19 }
 0x11a   : > { %3539 = vmatprep.subr.bf16.mxu1 %v3538_v29  ;;  %v3560_v29 = vpack.c.bf16 %v2109_v28, %v2108_v27 }
 0x11c   : > { %1323 = vmatmul.mubr.bf16.gmra.mrb[60].mxu0 %v3692_v11 }
 0x11d   : > { %1436 = vmatmul.mubr.bf16.gmra.mrb[60].mxu1 %v3692_v11  ;;  %v3522_v11 = vpack.c.bf16 %v2091_v9, %v2090_v7 }
 0x11e   : > { %3541 = vmatpush3.bf16.msra.mxu1 %v3540_v33  ;;  %v3530_v33 = vpack.c.bf16 %v2095_v31, %v2094_v30 }
 0x11f   : > { %3543 = vmatprep.subr.bf16.mxu1 %v3542_v41  ;;  %3523 = vmatprep.subr.bf16.mxu0 %v3522_v11  ;;  %v3564_v41 = vpack.c.bf16 %v2111_v40, %v2110_v39 }
 0x120   : > { %3525 = vmatpush3.bf16.msra.mxu0 %v3524_v15 }
 0x121   : > { %3527 = vmatprep.subr.bf16.mxu0 %v3526_v21 }
 0x122   : > { %3545 = vmatpush3.bf16.msra.mxu1 %v3544_v45  ;;  %v586_v45 = vlaneseq }
 0x123   : > { %3547 = vmatprep.subr.bf16.mxu1 %v3546_v53 }
 0x124   : > { %3529 = vmatpush3.bf16.msra.mxu0 %v3528_v26  ;;  %v4335_v49 = vshrl.u32 %v586_v45, 7 }
 0x125   : > { %3531 = vmatprep.subr.bf16.mxu0 %v3530_v33 }
 0x126   : > { %3549 = vmatpush3.bf16.msra.mxu1 %v3548_v57  ;;  %v588_v50 = vsub.s32 0, %v4335_v49  ;;  %v592_v52 = vsub.s32 1, %v4335_v49  ;;  %v596_v53 = vsub.s32 2, %v4335_v49  ;;  %v600_v54 = vsub.s32 3, %v4335_v49 }
 0x127   : > { %3551 = vmatprep.subr.bf16.mxu1 %v3550_v2 }
 0x128   : > { %3533 = vmatpush3.bf16.msra.mxu0 %v3532_v38  ;;  %v4345_v55 = vrot.slane %v4339_v51, %v588_v50  ;;  %v4348_v56 = vrot.slane %v4339_v51, %v592_v52  ;;  %v4351_v57 = vrot.slane %v4339_v51, %v596_v53  ;;  %v4354_v58 = vrot.slane %v4339_v51, %v600_v54 }
 0x129   : > { %3567 = vmatprep.subr.bf16.mxu0 %v3566_v46 }
 0x12a   : > { %3553 = vmatpush3.bf16.msra.mxu1 %v3552_v6 }
 0x12b   : > { %3555 = vmatprep.subr.bf16.mxu1 %v3554_v14 }
 0x12e   : > { %3557 = vmatpush3.bf16.msra.mxu1 %v3556_v18 }
 0x12f   : > { %3559 = vmatprep.subr.bf16.mxu1 %v3558_v25 }
 0x132   : > { %3561 = vmatpush3.bf16.msra.mxu1 %v3560_v29 }
 0x133   : > { %3563 = vmatprep.subr.bf16.mxu1 %v3562_v37 }
 0x136   : > { %3565 = vmatpush3.bf16.msra.mxu1 %v3564_v41 }
 0x137   : > { %3599 = vmatprep.subr.bf16.mxu1 %v3598_v48 }
 0x177   : > { %v1028_v59 = vpop.f32.mrb[0].mxu0  ;;  %v1141_v62 = vpop.f32.mrb[0].mxu1 }
 0x178   : > { %v1029_v60 = vadd.f32 %v1028_v59, %v4345_v55  ;;  %v1030_v61 = vpop.f32.mrb[1].mxu0  ;;  %v4359_v2 = vadd.f32 %v1141_v62, %v4351_v57  ;;  %v1143_v3 = vpop.f32.mrb[1].mxu1 }
 0x179   : > { %v1031_v63 = vadd.f32 %v1030_v61, %v4348_v56  ;;  %v1032_v1 = vpop.f32.mrb[2].mxu0  ;;  %v4363_v6 = vadd.f32 %v1143_v3, %v4354_v58  ;;  %v1145_v7 = vpop.f32.mrb[2].mxu1 }
 0x17a   : > { %v1033_v4 = vadd.f32 %v1032_v1, %v4345_v55  ;;  %v1034_v5 = vpop.f32.mrb[3].mxu0  ;;  %1446 = vxpose.xlu0.b32.start [1/16] %v1029_v60, 128  ;;  %v4367_v10 = vadd.f32 %v1145_v7, %v4351_v57  ;;  %v1147_v11 = vpop.f32.mrb[3].mxu1 }
 0x17b   : > { %v1035_v9 = vadd.f32 %v1034_v5, %v4348_v56  ;;  %1478 = vxpose.xlu1.b32.start [1/16] %v1031_v63, 128  ;;  %v4370_v12 = vadd.f32 %v1147_v11, %v4354_v58 }
 0x17c   : > { %v1638_v8 = vadd.f32 %v1033_v4, %v1029_v60  ;;  %v1664_v14 = vadd.f32 %v4367_v10, %v4359_v2 }
 0x17d   : > { %v1651_v13 = vadd.f32 %v1035_v9, %v1031_v63  ;;  %v1677_v15 = vadd.f32 %v4370_v12, %v4363_v6 }
 0x17e   : > { %1447 = vxpose.xlu0.b32.cont [2/16] %v1033_v4, 128 }
 0x17f   : > { %v1038_v16 = vpop.f32.mrb[4].mxu0  ;;  %1479 = vxpose.xlu1.b32.cont [2/16] %v1035_v9, 128 }
 0x180   : > { %v1039_v17 = vadd.f32 %v1038_v16, %v4345_v55  ;;  %v1040_v18 = vpop.f32.mrb[5].mxu0  ;;  %v1151_v19 = vpop.f32.mrb[4].mxu1 }
 0x181   : > { %v1041_v20 = vadd.f32 %v1040_v18, %v4348_v56  ;;  %v1042_v0 = vpop.f32.mrb[6].mxu0  ;;  %v4379_v21 = vadd.f32 %v1151_v19, %v4351_v57  ;;  %v1153_v22 = vpop.f32.mrb[5].mxu1 }
 0x182   : > { %v1639_v23 = vadd.f32 %v1638_v8, %v1039_v17  ;;  %v1043_v24 = vadd.f32 %v1042_v0, %v4345_v55  ;;  %v1044_v25 = vpop.f32.mrb[7].mxu0  ;;  %1448 = vxpose.xlu0.b32.cont [3/16] %v1039_v17, 128  ;;  %v4383_v26 = vadd.f32 %v1153_v22, %v4354_v58  ;;  %v1155_v27 = vpop.f32.mrb[6].mxu1 }
 0x183   : > { %v1652_v28 = vadd.f32 %v1651_v13, %v1041_v20  ;;  %v1045_v29 = vadd.f32 %v1044_v25, %v4348_v56  ;;  %1480 = vxpose.xlu1.b32.cont [3/16] %v1041_v20, 128  ;;  %v1665_v30 = vadd.f32 %v1664_v14, %v4379_v21  ;;  %v4388_v31 = vadd.f32 %v1155_v27, %v4351_v57  ;;  %v1157_v32 = vpop.f32.mrb[7].mxu1 }
 0x184   : > { %v1640_v33 = vadd.f32 %v1639_v23, %v1043_v24  ;;  %v1678_v34 = vadd.f32 %v1677_v15, %v4383_v26  ;;  %v4392_v35 = vadd.f32 %v1157_v32, %v4354_v58 }
 0x185   : > { %v1653_v36 = vadd.f32 %v1652_v28, %v1045_v29  ;;  %v1666_v37 = vadd.f32 %v1665_v30, %v4388_v31 }
 0x186   : > { %1449 = vxpose.xlu0.b32.cont [4/16] %v1043_v24, 128  ;;  %v1679_v38 = vadd.f32 %v1678_v34, %v4392_v35 }
 0x187   : > { %v1048_v39 = vpop.f32.mrb[8].mxu0  ;;  %1481 = vxpose.xlu1.b32.cont [4/16] %v1045_v29, 128 }
 0x188   : > { %v1049_v40 = vadd.f32 %v1048_v39, %v4345_v55  ;;  %v1050_v41 = vpop.f32.mrb[9].mxu0  ;;  %v1161_v42 = vpop.f32.mrb[8].mxu1 }
 0x189   : > { %v1051_v43 = vadd.f32 %v1050_v41, %v4348_v56  ;;  %v1052_v44 = vpop.f32.mrb[10].mxu0  ;;  %v4399_v45 = vadd.f32 %v1161_v42, %v4351_v57  ;;  %v1163_v46 = vpop.f32.mrb[9].mxu1 }
 0x18a   : > { %v1641_v47 = vadd.f32 %v1640_v33, %v1049_v40  ;;  %v1053_v48 = vadd.f32 %v1052_v44, %v4345_v55  ;;  %v1054_v50 = vpop.f32.mrb[11].mxu0  ;;  %1450 = vxpose.xlu0.b32.cont [5/16] %v1049_v40, 128  ;;  %v4403_v52 = vadd.f32 %v1163_v46, %v4354_v58  ;;  %v1165_v53 = vpop.f32.mrb[10].mxu1 }
 0x18b   : > { %v1654_v54 = vadd.f32 %v1653_v36, %v1051_v43  ;;  %v1055_v59 = vadd.f32 %v1054_v50, %v4348_v56  ;;  %1482 = vxpose.xlu1.b32.cont [5/16] %v1051_v43, 128  ;;  %v1667_v60 = vadd.f32 %v1666_v37, %v4399_v45  ;;  %v4408_v61 = vadd.f32 %v1165_v53, %v4351_v57  ;;  %v1167_v62 = vpop.f32.mrb[11].mxu1 }
 0x18c   : > { %v1642_v63 = vadd.f32 %v1641_v47, %v1053_v48  ;;  %v1680_v1 = vadd.f32 %v1679_v38, %v4403_v52  ;;  %v4412_v3 = vadd.f32 %v1167_v62, %v4354_v58 }
 0x18d   : > { %v1655_v4 = vadd.f32 %v1654_v54, %v1055_v59  ;;  %v1668_v5 = vadd.f32 %v1667_v60, %v4408_v61 }
 0x18e   : > { %1451 = vxpose.xlu0.b32.cont [6/16] %v1053_v48, 128  ;;  %v1681_v7 = vadd.f32 %v1680_v1, %v4412_v3 }
 0x18f   : > { %v1058_v9 = vpop.f32.mrb[12].mxu0  ;;  %1483 = vxpose.xlu1.b32.cont [6/16] %v1055_v59, 128 }
 0x190   : > { %v1059_v11 = vadd.f32 %v1058_v9, %v4345_v55  ;;  %v1060_v8 = vpop.f32.mrb[13].mxu0  ;;  %v1171_v13 = vpop.f32.mrb[12].mxu1 }
 0x191   : > { %v1061_v14 = vadd.f32 %v1060_v8, %v4348_v56  ;;  %v1062_v15 = vpop.f32.mrb[14].mxu0  ;;  %v4419_v16 = vadd.f32 %v1171_v13, %v4351_v57  ;;  %v1173_v17 = vpop.f32.mrb[13].mxu1 }
 0x192   : > { %v1643_v18 = vadd.f32 %v1642_v63, %v1059_v11  ;;  %v1063_v19 = vadd.f32 %v1062_v15, %v4345_v55  ;;  %v1064_v20 = vpop.f32.mrb[15].mxu0  ;;  %1452 = vxpose.xlu0.b32.cont [7/16] %v1059_v11, 128  ;;  %v4423_v0 = vadd.f32 %v1173_v17, %v4354_v58  ;;  %v1175_v22 = vpop.f32.mrb[14].mxu1 }
 0x193   : > { %v1656_v23 = vadd.f32 %v1655_v4, %v1061_v14  ;;  %v1065_v24 = vadd.f32 %v1064_v20, %v4348_v56  ;;  %1484 = vxpose.xlu1.b32.cont [7/16] %v1061_v14, 128  ;;  %v1669_v25 = vadd.f32 %v1668_v5, %v4419_v16  ;;  %v4428_v27 = vadd.f32 %v1175_v22, %v4351_v57  ;;  %v1177_v28 = vpop.f32.mrb[15].mxu1 }
 0x194   : > { %v1644_v29 = vadd.f32 %v1643_v18, %v1063_v19  ;;  %v1682_v30 = vadd.f32 %v1681_v7, %v4423_v0  ;;  %v4447_v48 = vadd.f32 %v1177_v28, %v4354_v58 }
 0x195   : > { %v1657_v32 = vadd.f32 %v1656_v23, %v1065_v24  ;;  %v4432_v33 = vadd.f32 %v1669_v25, %v4428_v27 }
 0x196   : > { %1453 = vxpose.xlu0.b32.cont [8/16] %v1063_v19, 128  ;;  %v1645_v63 = vrot.slane %v1644_v29, 4  ;;  %v1683_v13 = vadd.f32 %v1682_v30, %v4447_v48 }
 0x197   : > { %v1068_v34 = vpop.f32.mrb[16].mxu0  ;;  %1485 = vxpose.xlu1.b32.cont [8/16] %v1065_v24, 128  ;;  %v1658_v28 = vrot.slane %v1657_v32, 4 }
 0x198   : > { %v1070_v36 = vpop.f32.mrb[17].mxu0  ;;  %v1181_v37 = vpop.f32.mrb[16].mxu1  ;;  %v4463_v9 = vadd.f32 %v1068_v34, %v4345_v55  ;;  %v604_v34 = vsub.s32 4, %v4335_v49 }
 0x199   : > { %v1072_v38 = vpop.f32.mrb[18].mxu0  ;;  %v1183_v39 = vpop.f32.mrb[17].mxu1  ;;  %v4435_v42 = vadd.f32 %v1181_v37, %v4351_v57  ;;  %v4473_v17 = vadd.f32 %v1070_v36, %v4348_v56  ;;  %v1646_v36 = vadd.f32 %v1645_v63, %v1644_v29  ;;  %v608_v63 = vsub.s32 5, %v4335_v49 }
 0x19a   : > { %v1074_v40 = vpop.f32.mrb[19].mxu0  ;;  %v1185_v41 = vpop.f32.mrb[18].mxu1  ;;  %v4441_v46 = vadd.f32 %v1183_v39, %v4354_v58  ;;  %v4452_v54 = vadd.f32 %v1072_v38, %v4345_v55  ;;  %5534 = vst [vmem:[#allocation17_spill] sm:$0xff] %v4463_v9  ;;  %v1671_v39 = vrot.slane %v4432_v33, 4 }
 0x19b   : > { %5527 = vst [vmem:[#allocation10_spill] sm:$0xff] %v4435_v42  ;;  %v4438_v43 = vadd.f32 %v1185_v41, %v4351_v57  ;;  %v1187_v44 = vpop.f32.mrb[19].mxu1  ;;  %v4457_v1 = vadd.f32 %v1074_v40, %v4348_v56  ;;  %5537 = vst [vmem:[#allocation20_spill] sm:$0xff] %v4473_v17 }
 0x19c   : > { %5529 = vst [vmem:[#allocation12_spill] sm:$0xff] %v4441_v46  ;;  %v4444_v47 = vadd.f32 %v1187_v44, %v4354_v58  ;;  %5531 = vst [vmem:[#allocation14_spill] sm:$0xff] %v4452_v54  ;;  %v1935_v23 = vadd.f32 %v4452_v54, %v4463_v9  ;;  %v1684_v44 = vrot.slane %v1683_v13, 4 }
 0x19d   : > { %5528 = vst [vmem:[#allocation11_spill] sm:$0xff] %v4438_v43  ;;  %v1961_v53 = vadd.f32 %v4438_v43, %v4435_v42  ;;  %5532 = vst [vmem:[#allocation15_spill] sm:$0xff] %v4457_v1  ;;  %v1948_v30 = vadd.f32 %v4457_v1, %v4473_v17  ;;  %v4589_v43 = vld [vmem:[%s4123_s16 + $0x290] sm:$0xff] }
 0x19e   : > { %5530 = vst [vmem:[#allocation13_spill] sm:$0xff] %v4444_v47  ;;  %v1974_v60 = vadd.f32 %v4444_v47, %v4441_v46  ;;  %v4592_v46 = vld [vmem:[%s4123_s16 + $0x298] sm:$0xff] }
 0x19f   : > { %v1078_v50 = vpop.f32.mrb[20].mxu0 }
 0x1a0   : > { %v1080_v59 = vpop.f32.mrb[21].mxu0  ;;  %v1191_v62 = vpop.f32.mrb[20].mxu1  ;;  %v4466_v11 = vadd.f32 %v1078_v50, %v4345_v55 }
 0x1a1   : > { %v1082_v4 = vpop.f32.mrb[22].mxu0  ;;  %v4460_v5 = vadd.f32 %v1191_v62, %v4351_v57  ;;  %v1193_v7 = vpop.f32.mrb[21].mxu1  ;;  %v4476_v18 = vadd.f32 %v1080_v59, %v4348_v56 }
 0x1a2   : > { %5535 = vst [vmem:[#allocation18_spill] sm:$0xff] %v4466_v11  ;;  %v1084_v8 = vpop.f32.mrb[23].mxu0  ;;  %v4470_v14 = vadd.f32 %v1193_v7, %v4354_v58  ;;  %v1195_v15 = vpop.f32.mrb[22].mxu1  ;;  %v1936_v37 = vadd.f32 %v1935_v23, %v4466_v11  ;;  %v4493_v38 = vadd.f32 %v1082_v4, %v4345_v55  ;;  %v612_v4 = vsub.s32 6, %v4335_v49 }
 0x1a3   : > { %5533 = vst [vmem:[#allocation16_spill] sm:$0xff] %v4460_v5  ;;  %5538 = vst [vmem:[#allocation21_spill] sm:$0xff] %v4476_v18  ;;  %v1962_v19 = vadd.f32 %v1961_v53, %v4460_v5  ;;  %v4480_v20 = vadd.f32 %v1195_v15, %v4351_v57  ;;  %v1197_v22 = vpop.f32.mrb[23].mxu1  ;;  %v1949_v40 = vadd.f32 %v1948_v30, %v4476_v18  ;;  %v616_v23 = vsub.s32 7, %v4335_v49 }
 0x1a4   : > { %5536 = vst [vmem:[#allocation19_spill] sm:$0xff] %v4470_v14  ;;  %v1975_v24 = vadd.f32 %v1974_v60, %v4470_v14  ;;  %v4486_v25 = vadd.f32 %v1197_v22, %v4354_v58  ;;  %5541 = vst [vmem:[#allocation24_spill] sm:$0xff] %v4493_v38  ;;  %v4498_v41 = vadd.f32 %v1084_v8, %v4348_v56  ;;  %v1647_v30 = vrot.slane %v1646_v36, 2 }
 0x1a5   : > { %5539 = vst [vmem:[#allocation22_spill] sm:$0xff] %v4480_v20  ;;  %v1963_v53 = vadd.f32 %v1962_v19, %v4480_v20  ;;  %v1659_v7 = vadd.f32 %v1658_v28, %v1657_v32  ;;  %v1685_v20 = vadd.f32 %v1684_v44, %v1683_v13 }
 0x1a6   : > { %5540 = vst [vmem:[#allocation23_spill] sm:$0xff] %v4486_v25  ;;  %5542 = vst [vmem:[#allocation25_spill] sm:$0xff] %v4498_v41  ;;  %v1976_v60 = vadd.f32 %v1975_v24, %v4486_v25  ;;  %v1937_v24 = vadd.f32 %v1936_v37, %v4493_v38 }
 0x1a7   : > { %v1088_v50 = vpop.f32.mrb[24].mxu0  ;;  %v1660_v13 = vrot.slane %v1659_v7, 2 }
 0x1a8   : > { %v4502_v59 = vadd.f32 %v1088_v50, %v4345_v55  ;;  %v1090_v29 = vpop.f32.mrb[25].mxu0  ;;  %v1201_v62 = vpop.f32.mrb[24].mxu1  ;;  %v1672_v50 = vadd.f32 %v1671_v39, %v4432_v33 }
 0x1a9   : > { %v4508_v15 = vadd.f32 %v1090_v29, %v4348_v56  ;;  %v1092_v8 = vpop.f32.mrb[26].mxu0  ;;  %v4511_v22 = vadd.f32 %v1201_v62, %v4351_v57  ;;  %v1203_v19 = vpop.f32.mrb[25].mxu1  ;;  %v1950_v29 = vadd.f32 %v1949_v40, %v4498_v41  ;;  %v4536_v40 = vld [vmem:[%s4123_s16 + $0x308] sm:$0xff] }
 0x1aa   : > { %5543 = vst [vmem:[#allocation26_spill] sm:$0xff] %v4502_v59  ;;  %v1094_v25 = vpop.f32.mrb[27].mxu0  ;;  %v4517_v32 = vadd.f32 %v1203_v19, %v4354_v58  ;;  %v1205_v28 = vpop.f32.mrb[26].mxu1  ;;  %v1938_v5 = vadd.f32 %v1937_v24, %v4502_v59  ;;  %v4526_v37 = vadd.f32 %v1092_v8, %v4345_v55  ;;  %v4533_v19 = vld [vmem:[%s4123_s16 + $0x300] sm:$0xff]  ;;  %v4543_v24 = vrot.slane %v4339_v51, %v604_v34 }
 0x1ab   : > { %5544 = vst [vmem:[#allocation27_spill] sm:$0xff] %v4508_v15  ;;  %5545 = vst [vmem:[#allocation28_spill] sm:$0xff] %v4511_v22  ;;  %v1964_v62 = vadd.f32 %v1963_v53, %v4511_v22  ;;  %v4522_v14 = vadd.f32 %v1205_v28, %v4351_v57  ;;  %v1207_v49 = vpop.f32.mrb[27].mxu1  ;;  %v1951_v44 = vadd.f32 %v1950_v29, %v4508_v15  ;;  %v1673_v28 = vrot.slane %v1672_v50, 2 }
 0x1ac   : > { %5546 = vst [vmem:[#allocation29_spill] sm:$0xff] %v4517_v32  ;;  %5548 = vst [vmem:[#allocation31_spill] sm:$0xff] %v4526_v37  ;;  %v1977_v33 = vadd.f32 %v1976_v60, %v4517_v32  ;;  %v4530_v39 = vadd.f32 %v1207_v49, %v4354_v58  ;;  %v4540_v53 = vadd.f32 %v1094_v25, %v4348_v56  ;;  %v1686_v34 = vrot.slane %v1685_v20, 2 }
 0x1ad   : > { %5547 = vst [vmem:[#allocation30_spill] sm:$0xff] %v4522_v14  ;;  %v4546_v8 = vrot.slane %v4339_v51, %v608_v63  ;;  %v4549_v60 = vrot.slane %v4339_v51, %v612_v4  ;;  %v4551_v49 = vadd.f32 %v1647_v30, %v1646_v36  ;;  %v1965_v32 = vadd.f32 %v1964_v62, %v4522_v14 }
 0x1ae   : > { %5549 = vst [vmem:[#allocation32_spill] sm:$0xff] %v4530_v39  ;;  %5550 = vst [vmem:[#allocation33_spill] sm:$0xff] %v4540_v53  ;;  %v4555_v29 = vrot.slane %v4339_v51, %v616_v23  ;;  %v1939_v47 = vadd.f32 %v1938_v5, %v4526_v37  ;;  %v1978_v63 = vadd.f32 %v1977_v33, %v4530_v39 }
 0x1af   : > { %v1098_v22 = vpop.f32.mrb[28].mxu0  ;;  %v4564_v62 = vadd.f32 %v1660_v13, %v1659_v7  ;;  %v1952_v51 = vadd.f32 %v1951_v44, %v4540_v53  ;;  %v4576_v39 = vadd.f32 %v1673_v28, %v1672_v50 }
 0x1b0   : > { %v4562_v4 = vadd.f32 %v1098_v22, %v4345_v55  ;;  %v1211_v36 = vpop.f32.mrb[28].mxu1  ;;  %v1100_v30 = vpop.f32.mrb[29].mxu0  ;;  %v4574_v22 = vld [vmem:[%s4123_s16 + $0x200] sm:$0xff] }
 0x1b1   : > { %v4568_v23 = vadd.f32 %v1211_v36, %v4351_v57  ;;  %v4571_v25 = vadd.f32 %v1100_v30, %v4348_v56  ;;  %v1213_v5 = vpop.f32.mrb[29].mxu1  ;;  %v1102_v33 = vpop.f32.mrb[30].mxu0  ;;  %v4586_v30 = vld [vmem:[%s4123_s16 + $0x208] sm:$0xff] }
 0x1b2   : > { %5551 = vst [vmem:[#allocation34_spill] sm:$0xff] %v4562_v4  ;;  %v1940_v14 = vadd.f32 %v1939_v47, %v4562_v4  ;;  %v4580_v7 = vadd.f32 %v1213_v5, %v4354_v58  ;;  %v4583_v13 = vadd.f32 %v1102_v33, %v4345_v55  ;;  %v1215_v44 = vpop.f32.mrb[30].mxu1  ;;  %v1104_v36 = vpop.f32.mrb[31].mxu0  ;;  %v4603_v5 = vld [vmem:[%s4123_s16 + $0x390] sm:$0xff]  ;;  %v4606_v33 = vld [vmem:[%s4123_s16 + $0x398] sm:$0xff]  ;;  %v1687_v4 = vadd.f32 %v1686_v34, %v1685_v20 }
 0x1b3   : > { %5552 = vst [vmem:[#allocation35_spill] sm:$0xff] %v4568_v23  ;;  %5553 = vst [vmem:[#allocation36_spill] sm:$0xff] %v4571_v25  ;;  %v1966_v42 = vadd.f32 %v1965_v32, %v4568_v23  ;;  %v1953_v50 = vadd.f32 %v1952_v51, %v4571_v25  ;;  %v4597_v47 = vadd.f32 %v1215_v44, %v4351_v57  ;;  %v1217_v55 = vpop.f32.mrb[31].mxu1 }
 0x1b4   : > { %5554 = vst [vmem:[#allocation37_spill] sm:$0xff] %v4580_v7  ;;  %5555 = vst [vmem:[#allocation38_spill] sm:$0xff] %v4583_v13  ;;  %v4600_v28 = vadd.f32 %v1104_v36, %v4348_v56  ;;  %v1979_v53 = vadd.f32 %v1978_v63, %v4580_v7  ;;  %v1941_v37 = vadd.f32 %v1940_v14, %v4583_v13  ;;  %v1649_v36 = vrot.slane %v4551_v49, 1 }
 0x1b5   : > { %5556 = vst [vmem:[#allocation39_spill] sm:$0xff] %v4597_v47  ;;  %v4611_v32 = vadd.f32 %v1217_v55, %v4354_v58  ;;  %v1967_v51 = vadd.f32 %v1966_v42, %v4597_v47  ;;  %v1662_v58 = vrot.slane %v4564_v62, 1  ;;  %v1675_v42 = vrot.slane %v4576_v39, 1 }
 0x1b6   : > { %5557 = vst [vmem:[#allocation40_spill] sm:$0xff] %v4600_v28  ;;  %v1954_v57 = vadd.f32 %v1953_v50, %v4600_v28  ;;  %v1942_v20 = vrot.slane %v1941_v37, 4  ;;  %v1688_v56 = vrot.slane %v1687_v4, 1  ;;  %v1650_v54 = vadd.f32 %v1649_v36, %v4551_v49 }
 0x1b7   : > { %5558 = vst [vmem:[#allocation41_spill] sm:$0xff] %v4611_v32  ;;  %v1980_v34 = vadd.f32 %v1979_v53, %v4611_v32  ;;  %v1968_v63 = vrot.slane %v1967_v51, 4  ;;  %v1254_v55 = vpop.f32.mrb[32].mxu0 }
 0x1b8   : > { %v1955_v50 = vrot.slane %v1954_v57, 4  ;;  %v1943_v47 = vadd.f32 %v1942_v20, %v1941_v37  ;;  %v1255_v44 = vadd.f32 %v1254_v55, %v4543_v24  ;;  %v1256_v23 = vpop.f32.mrb[33].mxu0  ;;  %v1367_v28 = vpop.f32.mrb[32].mxu1 }
 0x1b9   : > { %v1981_v7 = vrot.slane %v1980_v34, 4  ;;  %v1969_v13 = vadd.f32 %v1968_v63, %v1967_v51  ;;  %v1257_v32 = vadd.f32 %v1256_v23, %v4546_v8  ;;  %v1258_v14 = vpop.f32.mrb[34].mxu0  ;;  %v4628_v25 = vadd.f32 %v1367_v28, %v4549_v60  ;;  %v1369_v15 = vpop.f32.mrb[33].mxu1 }
 0x1ba   : > { %v1956_v53 = vadd.f32 %v1955_v50, %v1954_v57  ;;  %v1944_v59 = vrot.slane %v1943_v47, 2  ;;  %v1259_v38 = vadd.f32 %v1258_v14, %v4543_v24  ;;  %v1260_v18 = vpop.f32.mrb[35].mxu0  ;;  %1454 = vxpose.xlu0.b32.cont [9/16] %v1255_v44, 128  ;;  %v4632_v37 = vadd.f32 %v1369_v15, %v4555_v29  ;;  %v1371_v20 = vpop.f32.mrb[34].mxu1 }
 0x1bb   : > { %v1982_v41 = vadd.f32 %v1981_v7, %v1980_v34  ;;  %v1970_v55 = vrot.slane %v1969_v13, 2  ;;  %v1261_v57 = vadd.f32 %v1260_v18, %v4546_v8  ;;  %1486 = vxpose.xlu1.b32.cont [9/16] %v1257_v32, 128  ;;  %v4636_v23 = vadd.f32 %v1371_v20, %v4549_v60  ;;  %v1373_v28 = vpop.f32.mrb[35].mxu1 }
 0x1bc   : > { %v1957_v51 = vrot.slane %v1956_v53, 2  ;;  %v1945_v63 = vadd.f32 %v1944_v59, %v1943_v47  ;;  %v1690_v7 = vadd.f32 %v1259_v38, %v1255_v44  ;;  %v4639_v34 = vadd.f32 %v1373_v28, %v4555_v29 }
 0x1bd   : > { %v1983_v50 = vrot.slane %v1982_v41, 2  ;;  %v1971_v14 = vadd.f32 %v1970_v55, %v1969_v13  ;;  %v1703_v15 = vadd.f32 %v1261_v57, %v1257_v32  ;;  %v1716_v1 = vadd.f32 %v4636_v23, %v4628_v25 }
 0x1be   : > { %v1958_v11 = vadd.f32 %v1957_v51, %v1956_v53  ;;  %v1946_v18 = vrot.slane %v1945_v63, 1  ;;  %1455 = vxpose.xlu0.b32.cont [10/16] %v1259_v38, 128  ;;  %v1729_v20 = vadd.f32 %v4639_v34, %v4632_v37  ;;  %v1663_v59 = vadd.f32 %v1662_v58, %v4564_v62 }
 0x1bf   : > { %v1984_v17 = vadd.f32 %v1983_v50, %v1982_v41  ;;  %v1676_v47 = vadd.f32 %v1675_v42, %v4576_v39  ;;  %v1972_v44 = vrot.slane %v1971_v14, 1  ;;  %v1264_v13 = vpop.f32.mrb[36].mxu0  ;;  %1487 = vxpose.xlu1.b32.cont [10/16] %v1261_v57, 128  ;;  %v1689_v32 = vadd.f32 %v1688_v56, %v1687_v4 }
 0x1c0   : > { %v1959_v28 = vrot.slane %v1958_v11, 1  ;;  %v1947_v53 = vadd.f32 %v1946_v18, %v1945_v63  ;;  %v1265_v51 = vadd.f32 %v1264_v13, %v4543_v24  ;;  %v1266_v49 = vpop.f32.mrb[37].mxu0  ;;  %v1377_v38 = vpop.f32.mrb[36].mxu1  ;;  %v4656_v13 = vld [vmem:[%s4123_s16 + $0x310] sm:$0xff] }
 0x1c1   : > { %v1985_v55 = vrot.slane %v1984_v17, 1  ;;  %v1973_v41 = vadd.f32 %v1972_v44, %v1971_v14  ;;  %v1267_v50 = vadd.f32 %v1266_v49, %v4546_v8  ;;  %v1268_v62 = vpop.f32.mrb[38].mxu0  ;;  %v4651_v39 = vadd.f32 %v1377_v38, %v4549_v60  ;;  %v1379_v58 = vpop.f32.mrb[37].mxu1 }
 0x1c2   : > { %v1960_v36 = vadd.f32 %v1959_v28, %v1958_v11  ;;  %v1691_v57 = vadd.f32 %v1690_v7, %v1265_v51  ;;  %v1269_v4 = vadd.f32 %v1268_v62, %v4543_v24  ;;  %v1270_v56 = vpop.f32.mrb[39].mxu0  ;;  %1456 = vxpose.xlu0.b32.cont [11/16] %v1265_v51, 128  ;;  %v2040_v63 = vsel %vm2039_vm0, %v1650_v54, %v1947_v53  ;;  %v1381_v18 = vpop.f32.mrb[38].mxu1  ;;  %v4659_v11 = vld [vmem:[%s4123_s16 + $0x318] sm:$0xff] }
 0x1c3   : > { %v1986_v42 = vadd.f32 %v1985_v55, %v1984_v17  ;;  %v1704_v14 = vadd.f32 %v1703_v15, %v1267_v50  ;;  %v1271_v44 = vadd.f32 %v1270_v56, %v4546_v8  ;;  %1488 = vxpose.xlu1.b32.cont [11/16] %v1267_v50, 128  ;;  %v2048_v7 = vmul.f32 0.015625, %v2040_v63  ;;  %v1383_v28 = vpop.f32.mrb[39].mxu1  ;;  %v4668_v56 = vld [vmem:[%s4123_s16 + $0x210] sm:$0xff]  ;;  %v4671_v50 = vld [vmem:[%s4123_s16 + $0x218] sm:$0xff] }
 0x1c4   : > { %v2041_v17 = vsel %vm2039_vm0, %v1663_v59, %v1960_v36  ;;  %v1692_v55 = vadd.f32 %v1691_v57, %v1269_v4  ;;  %v2042_v53 = vsel %vm2039_vm0, %v1676_v47, %v1973_v41  ;;  %v1717_v36 = vadd.f32 %v1716_v1, %v4651_v39  ;;  %v4681_v47 = vld [vmem:[%s4123_s16 + $0x2a0] sm:$0xff]  ;;  %v4684_v41 = vld [vmem:[%s4123_s16 + $0x2a8] sm:$0xff] }
 0x1c5   : > { %v2049_v51 = vmul.f32 0.015625, %v2041_v17  ;;  %v2043_v54 = vsel %vm2039_vm0, %v1689_v32, %v1986_v42  ;;  %v1705_v49 = vadd.f32 %v1704_v14, %v1271_v44  ;;  %v2050_v62 = vmul.f32 0.015625, %v2042_v53 }
 0x1c6   : > { %v2051_v38 = vmul.f32 0.015625, %v2043_v54  ;;  %1457 = vxpose.xlu0.b32.cont [12/16] %v1269_v4, 128  ;;  %v4675_v57 = vadd.f32 %v1379_v58, %v4555_v29  ;;  %v4678_v32 = vadd.f32 %v1381_v18, %v4549_v60  ;;  %v2056_v14 = vmax.f32 %v2048_v7, 0.0 }
 0x1c7   : > { %v2057_v59 = vmax.f32 %v2049_v51, 0.0  ;;  %v1274_v42 = vpop.f32.mrb[40].mxu0  ;;  %1489 = vxpose.xlu1.b32.cont [12/16] %v1271_v44, 128  ;;  %v2058_v17 = vmax.f32 %v2050_v62, 0.0  ;;  %v4687_v4 = vadd.f32 %v1383_v28, %v4555_v29  ;;  %v3572_v53 = vpack.c.bf16 %v4671_v50, %v4668_v56 }
 0x1c8   : > { %v2059_v63 = vmax.f32 %v2051_v38, 0.0  ;;  %v1275_v1 = vadd.f32 %v1274_v42, %v4543_v24  ;;  %v1276_v51 = vpop.f32.mrb[41].mxu0  ;;  %v1730_v58 = vadd.f32 %v1729_v20, %v4675_v57  ;;  %v1718_v18 = vadd.f32 %v1717_v36, %v4678_v32  ;;  %v1387_v54 = vpop.f32.mrb[40].mxu1  ;;  %v2180_v42 = vld [vmem:[%s4123_s16 + $0x3a0] sm:$0xff] }
 0x1c9   : > { %2256 = vmatprep.mubr.f32.mxu0 %v2057_v59  ;;  %v1277_v44 = vadd.f32 %v1276_v51, %v4546_v8  ;;  %v1278_v7 = vpop.f32.mrb[42].mxu0  ;;  %v4696_v28 = vadd.f32 %v1387_v54, %v4549_v60  ;;  %v1389_v38 = vpop.f32.mrb[41].mxu1  ;;  %v3574_v20 = vpack.c.bf16 %v4684_v41, %v4681_v47 }
 0x1ca   : > { %2326 = vmatprep.mubr.f32.mxu1 %v2059_v63  ;;  %2257 = vmatmul.mubr.f32.vlgmr.msra.gmra.mrb[64].mxu0 %v2056_v14  ;;  %v1693_v62 = vadd.f32 %v1692_v55, %v1275_v1  ;;  %v1279_v59 = vadd.f32 %v1278_v7, %v4543_v24  ;;  %v1280_v56 = vpop.f32.mrb[43].mxu0  ;;  %v1731_v50 = vadd.f32 %v1730_v58, %v4687_v4  ;;  %v1391_v36 = vpop.f32.mrb[42].mxu1  ;;  %v2181_v63 = vld [vmem:[%s4123_s16 + $0x3a8] sm:$0xff]  ;;  %v2132_v7 = vld [vmem:[%s4123_s16 + $0x220] sm:$0xff] }
 0x1cb   : > { %2327 = vmatmul.mubr.f32.vlgmr.msra.gmra.mrb[64].mxu1 %v2058_v17  ;;  %1458 = vxpose.xlu0.b32.cont [13/16] %v1275_v1, 128  ;;  %v1706_v14 = vadd.f32 %v1705_v49, %v1277_v44  ;;  %v1281_v51 = vadd.f32 %v1280_v56, %v4546_v8  ;;  %v1719_v55 = vadd.f32 %v1718_v18, %v4696_v28  ;;  %v1393_v41 = vpop.f32.mrb[43].mxu1  ;;  %v4710_v17 = vld [vmem:[%s4123_s16 + $0x320] sm:$0xff]  ;;  %v2165_v1 = vld [vmem:[%s4123_s16 + $0x328] sm:$0xff]  ;;  %v2150_v56 = vld [vmem:[%s4123_s16 + $0x2b0] sm:$0xff] }
 0x1cc   : > { %1490 = vxpose.xlu1.b32.cont [13/16] %v1277_v44, 128  ;;  %v4707_v47 = vadd.f32 %v1389_v38, %v4555_v29  ;;  %v1694_v58 = vadd.f32 %v1693_v62, %v1279_v59  ;;  %v4714_v54 = vadd.f32 %v1391_v36, %v4549_v60  ;;  %v4717_v49 = vadd.f32 %v1393_v41, %v4555_v29  ;;  %v2133_v38 = vld [vmem:[%s4123_s16 + $0x228] sm:$0xff] }
 0x1cd   : > { %v5559_v18 = vpack.c.bf16 %v4536_v40, %v4533_v19  ;;  %v5560_v44 = vpack.c.bf16 %v4586_v30, %v4574_v22  ;;  %v1707_v62 = vadd.f32 %v1706_v14, %v1281_v51  ;;  %v5561_v41 = vpack.c.bf16 %v4592_v46, %v4589_v43  ;;  %v2151_v22 = vld [vmem:[%s4123_s16 + $0x2b8] sm:$0xff]  ;;  %v2182_v30 = vld [vmem:[%s4123_s16 + $0x3b0] sm:$0xff] }
 0x1ce   : > { %v1732_v36 = vadd.f32 %v1731_v50, %v4707_v47  ;;  %v5562_v19 = vpack.c.bf16 %v4606_v33, %v4603_v5  ;;  %v3606_v40 = vpack.c.bf16 %v2181_v63, %v2180_v42  ;;  %v4740_v14 = vld [vmem:[%s4123_s16 + $0x330] sm:$0xff]  ;;  %v4743_v50 = vld [vmem:[%s4123_s16 + $0x338] sm:$0xff]  ;;  %v3608_v46 = vpack.c.bf16 %v2165_v1, %v4710_v17 }
 0x1cf   : > { %3601 = vmatpush3.bf16.msra.mxu1 %v5559_v18  ;;  %3569 = vmatpush3.bf16.msra.mxu0 %v5560_v44  ;;  %v2183_v18 = vld [vmem:[%s4123_s16 + $0x3b8] sm:$0xff]  ;;  %v1720_v44 = vadd.f32 %v1719_v55, %v4714_v54  ;;  %v1284_v15 = vpop.f32.mrb[44].mxu0  ;;  %v3576_v5 = vpack.c.bf16 %v2133_v38, %v2132_v7  ;;  %v2134_v33 = vld [vmem:[%s4123_s16 + $0x230] sm:$0xff]  ;;  %v3578_v55 = vpack.c.bf16 %v2151_v22, %v2150_v56  ;;  %v2152_v22 = vld [vmem:[%s4123_s16 + $0x2c0] sm:$0xff] }
 0x1d0   : > { %3571 = vmatprep.subr.bf16.mxu0 %v5561_v41  ;;  %3603 = vmatprep.subr.bf16.mxu1 %v5562_v19  ;;  %v1733_v43 = vadd.f32 %v1732_v36, %v4717_v49  ;;  %v2135_v41 = vld [vmem:[%s4123_s16 + $0x238] sm:$0xff]  ;;  %v1285_v42 = vadd.f32 %v1284_v15, %v4543_v24  ;;  %v1286_v63 = vpop.f32.mrb[45].mxu0  ;;  %v1397_v19 = vpop.f32.mrb[44].mxu1  ;;  %v3610_v9 = vpack.c.bf16 %v2183_v18, %v2182_v30 }
 0x1d1   : > { %1459 = vxpose.xlu0.b32.cont [14/16] %v1279_v59, 128  ;;  %1491 = vxpose.xlu1.b32.cont [14/16] %v1281_v51, 128  ;;  %v5563_v59 = vpack.c.bf16 %v4659_v11, %v4656_v13  ;;  %v1287_v51 = vadd.f32 %v1286_v63, %v4546_v8  ;;  %v1288_v36 = vpop.f32.mrb[46].mxu0  ;;  %v4755_v17 = vadd.f32 %v1397_v19, %v4549_v60  ;;  %v1399_v1 = vpop.f32.mrb[45].mxu1  ;;  %v2169_v63 = vld [vmem:[%s4123_s16 + $0x348] sm:$0xff] }
 0x1d2   : > { %v3612_v15 = vpack.c.bf16 %v4743_v50, %v4740_v14  ;;  %v1695_v13 = vadd.f32 %v1694_v58, %v1285_v42  ;;  %v1289_v11 = vadd.f32 %v1288_v36, %v4543_v24  ;;  %v4761_v7 = vadd.f32 %v1399_v1, %v4555_v29  ;;  %v1401_v38 = vpop.f32.mrb[46].mxu1  ;;  %v2184_v50 = vld [vmem:[%s4123_s16 + $0x3c0] sm:$0xff]  ;;  %v2137_v36 = vld [vmem:[%s4123_s16 + $0x248] sm:$0xff]  ;;  %v2154_v1 = vld [vmem:[%s4123_s16 + $0x2d0] sm:$0xff] }
 0x1d3   : > { %3605 = vmatpush3.bf16.msra.mxu1 %v5563_v59  ;;  %3573 = vmatpush3.bf16.msra.mxu0 %v3572_v53  ;;  %v1290_v53 = vpop.f32.mrb[47].mxu0  ;;  %v3580_v56 = vpack.c.bf16 %v2135_v41, %v2134_v33  ;;  %v1721_v58 = vadd.f32 %v1720_v44, %v4755_v17  ;;  %v4768_v18 = vadd.f32 %v1401_v38, %v4549_v60  ;;  %v1403_v14 = vpop.f32.mrb[47].mxu1  ;;  %v2168_v44 = vld [vmem:[%s4123_s16 + $0x340] sm:$0xff]  ;;  %v2187_v38 = vld [vmem:[%s4123_s16 + $0x3d8] sm:$0xff] }
 0x1d4   : > { %3575 = vmatprep.subr.bf16.mxu0 %v3574_v20  ;;  %3607 = vmatprep.subr.bf16.mxu1 %v3606_v40  ;;  %5564 = vst [vmem:[#allocation42_spill] sm:$0xff] %v4761_v7  ;;  %v2153_v20 = vld [vmem:[%s4123_s16 + $0x2c8] sm:$0xff]  ;;  %v1708_v40 = vadd.f32 %v1707_v62, %v1287_v51  ;;  %v1291_v30 = vadd.f32 %v1290_v53, %v4546_v8  ;;  %v2186_v53 = vld [vmem:[%s4123_s16 + $0x3d0] sm:$0xff] }
 0x1d5   : > { %1460 = vxpose.xlu0.b32.cont [15/16] %v1285_v42, 128  ;;  %1492 = vxpose.xlu1.b32.cont [15/16] %v1287_v51, 128  ;;  %5565 = vst [vmem:[#allocation43_spill] sm:$0xff] %v4768_v18  ;;  %v2185_v42 = vld [vmem:[%s4123_s16 + $0x3c8] sm:$0xff]  ;;  %v4772_v33 = vadd.f32 %v1695_v13, %v1289_v11  ;;  %v1734_v41 = vadd.f32 %v1733_v43, %v4761_v7  ;;  %v2136_v51 = vld [vmem:[%s4123_s16 + $0x240] sm:$0xff]  ;;  %v2155_v13 = vld [vmem:[%s4123_s16 + $0x2d8] sm:$0xff] }
 0x1d6   : > { %v4776_v62 = vadd.f32 %v1403_v14, %v4555_v29  ;;  %v4780_v19 = vadd.f32 %v1708_v40, %v1291_v30  ;;  %v4783_v59 = vadd.f32 %v1721_v58, %v4768_v18  ;;  %v3582_v43 = vpack.c.bf16 %v2153_v20, %v2152_v22  ;;  %v2170_v58 = vld [vmem:[%s4123_s16 + $0x350] sm:$0xff]  ;;  %v2171_v14 = vld [vmem:[%s4123_s16 + $0x358] sm:$0xff] }
 0x1d7   : > { %3609 = vmatpush3.bf16.msra.mxu1 %v3608_v46  ;;  %3577 = vmatpush3.bf16.msra.mxu0 %v3576_v5  ;;  %v3614_v5 = vpack.c.bf16 %v2185_v42, %v2184_v50  ;;  %v1294_v40 = vpop.f32.mrb[48].mxu0  ;;  %v3616_v22 = vpack.c.bf16 %v2169_v63, %v2168_v44  ;;  %v3586_v50 = vpack.c.bf16 %v2155_v13, %v2154_v1  ;;  %v2139_v18 = vld [vmem:[%s4123_s16 + $0x258] sm:$0xff]  ;;  %v2156_v63 = vld [vmem:[%s4123_s16 + $0x2e0] sm:$0xff] }
 0x1d8   : > { %5566 = vst [vmem:[#allocation44_spill] sm:$0xff] %v4776_v62  ;;  %3579 = vmatprep.subr.bf16.mxu0 %v3578_v55  ;;  %3611 = vmatprep.subr.bf16.mxu1 %v3610_v9  ;;  %v4789_v46 = vadd.f32 %v1734_v41, %v4776_v62  ;;  %v1407_v55 = vpop.f32.mrb[48].mxu1  ;;  %v1296_v9 = vpop.f32.mrb[49].mxu0  ;;  %v3618_v42 = vpack.c.bf16 %v2187_v38, %v2186_v53  ;;  %v2138_v62 = vld [vmem:[%s4123_s16 + $0x250] sm:$0xff]  ;;  %v2188_v38 = vld [vmem:[%s4123_s16 + $0x3e0] sm:$0xff] }
 0x1d9   : > { %1461 = vxpose.xlu0.b32.end [16/16] %v1289_v11, 128  ;;  %1493 = vxpose.xlu1.b32.end [16/16] %v1291_v30, 128  ;;  %v3584_v11 = vpack.c.bf16 %v2137_v36, %v2136_v51  ;;  %v1409_v20 = vpop.f32.mrb[49].mxu1  ;;  %v1298_v41 = vpop.f32.mrb[50].mxu0  ;;  %v4800_v30 = vadd.f32 %v1294_v40, %v4543_v24  ;;  %v3620_v44 = vpack.c.bf16 %v2171_v14, %v2170_v58  ;;  %v2189_v40 = vld [vmem:[%s4123_s16 + $0x3e8] sm:$0xff]  ;;  %v2172_v14 = vld [vmem:[%s4123_s16 + $0x360] sm:$0xff] }
 0x1da   : > { %v4803_v7 = vadd.f32 %v1298_v41, %v4543_v24  ;;  %v4812_v51 = vadd.f32 %v1296_v9, %v4546_v8  ;;  %v4821_v13 = vadd.f32 %v1409_v20, %v4555_v29  ;;  %v3588_v53 = vpack.c.bf16 %v2139_v18, %v2138_v62  ;;  %v2141_v9 = vld [vmem:[%s4123_s16 + $0x268] sm:$0xff] }
 0x1db   : > { %3613 = vmatpush3.bf16.msra.mxu1 %v3612_v15  ;;  %3581 = vmatpush3.bf16.msra.mxu0 %v3580_v56  ;;  %v1411_v15 = vpop.f32.mrb[50].mxu1  ;;  %v1300_v56 = vpop.f32.mrb[51].mxu0  ;;  %v2173_v41 = vld [vmem:[%s4123_s16 + $0x368] sm:$0xff] }
 0x1dc   : > { %3583 = vmatprep.subr.bf16.mxu0 %v3582_v43  ;;  %5567 = vst [vmem:[#allocation45_spill] sm:$0xff] %v4803_v7  ;;  %3615 = vmatprep.subr.bf16.mxu1 %v3614_v5  ;;  %v2157_v43 = vld [vmem:[%s4123_s16 + $0x2e8] sm:$0xff]  ;;  %5569 = vst [vmem:[#allocation47_spill] sm:$0xff] %v4812_v51  ;;  %v4815_v36 = vadd.f32 %v1411_v15, %v4549_v60  ;;  %v4818_v1 = vadd.f32 %v1300_v56, %v4546_v8  ;;  %v1413_v5 = vpop.f32.mrb[51].mxu1  ;;  %v2158_v15 = vld [vmem:[%s4123_s16 + $0x2f0] sm:$0xff] }
 0x1dd   : > { %1510 = vxpose.xlu0.b32.start [1/16] %v4359_v2, 128  ;;  %1542 = vxpose.xlu1.b32.start [1/16] %v4363_v6, 128  ;;  %v4809_v2 = vadd.f32 %v1407_v55, %v4549_v60  ;;  %5572 = vst [vmem:[#allocation50_spill] sm:$0xff] %v4821_v13  ;;  %v4824_v6 = vadd.f32 %v1413_v5, %v4555_v29  ;;  %v2140_v55 = vld [vmem:[%s4123_s16 + $0x260] sm:$0xff]  ;;  %v2190_v56 = vld [vmem:[%s4123_s16 + $0x3f0] sm:$0xff] }
 0x1de   : > { %5570 = vst [vmem:[#allocation48_spill] sm:$0xff] %v4815_v36  ;;  %5571 = vst [vmem:[#allocation49_spill] sm:$0xff] %v4818_v1  ;;  %v3590_v58 = vpack.c.bf16 %v2157_v43, %v2156_v63  ;;  %v1987_v20 = vadd.f32 %v4803_v7, %v4800_v30  ;;  %v2000_v62 = vadd.f32 %v4818_v1, %v4812_v51  ;;  %v2143_v1 = vld [vmem:[%s4123_s16 + $0x278] sm:$0xff]  ;;  %v2174_v7 = vld [vmem:[%s4123_s16 + $0x370] sm:$0xff] }
 0x1df   : > { %5568 = vst [vmem:[#allocation46_spill] sm:$0xff] %v4809_v2  ;;  %5573 = vst [vmem:[#allocation51_spill] sm:$0xff] %v4824_v6  ;;  %3617 = vmatpush3.bf16.msra.mxu1 %v3616_v22  ;;  %3585 = vmatpush3.bf16.msra.mxu0 %v3584_v11  ;;  %v2159_v22 = vld [vmem:[%s4123_s16 + $0x2f8] sm:$0xff]  ;;  %v2013_v18 = vadd.f32 %v4815_v36, %v4809_v2  ;;  %v1304_v11 = vpop.f32.mrb[52].mxu0  ;;  %v3592_v5 = vpack.c.bf16 %v2141_v9, %v2140_v55 }
 0x1e0   : > { %3587 = vmatprep.subr.bf16.mxu0 %v3586_v50  ;;  %3619 = vmatprep.subr.bf16.mxu1 %v3618_v42  ;;  %v3622_v50 = vpack.c.bf16 %v2189_v40, %v2188_v38  ;;  %v2026_v42 = vadd.f32 %v4824_v6, %v4821_v13  ;;  %v4847_v63 = vadd.f32 %v1304_v11, %v4543_v24  ;;  %v1417_v43 = vpop.f32.mrb[52].mxu1  ;;  %v2142_v11 = vld [vmem:[%s4123_s16 + $0x270] sm:$0xff]  ;;  %v2175_v51 = vld [vmem:[%s4123_s16 + $0x378] sm:$0xff] }
 0x1e1   : > { %1511 = vxpose.xlu0.b32.cont [2/16] %v4367_v10, 128  ;;  %1543 = vxpose.xlu1.b32.cont [2/16] %v4370_v12, 128  ;;  %v2191_v10 = vld [vmem:[%s4123_s16 + $0x3f8] sm:$0xff]  ;;  %v1306_v12 = vpop.f32.mrb[53].mxu0  ;;  %v4850_v36 = vadd.f32 %v1417_v43, %v4549_v60  ;;  %v1419_v40 = vpop.f32.mrb[53].mxu1  ;;  %v3624_v6 = vpack.c.bf16 %v2173_v41, %v2172_v14  ;;  %v3594_v13 = vpack.c.bf16 %v2159_v22, %v2158_v15 }
 0x1e2   : > { %v4853_v38 = vadd.f32 %v1306_v12, %v4546_v8  ;;  %v1308_v2 = vpop.f32.mrb[54].mxu0  ;;  %v1421_v9 = vpop.f32.mrb[54].mxu1  ;;  %v3626_v12 = vpack.c.bf16 %v2191_v10, %v2190_v56  ;;  %v3596_v22 = vpack.c.bf16 %v2143_v1, %v2142_v11 }
 0x1e3   : > { %3621 = vmatpush3.bf16.msra.mxu1 %v3620_v44  ;;  %3589 = vmatpush3.bf16.msra.mxu0 %v3588_v53  ;;  %v1988_v44 = vadd.f32 %v1987_v20, %v4847_v63  ;;  %v4860_v53 = vadd.f32 %v1419_v40, %v4555_v29  ;;  %v4863_v55 = vadd.f32 %v1308_v2, %v4543_v24  ;;  %v1310_v43 = vpop.f32.mrb[55].mxu0  ;;  %v1423_v41 = vpop.f32.mrb[55].mxu1 }
 0x1e4   : > { %3591 = vmatprep.subr.bf16.mxu0 %v3590_v58  ;;  %v2014_v58 = vadd.f32 %v2013_v18, %v4850_v36  ;;  %v2001_v14 = vadd.f32 %v2000_v62, %v4853_v38  ;;  %v4874_v20 = vadd.f32 %v1310_v43, %v4546_v8  ;;  %v4878_v15 = vadd.f32 %v1423_v41, %v4555_v29 }
 0x1e5   : > { %1512 = vxpose.xlu0.b32.cont [3/16] %v4379_v21, 128  ;;  %1544 = vxpose.xlu1.b32.cont [3/16] %v4383_v26, 128  ;;  %v4871_v21 = vadd.f32 %v1421_v9, %v4549_v60  ;;  %v2027_v2 = vadd.f32 %v2026_v42, %v4860_v53  ;;  %v3628_v26 = vpack.c.bf16 %v2175_v51, %v2174_v7 }
 0x1e6   : > { %3623 = vmatprep.subr.bf16.mxu1 %v3622_v50  ;;  %v1989_v18 = vadd.f32 %v1988_v44, %v4863_v55  ;;  %v2002_v56 = vadd.f32 %v2001_v14, %v4874_v20 }
 0x1e7   : > { %3593 = vmatpush3.bf16.msra.mxu0 %v3592_v5  ;;  %3625 = vmatpush3.bf16.msra.mxu1 %v3624_v6  ;;  %v2015_v62 = vadd.f32 %v2014_v58, %v4871_v21  ;;  %v1314_v10 = vpop.f32.mrb[56].mxu0  ;;  %v2028_v42 = vadd.f32 %v2027_v2, %v4878_v15  ;;  %v1723_v5 = vrot.slane %v4783_v59, 4  ;;  %v1736_v2 = vrot.slane %v4789_v46, 4 }
 0x1e8   : > { %3595 = vmatprep.subr.bf16.mxu0 %v3594_v13  ;;  %3627 = vmatprep.subr.bf16.mxu1 %v3626_v12  ;;  %v4887_v50 = vadd.f32 %v1314_v10, %v4543_v24  ;;  %v1427_v1 = vpop.f32.mrb[56].mxu1  ;;  %v1316_v13 = vpop.f32.mrb[57].mxu0 }
 0x1e9   : > { %1513 = vxpose.xlu0.b32.cont [4/16] %v4388_v31, 128  ;;  %1545 = vxpose.xlu1.b32.cont [4/16] %v4392_v35, 128  ;;  %v1697_v31 = vrot.slane %v4772_v33, 4  ;;  %v4891_v7 = vadd.f32 %v1427_v1, %v4549_v60  ;;  %v4894_v35 = vadd.f32 %v1316_v13, %v4546_v8  ;;  %v1429_v51 = vpop.f32.mrb[57].mxu1  ;;  %v1318_v6 = vpop.f32.mrb[58].mxu0 }
 0x1ea   : > { %v1990_v40 = vadd.f32 %v1989_v18, %v4887_v50  ;;  %v4900_v11 = vadd.f32 %v1429_v51, %v4555_v29  ;;  %v4903_v44 = vadd.f32 %v1318_v6, %v4543_v24  ;;  %v1431_v9 = vpop.f32.mrb[58].mxu1  ;;  %v1320_v43 = vpop.f32.mrb[59].mxu0 }
 0x1eb   : > { %3597 = vmatpush3.bf16.msra.mxu0 %v3596_v22  ;;  %3629 = vmatpush3.bf16.msra.mxu1 %v3628_v26  ;;  %v2016_v12 = vadd.f32 %v2015_v62, %v4891_v7  ;;  %v2003_v58 = vadd.f32 %v2002_v56, %v4894_v35  ;;  %v4909_v14 = vadd.f32 %v1431_v9, %v4549_v60  ;;  %v1433_v41 = vpop.f32.mrb[59].mxu1 }
 0x1ec   : > { %v2029_v22 = vadd.f32 %v2028_v42, %v4900_v11  ;;  %v4917_v26 = vadd.f32 %v1433_v41, %v4555_v29  ;;  %v1698_v18 = vadd.f32 %v1697_v31, %v4772_v33  ;;  %v1724_v62 = vadd.f32 %v1723_v5, %v4783_v59 }
 0x1ed   : > { %1514 = vxpose.xlu0.b32.cont [5/16] %v4399_v45, 128  ;;  %1546 = vxpose.xlu1.b32.cont [5/16] %v4403_v52, 128  ;;  %v4912_v45 = vadd.f32 %v1320_v43, %v4546_v8  ;;  %v1710_v52 = vrot.slane %v4780_v19, 4  ;;  %v1991_v56 = vadd.f32 %v1990_v40, %v4903_v44  ;;  %v2017_v10 = vadd.f32 %v2016_v12, %v4909_v14 }
 0x1ee   : > { %v1737_v42 = vadd.f32 %v1736_v2, %v4789_v46  ;;  %v2030_v51 = vadd.f32 %v2029_v22, %v4917_v26  ;;  %v1699_v6 = vrot.slane %v1698_v18, 2  ;;  %v1725_v43 = vrot.slane %v1724_v62, 2 }
 0x1ef   : > { %v2004_v1 = vadd.f32 %v2003_v58, %v4912_v45  ;;  %v1324_v13 = vpop.f32.mrb[60].mxu0  ;;  %v1711_v5 = vadd.f32 %v1710_v52, %v4780_v19 }
 0x1f0   : > { %v4930_v33 = vadd.f32 %v1324_v13, %v4543_v24  ;;  %v1437_v31 = vpop.f32.mrb[60].mxu1  ;;  %v1326_v59 = vpop.f32.mrb[61].mxu0 }
 0x1f1   : > { %1515 = vxpose.xlu0.b32.cont [6/16] %v4408_v61, 128  ;;  %1547 = vxpose.xlu1.b32.cont [6/16] %v4412_v3, 128  ;;  %v4934_v61 = vadd.f32 %v1437_v31, %v4549_v60  ;;  %v4937_v40 = vadd.f32 %v1326_v59, %v4546_v8  ;;  %v1439_v9 = vpop.f32.mrb[61].mxu1  ;;  %v1328_v3 = vpop.f32.mrb[62].mxu0  ;;  %v1738_v31 = vrot.slane %v1737_v42, 2 }
 0x1f2   : > { %v1992_v46 = vadd.f32 %v1991_v56, %v4930_v33  ;;  %v4941_v12 = vadd.f32 %v1439_v9, %v4555_v29  ;;  %v4944_v58 = vadd.f32 %v1328_v3, %v4543_v24  ;;  %v1441_v41 = vpop.f32.mrb[62].mxu1  ;;  %v1330_v2 = vpop.f32.mrb[63].mxu0  ;;  %v1726_v3 = vadd.f32 %v1725_v43, %v1724_v62 }
 0x1f3   : > { %5574 = vst [vmem:[#allocation52_spill] sm:$0xff] %v4934_v61  ;;  %v2018_v19 = vadd.f32 %v2017_v10, %v4934_v61  ;;  %v2005_v22 = vadd.f32 %v2004_v1, %v4937_v40  ;;  %v4950_v52 = vadd.f32 %v1441_v41, %v4549_v60  ;;  %v4953_v13 = vadd.f32 %v1330_v2, %v4546_v8  ;;  %v1443_v56 = vpop.f32.mrb[63].mxu1 }
 0x1f4   : > { %5575 = vst [vmem:[#allocation53_spill] sm:$0xff] %v4941_v12  ;;  %v2031_v24 = vadd.f32 %v2030_v51, %v4941_v12  ;;  %v1993_v59 = vadd.f32 %v1992_v46, %v4944_v58  ;;  %v1712_v10 = vrot.slane %v1711_v5, 2  ;;  %v1700_v51 = vadd.f32 %v1699_v6, %v1698_v18 }
 0x1f5   : > { %1516 = vxpose.xlu0.b32.cont [7/16] %v4419_v16, 128  ;;  %5576 = vst [vmem:[#allocation54_spill] sm:$0xff] %v4950_v52  ;;  %1548 = vxpose.xlu1.b32.cont [7/16] %v4423_v0, 128  ;;  %v4959_v16 = vadd.f32 %v1443_v56, %v4555_v29  ;;  %v2019_v1 = vadd.f32 %v2018_v19, %v4950_v52 }
 0x1f6   : > { %v2006_v60 = vadd.f32 %v2005_v22, %v4953_v13  ;;  %v1994_v9 = vrot.slane %v1993_v59, 4  ;;  %v1739_v46 = vadd.f32 %v1738_v31, %v1737_v42  ;;  %v1713_v56 = vadd.f32 %v1712_v10, %v1711_v5 }
 0x1f7   : > { %5577 = vst [vmem:[#allocation55_spill] sm:$0xff] %v4959_v16  ;;  %v2032_v8 = vadd.f32 %v2031_v24, %v4959_v16  ;;  %v2020_v0 = vrot.slane %v2019_v1, 4  ;;  %v1727_v22 = vrot.slane %v1726_v3, 1 }
 0x1f8   : > { %v2007_v41 = vrot.slane %v2006_v60, 4  ;;  %v1995_v2 = vadd.f32 %v1994_v9, %v1993_v59  ;;  %v1740_v62 = vrot.slane %v1739_v46, 1  ;;  %v1714_v18 = vrot.slane %v1713_v56, 1 }
 0x1f9   : > { %1517 = vxpose.xlu0.b32.cont [8/16] %v4428_v27, 128  ;;  %1549 = vxpose.xlu1.b32.cont [8/16] %v4447_v48, 128  ;;  %v2033_v29 = vrot.slane %v2032_v8, 4  ;;  %v2021_v12 = vadd.f32 %v2020_v0, %v2019_v1  ;;  %v1701_v27 = vrot.slane %v1700_v51, 1  ;;  %v1728_v59 = vadd.f32 %v1727_v22, %v1726_v3 }
 0x1fa   : > { %v2008_v61 = vadd.f32 %v2007_v41, %v2006_v60  ;;  %v1996_v19 = vrot.slane %v1995_v2, 2  ;;  %v1741_v60 = vadd.f32 %v1740_v62, %v1739_v46 }
 0x1fb   : > { %v2034_v52 = vadd.f32 %v2033_v29, %v2032_v8  ;;  %v2022_v24 = vrot.slane %v2021_v12, 2  ;;  %v1715_v8 = vadd.f32 %v1714_v18, %v1713_v56  ;;  %v5587_v18 = vld [vmem:[#allocation24_spill] sm:$0xff] }
 0x1fc   : > { %v2009_v16 = vrot.slane %v2008_v61, 2  ;;  %v1997_v43 = vadd.f32 %v1996_v19, %v1995_v2  ;;  %v5581_v19 = vld [vmem:[#allocation17_spill] sm:$0xff] }
 0x1fd   : > { %1518 = vxpose.xlu0.b32.cont [9/16] %v4628_v25, 128  ;;  %1550 = vxpose.xlu1.b32.cont [9/16] %v4632_v37, 128  ;;  %v2035_v48 = vrot.slane %v2034_v52, 2  ;;  %v2023_v42 = vadd.f32 %v2022_v24, %v2021_v12  ;;  %v1702_v25 = vadd.f32 %v1701_v27, %v1700_v51  ;;  %v5582_v24 = vld [vmem:[#allocation20_spill] sm:$0xff]  ;;  %v5585_v27 = vld [vmem:[#allocation18_spill] sm:$0xff] }
 0x1fe   : > { %v2010_v6 = vadd.f32 %v2009_v16, %v2008_v61  ;;  %v1998_v31 = vrot.slane %v1997_v43, 1 }
 0x1ff   : > { %v2036_v5 = vadd.f32 %v2035_v48, %v2034_v52  ;;  %v2024_v10 = vrot.slane %v2023_v42, 1 }
 0x200   : > { %v2011_v1 = vrot.slane %v2010_v6, 1  ;;  %v1999_v9 = vadd.f32 %v1998_v31, %v1997_v43  ;;  %v5586_v43 = vld [vmem:[#allocation21_spill] sm:$0xff] }
 0x201   : > { %1519 = vxpose.xlu0.b32.cont [10/16] %v4636_v23, 128  ;;  %1551 = vxpose.xlu1.b32.cont [10/16] %v4639_v34, 128  ;;  %v2037_v37 = vrot.slane %v2036_v5, 1  ;;  %v2025_v0 = vadd.f32 %v2024_v10, %v2023_v42  ;;  %v5590_v10 = vld [vmem:[#allocation27_spill] sm:$0xff] }
 0x202   : > { %v2012_v41 = vadd.f32 %v2011_v1, %v2010_v6  ;;  %v2044_v61 = vsel %vm2039_vm0, %v1702_v25, %v1999_v9  ;;  %v5588_v6 = vld [vmem:[#allocation25_spill] sm:$0xff]  ;;  %v5591_v25 = vld [vmem:[#allocation31_spill] sm:$0xff] }
 0x203   : > { %v2038_v2 = vadd.f32 %v2037_v37, %v2036_v5  ;;  %v2052_v12 = vmul.f32 0.015625, %v2044_v61  ;;  %v2046_v52 = vsel %vm2039_vm0, %v1728_v59, %v2025_v0  ;;  %v5589_v5 = vld [vmem:[#allocation26_spill] sm:$0xff]  ;;  %v5592_v9 = vld [vmem:[#allocation33_spill] sm:$0xff] }
 0x204   : > { %v2045_v23 = vsel %vm2039_vm0, %v1715_v8, %v2012_v41  ;;  %v2054_v3 = vmul.f32 0.015625, %v2046_v52  ;;  %v5593_v8 = vld [vmem:[#allocation34_spill] sm:$0xff]  ;;  %v5594_v41 = vld [vmem:[#allocation36_spill] sm:$0xff] }
 0x205   : > { %1520 = vxpose.xlu0.b32.cont [11/16] %v4651_v39, 128  ;;  %1552 = vxpose.xlu1.b32.cont [11/16] %v4675_v57, 128  ;;  %v2053_v34 = vmul.f32 0.015625, %v2045_v23  ;;  %v2047_v16 = vsel %vm2039_vm0, %v1741_v60, %v2038_v2  ;;  %v2060_v56 = vmax.f32 %v2052_v12, 0.0  ;;  %v5578_v57 = vld [vmem:[#allocation42_spill] sm:$0xff]  ;;  %v5596_v12 = vld [vmem:[#allocation40_spill] sm:$0xff] }
 0x206   : > { %v2055_v51 = vmul.f32 0.015625, %v2047_v16  ;;  %v2062_v29 = vmax.f32 %v2054_v3, 0.0  ;;  %v5595_v61 = vld [vmem:[#allocation38_spill] sm:$0xff]  ;;  %v5597_v16 = vld [vmem:[#allocation47_spill] sm:$0xff] }
 0x207   : > { %v2061_v46 = vmax.f32 %v2053_v34, 0.0 }
 0x208   : > { %v2063_v39 = vmax.f32 %v2055_v51, 0.0  ;;  %v5598_v51 = vld [vmem:[#allocation45_spill] sm:$0xff] }
 0x209   : > { %1521 = vxpose.xlu0.b32.cont [12/16] %v4678_v32, 128  ;;  %1553 = vxpose.xlu1.b32.cont [12/16] %v4687_v4, 128  ;;  %v5579_v32 = vld [vmem:[#allocation43_spill] sm:$0xff]  ;;  %v5580_v4 = vld [vmem:[#allocation44_spill] sm:$0xff] }
 0x20a   : > { %2396 = vmatprep.mubr.f32.mxu0 %v2061_v46  ;;  %2466 = vmatprep.mubr.f32.mxu1 %v2063_v39 }
 0x20b   : > { %2397 = vmatmul.mubr.f32.vlgmr.msra.gmra.mrb[66].mxu0 %v2060_v56  ;;  %2467 = vmatmul.mubr.f32.vlgmr.msra.gmra.mrb[66].mxu1 %v2062_v29  ;;  %v5599_v29 = vld [vmem:[#allocation49_spill] sm:$0xff] }
 0x20d   : > { %1522 = vxpose.xlu0.b32.cont [13/16] %v4696_v28, 128  ;;  %1554 = vxpose.xlu1.b32.cont [13/16] %v4707_v47, 128  ;;  %v5583_v47 = vld [vmem:[#allocation14_spill] sm:$0xff] }
 0x211   : > { %1523 = vxpose.xlu0.b32.cont [14/16] %v4714_v54, 128  ;;  %1555 = vxpose.xlu1.b32.cont [14/16] %v4717_v49, 128  ;;  %v5584_v49 = vld [vmem:[#allocation15_spill] sm:$0xff] }
 0x215   : > { %1524 = vxpose.xlu0.b32.cont [15/16] %v4755_v17, 128  ;;  %1556 = vxpose.xlu1.b32.cont [15/16] %v5578_v57, 128 }
 0x219   : > { %1525 = vxpose.xlu0.b32.end [16/16] %v5579_v32, 128  ;;  %1557 = vxpose.xlu1.b32.end [16/16] %v5580_v4, 128  ;;  %v5600_v4 = vld [vmem:[#allocation10_spill] sm:$0xff] }
 0x21d   : > { %1742 = vxpose.xlu0.b32.start [1/16] %v5581_v19, 128  ;;  %v1462_v22 = vpop.trf.xlu0  ;;  %1774 = vxpose.xlu1.b32.start [1/16] %v5582_v24, 128  ;;  %v1494_v28 = vpop.trf.xlu1  ;;  %v5601_v19 = vld [vmem:[#allocation12_spill] sm:$0xff]  ;;  %v5603_v24 = vld [vmem:[#allocation13_spill] sm:$0xff] }
 0x21e   : > { %1574 = vst [vmem:[%s4990_s14] sm:$0xff] %v1462_v22  ;;  %1590 = vst [vmem:[%s4990_s14 + $0x80] sm:$0xff] %v1494_v28  ;;  %v5602_v22 = vld [vmem:[#allocation11_spill] sm:$0xff]  ;;  %v5604_v28 = vld [vmem:[#allocation16_spill] sm:$0xff] }
 0x221   : > { %1743 = vxpose.xlu0.b32.cont [2/16] %v5583_v47, 128  ;;  %v1463_v54 = vpop.trf.xlu0  ;;  %1775 = vxpose.xlu1.b32.cont [2/16] %v5584_v49, 128  ;;  %v1495_v17 = vpop.trf.xlu1 }
 0x222   : > { %1575 = vst [vmem:[%s4990_s14 + $0x8] sm:$0xff] %v1463_v54  ;;  %1591 = vst [vmem:[%s4990_s14 + $0x88] sm:$0xff] %v1495_v17  ;;  %v5605_v54 = vld [vmem:[#allocation19_spill] sm:$0xff]  ;;  %v5606_v17 = vld [vmem:[#allocation22_spill] sm:$0xff] }
 0x225   : > { %1744 = vxpose.xlu0.b32.cont [3/16] %v5585_v27, 128  ;;  %v1464_v62 = vpop.trf.xlu0  ;;  %1776 = vxpose.xlu1.b32.cont [3/16] %v5586_v43, 128  ;;  %v1496_v48 = vpop.trf.xlu1 }
 0x226   : > { %1576 = vst [vmem:[%s4990_s14 + $0x10] sm:$0xff] %v1464_v62  ;;  %1592 = vst [vmem:[%s4990_s14 + $0x90] sm:$0xff] %v1496_v48  ;;  %v5607_v62 = vld [vmem:[#allocation23_spill] sm:$0xff]  ;;  %v5608_v48 = vld [vmem:[#allocation28_spill] sm:$0xff] }
 0x229   : > { %1745 = vxpose.xlu0.b32.cont [4/16] %v5587_v18, 128  ;;  %v1465_v42 = vpop.trf.xlu0  ;;  %1777 = vxpose.xlu1.b32.cont [4/16] %v5588_v6, 128  ;;  %v1497_v31 = vpop.trf.xlu1 }
 0x22a   : > { %1577 = vst [vmem:[%s4990_s14 + $0x18] sm:$0xff] %v1465_v42  ;;  %1593 = vst [vmem:[%s4990_s14 + $0x98] sm:$0xff] %v1497_v31  ;;  %v5609_v42 = vld [vmem:[#allocation29_spill] sm:$0xff]  ;;  %v5610_v31 = vld [vmem:[#allocation30_spill] sm:$0xff] }
 0x22d   : > { %1746 = vxpose.xlu0.b32.cont [5/16] %v5589_v5, 128  ;;  %v1466_v59 = vpop.trf.xlu0  ;;  %1778 = vxpose.xlu1.b32.cont [5/16] %v5590_v10, 128  ;;  %v1498_v1 = vpop.trf.xlu1 }
 0x22e   : > { %1578 = vst [vmem:[%s4990_s14 + $0x20] sm:$0xff] %v1466_v59  ;;  %1594 = vst [vmem:[%s4990_s14 + $0xa0] sm:$0xff] %v1498_v1  ;;  %v5611_v59 = vld [vmem:[#allocation32_spill] sm:$0xff]  ;;  %v5612_v1 = vld [vmem:[#allocation35_spill] sm:$0xff] }
 0x231   : > { %1747 = vxpose.xlu0.b32.cont [6/16] %v5591_v25, 128  ;;  %v1467_v60 = vpop.trf.xlu0  ;;  %1779 = vxpose.xlu1.b32.cont [6/16] %v5592_v9, 128  ;;  %v1499_v37 = vpop.trf.xlu1 }
 0x232   : > { %1579 = vst [vmem:[%s4990_s14 + $0x28] sm:$0xff] %v1467_v60  ;;  %1595 = vst [vmem:[%s4990_s14 + $0xa8] sm:$0xff] %v1499_v37  ;;  %v5613_v60 = vld [vmem:[#allocation37_spill] sm:$0xff]  ;;  %v5614_v37 = vld [vmem:[#allocation39_spill] sm:$0xff] }
 0x235   : > { %1748 = vxpose.xlu0.b32.cont [7/16] %v5593_v8, 128  ;;  %v1468_v0 = vpop.trf.xlu0  ;;  %1780 = vxpose.xlu1.b32.cont [7/16] %v5594_v41, 128  ;;  %v1500_v2 = vpop.trf.xlu1 }
 0x236   : > { %1580 = vst [vmem:[%s4990_s14 + $0x30] sm:$0xff] %v1468_v0  ;;  %1596 = vst [vmem:[%s4990_s14 + $0xb0] sm:$0xff] %v1500_v2  ;;  %v5615_v0 = vld [vmem:[#allocation41_spill] sm:$0xff]  ;;  %v5616_v2 = vld [vmem:[#allocation46_spill] sm:$0xff] }
 0x239   : > { %1749 = vxpose.xlu0.b32.cont [8/16] %v5595_v61, 128  ;;  %v1469_v23 = vpop.trf.xlu0  ;;  %1781 = vxpose.xlu1.b32.cont [8/16] %v5596_v12, 128  ;;  %v1501_v52 = vpop.trf.xlu1 }
 0x23a   : > { %1581 = vst [vmem:[%s4990_s14 + $0x38] sm:$0xff] %v1469_v23  ;;  %1597 = vst [vmem:[%s4990_s14 + $0xb8] sm:$0xff] %v1501_v52  ;;  %v5617_v23 = vld [vmem:[#allocation50_spill] sm:$0xff]  ;;  %v5618_v52 = vld [vmem:[#allocation48_spill] sm:$0xff] }
 0x23d   : > { %1750 = vxpose.xlu0.b32.cont [9/16] %v4800_v30, 128  ;;  %v1470_v34 = vpop.trf.xlu0  ;;  %1782 = vxpose.xlu1.b32.cont [9/16] %v5597_v16, 128  ;;  %v1502_v3 = vpop.trf.xlu1  ;;  %v5619_v16 = vld [vmem:[#allocation51_spill] sm:$0xff] }
 0x23e   : > { %1582 = vst [vmem:[%s4990_s14 + $0x40] sm:$0xff] %v1470_v34  ;;  %1598 = vst [vmem:[%s4990_s14 + $0xc0] sm:$0xff] %v1502_v3 }
 0x241   : > { %1751 = vxpose.xlu0.b32.cont [10/16] %v5598_v51, 128  ;;  %v1471_v46 = vpop.trf.xlu0  ;;  %1783 = vxpose.xlu1.b32.cont [10/16] %v5599_v29, 128  ;;  %v1503_v39 = vpop.trf.xlu1 }
 0x242   : > { %1583 = vst [vmem:[%s4990_s14 + $0x48] sm:$0xff] %v1471_v46  ;;  %1599 = vst [vmem:[%s4990_s14 + $0xc8] sm:$0xff] %v1503_v39 }
 0x245   : > { %1752 = vxpose.xlu0.b32.cont [11/16] %v4847_v63, 128  ;;  %v1472_v30 = vpop.trf.xlu0  ;;  %1784 = vxpose.xlu1.b32.cont [11/16] %v4853_v38, 128  ;;  %v1504_v56 = vpop.trf.xlu1 }
 0x246   : > { %1584 = vst [vmem:[%s4990_s14 + $0x50] sm:$0xff] %v1472_v30  ;;  %1600 = vst [vmem:[%s4990_s14 + $0xd0] sm:$0xff] %v1504_v56  ;;  %v5621_v56 = vld [vmem:[#allocation53_spill] sm:$0xff] }
 0x249   : > { %1753 = vxpose.xlu0.b32.cont [12/16] %v4863_v55, 128  ;;  %v1473_v57 = vpop.trf.xlu0  ;;  %1785 = vxpose.xlu1.b32.cont [12/16] %v4874_v20, 128  ;;  %v1505_v32 = vpop.trf.xlu1 }
 0x24a   : > { %1585 = vst [vmem:[%s4990_s14 + $0x58] sm:$0xff] %v1473_v57  ;;  %1601 = vst [vmem:[%s4990_s14 + $0xd8] sm:$0xff] %v1505_v32  ;;  %v5622_v57 = vld [vmem:[#allocation54_spill] sm:$0xff]  ;;  %v5623_v32 = vld [vmem:[#allocation55_spill] sm:$0xff] }
 0x24d   : > { %1754 = vxpose.xlu0.b32.cont [13/16] %v4887_v50, 128  ;;  %v1474_v63 = vpop.trf.xlu0  ;;  %1786 = vxpose.xlu1.b32.cont [13/16] %v4894_v35, 128  ;;  %v1506_v38 = vpop.trf.xlu1 }
 0x24e   : > { %1586 = vst [vmem:[%s4990_s14 + $0x60] sm:$0xff] %v1474_v63  ;;  %1602 = vst [vmem:[%s4990_s14 + $0xe0] sm:$0xff] %v1506_v38 }
 0x251   : > { %1755 = vxpose.xlu0.b32.cont [14/16] %v4903_v44, 128  ;;  %v1475_v55 = vpop.trf.xlu0  ;;  %1787 = vxpose.xlu1.b32.cont [14/16] %v4912_v45, 128  ;;  %v1507_v20 = vpop.trf.xlu1 }
 0x252   : > { %1587 = vst [vmem:[%s4990_s14 + $0x68] sm:$0xff] %v1475_v55  ;;  %1603 = vst [vmem:[%s4990_s14 + $0xe8] sm:$0xff] %v1507_v20 }
 0x255   : > { %1756 = vxpose.xlu0.b32.cont [15/16] %v4930_v33, 128  ;;  %v1476_v50 = vpop.trf.xlu0  ;;  %1788 = vxpose.xlu1.b32.cont [15/16] %v4937_v40, 128  ;;  %v1508_v35 = vpop.trf.xlu1 }
 0x256   : > { %1588 = vst [vmem:[%s4990_s14 + $0x70] sm:$0xff] %v1476_v50  ;;  %1604 = vst [vmem:[%s4990_s14 + $0xf0] sm:$0xff] %v1508_v35 }
 0x259   : > { %1757 = vxpose.xlu0.b32.end [16/16] %v4944_v58, 128  ;;  %v1477_v44 = vpop.trf.xlu0  ;;  %1789 = vxpose.xlu1.b32.end [16/16] %v4953_v13, 128  ;;  %v1509_v45 = vpop.trf.xlu1 }
 0x25a   : > { %1589 = vst [vmem:[%s4990_s14 + $0x78] sm:$0xff] %v1477_v44  ;;  %1605 = vst [vmem:[%s4990_s14 + $0xf8] sm:$0xff] %v1509_v45 }
 0x25d   : > { %1806 = vxpose.xlu0.b32.start [1/16] %v5600_v4, 128  ;;  %v1526_v33 = vpop.trf.xlu0  ;;  %1838 = vxpose.xlu1.b32.start [1/16] %v5601_v19, 128  ;;  %v1558_v40 = vpop.trf.xlu1 }
 0x25e   : > { %1606 = vst [vmem:[%s4990_s14 + $0x100] sm:$0xff] %v1526_v33  ;;  %1622 = vst [vmem:[%s4990_s14 + $0x180] sm:$0xff] %v1558_v40 }
 0x261   : > { %1807 = vxpose.xlu0.b32.cont [2/16] %v5602_v22, 128  ;;  %v1527_v58 = vpop.trf.xlu0  ;;  %1839 = vxpose.xlu1.b32.cont [2/16] %v5603_v24, 128  ;;  %v1559_v13 = vpop.trf.xlu1 }
 0x262   : > { %1607 = vst [vmem:[%s4990_s14 + $0x108] sm:$0xff] %v1527_v58  ;;  %1623 = vst [vmem:[%s4990_s14 + $0x188] sm:$0xff] %v1559_v13 }
 0x265   : > { %1808 = vxpose.xlu0.b32.cont [3/16] %v5604_v28, 128  ;;  %v1528_v47 = vpop.trf.xlu0  ;;  %1840 = vxpose.xlu1.b32.cont [3/16] %v5605_v54, 128  ;;  %v1560_v49 = vpop.trf.xlu1 }
 0x266   : > { %1608 = vst [vmem:[%s4990_s14 + $0x110] sm:$0xff] %v1528_v47  ;;  %1624 = vst [vmem:[%s4990_s14 + $0x190] sm:$0xff] %v1560_v49 }
 0x269   : > { %1809 = vxpose.xlu0.b32.cont [4/16] %v5606_v17, 128  ;;  %v1529_v27 = vpop.trf.xlu0  ;;  %1841 = vxpose.xlu1.b32.cont [4/16] %v5607_v62, 128  ;;  %v1561_v43 = vpop.trf.xlu1 }
 0x26a   : > { %1609 = vst [vmem:[%s4990_s14 + $0x118] sm:$0xff] %v1529_v27  ;;  %1625 = vst [vmem:[%s4990_s14 + $0x198] sm:$0xff] %v1561_v43 }
 0x26d   : > { %1810 = vxpose.xlu0.b32.cont [5/16] %v5608_v48, 128  ;;  %v1530_v18 = vpop.trf.xlu0  ;;  %1842 = vxpose.xlu1.b32.cont [5/16] %v5609_v42, 128  ;;  %v1562_v6 = vpop.trf.xlu1 }
 0x26e   : > { %1610 = vst [vmem:[%s4990_s14 + $0x120] sm:$0xff] %v1530_v18  ;;  %1626 = vst [vmem:[%s4990_s14 + $0x1a0] sm:$0xff] %v1562_v6 }
 0x271   : > { %1811 = vxpose.xlu0.b32.cont [6/16] %v5610_v31, 128  ;;  %v1531_v5 = vpop.trf.xlu0  ;;  %1843 = vxpose.xlu1.b32.cont [6/16] %v5611_v59, 128  ;;  %v1563_v10 = vpop.trf.xlu1 }
 0x272   : > { %1611 = vst [vmem:[%s4990_s14 + $0x128] sm:$0xff] %v1531_v5  ;;  %1627 = vst [vmem:[%s4990_s14 + $0x1a8] sm:$0xff] %v1563_v10 }
 0x275   : > { %1812 = vxpose.xlu0.b32.cont [7/16] %v5612_v1, 128  ;;  %v1532_v25 = vpop.trf.xlu0  ;;  %1844 = vxpose.xlu1.b32.cont [7/16] %v5613_v60, 128  ;;  %v1564_v9 = vpop.trf.xlu1 }
 0x276   : > { %1612 = vst [vmem:[%s4990_s14 + $0x130] sm:$0xff] %v1532_v25  ;;  %1628 = vst [vmem:[%s4990_s14 + $0x1b0] sm:$0xff] %v1564_v9 }
 0x279   : > { %1813 = vxpose.xlu0.b32.cont [8/16] %v5614_v37, 128  ;;  %v1533_v8 = vpop.trf.xlu0  ;;  %1845 = vxpose.xlu1.b32.cont [8/16] %v5615_v0, 128  ;;  %v1565_v41 = vpop.trf.xlu1 }
 0x27a   : > { %1613 = vst [vmem:[%s4990_s14 + $0x138] sm:$0xff] %v1533_v8  ;;  %1629 = vst [vmem:[%s4990_s14 + $0x1b8] sm:$0xff] %v1565_v41 }
 0x27d   : > { %1814 = vxpose.xlu0.b32.cont [9/16] %v5616_v2, 128  ;;  %v1534_v61 = vpop.trf.xlu0  ;;  %1846 = vxpose.xlu1.b32.cont [9/16] %v5617_v23, 128  ;;  %v1566_v12 = vpop.trf.xlu1 }
 0x27e   : > { %1614 = vst [vmem:[%s4990_s14 + $0x140] sm:$0xff] %v1534_v61  ;;  %1630 = vst [vmem:[%s4990_s14 + $0x1c0] sm:$0xff] %v1566_v12 }
 0x281   : > { %1815 = vxpose.xlu0.b32.cont [10/16] %v5618_v52, 128  ;;  %v1535_v34 = vpop.trf.xlu0  ;;  %1847 = vxpose.xlu1.b32.cont [10/16] %v5619_v16, 128  ;;  %v1567_v3 = vpop.trf.xlu1 }
 0x282   : > { %1615 = vst [vmem:[%s4990_s14 + $0x148] sm:$0xff] %v1535_v34  ;;  %1631 = vst [vmem:[%s4990_s14 + $0x1c8] sm:$0xff] %v1567_v3 }
 0x285   : > { %1816 = vxpose.xlu0.b32.cont [11/16] %v4850_v36, 128  ;;  %v1536_v51 = vpop.trf.xlu0  ;;  %1848 = vxpose.xlu1.b32.cont [11/16] %v4860_v53, 128  ;;  %v1568_v46 = vpop.trf.xlu1 }
 0x286   : > { %1616 = vst [vmem:[%s4990_s14 + $0x150] sm:$0xff] %v1536_v51  ;;  %1632 = vst [vmem:[%s4990_s14 + $0x1d0] sm:$0xff] %v1568_v46 }
 0x289   : > { %1817 = vxpose.xlu0.b32.cont [12/16] %v4871_v21, 128  ;;  %v1537_v29 = vpop.trf.xlu0  ;;  %1849 = vxpose.xlu1.b32.cont [12/16] %v4878_v15, 128  ;;  %v1569_v39 = vpop.trf.xlu1 }
 0x28a   : > { %1617 = vst [vmem:[%s4990_s14 + $0x158] sm:$0xff] %v1537_v29  ;;  %1633 = vst [vmem:[%s4990_s14 + $0x1d8] sm:$0xff] %v1569_v39 }
 0x28d   : > { %1818 = vxpose.xlu0.b32.cont [13/16] %v4891_v7, 128  ;;  %v1538_v36 = vpop.trf.xlu0  ;;  %1850 = vxpose.xlu1.b32.cont [13/16] %v4900_v11, 128  ;;  %v1570_v53 = vpop.trf.xlu1  ;;  %v5620_v7 = vld [vmem:[#allocation52_spill] sm:$0xff] }
 0x28e   : > { %1618 = vst [vmem:[%s4990_s14 + $0x160] sm:$0xff] %v1538_v36  ;;  %1634 = vst [vmem:[%s4990_s14 + $0x1e0] sm:$0xff] %v1570_v53 }
 0x291   : > { %1819 = vxpose.xlu0.b32.cont [14/16] %v4909_v14, 128  ;;  %v1539_v21 = vpop.trf.xlu0  ;;  %1851 = vxpose.xlu1.b32.cont [14/16] %v4917_v26, 128  ;;  %v1571_v15 = vpop.trf.xlu1 }
 0x292   : > { %1619 = vst [vmem:[%s4990_s14 + $0x168] sm:$0xff] %v1539_v21  ;;  %1635 = vst [vmem:[%s4990_s14 + $0x1e8] sm:$0xff] %v1571_v15 }
 0x295   : > { %1820 = vxpose.xlu0.b32.cont [15/16] %v5620_v7, 128  ;;  %v1540_v30 = vpop.trf.xlu0  ;;  %1852 = vxpose.xlu1.b32.cont [15/16] %v5621_v56, 128  ;;  %v1572_v11 = vpop.trf.xlu1 }
 0x296   : > { %1620 = vst [vmem:[%s4990_s14 + $0x170] sm:$0xff] %v1540_v30  ;;  %1636 = vst [vmem:[%s4990_s14 + $0x1f0] sm:$0xff] %v1572_v11 }
 0x299   : > { %1821 = vxpose.xlu0.b32.end [16/16] %v5622_v57, 128  ;;  %v1541_v14 = vpop.trf.xlu0  ;;  %1853 = vxpose.xlu1.b32.end [16/16] %v5623_v32, 128  ;;  %v1573_v26 = vpop.trf.xlu1 }
 0x29a   : > { %1621 = vst [vmem:[%s4990_s14 + $0x178] sm:$0xff] %v1541_v14  ;;  %1637 = vst [vmem:[%s4990_s14 + $0x1f8] sm:$0xff] %v1573_v26 }
 0x29d   : > { %v1758_v63 = vpop.trf.xlu0  ;;  %v1790_v38 = vpop.trf.xlu1 }
 0x29e   : > { %3289 = vst [vmem:[%s4990_s14 + $0x200] sm:$0xff] %v1758_v63  ;;  %3305 = vst [vmem:[%s4990_s14 + $0x280] sm:$0xff] %v1790_v38  ;;  %v3394_v55 = vpop.f32.mrb[64].mxu0  ;;  %v3429_v20 = vpop.f32.mrb[64].mxu1 }
 0x29f   : > { %v3395_v50 = vpop.f32.mrb[65].mxu0  ;;  %v3430_v44 = vpop.f32.mrb[65].mxu1 }
 0x2a0   : > { %v3396_v35 = vadd.f32 %v3395_v50, %v3394_v55  ;;  %v3431_v4 = vadd.f32 %v3430_v44, %v3429_v20 }
 0x2a1   : > { %v1759_v45 = vpop.trf.xlu0  ;;  %v1791_v33 = vpop.trf.xlu1 }
 0x2a2   : > { %3290 = vst [vmem:[%s4990_s14 + $0x208] sm:$0xff] %v1759_v45  ;;  %3306 = vst [vmem:[%s4990_s14 + $0x288] sm:$0xff] %v1791_v33  ;;  %v5122_v19 = vadd.f32 %v3431_v4, %v3396_v35 }
 0x2a5   : > { %v1760_v40 = vpop.trf.xlu0  ;;  %v1792_v22 = vpop.trf.xlu1 }
 0x2a6   : > { %3291 = vst [vmem:[%s4990_s14 + $0x210] sm:$0xff] %v1760_v40  ;;  %3307 = vst [vmem:[%s4990_s14 + $0x290] sm:$0xff] %v1792_v22 }
 0x2a9   : > { %v1761_v58 = vpop.trf.xlu0  ;;  %v1793_v24 = vpop.trf.xlu1 }
 0x2aa   : > { %3292 = vst [vmem:[%s4990_s14 + $0x218] sm:$0xff] %v1761_v58  ;;  %3308 = vst [vmem:[%s4990_s14 + $0x298] sm:$0xff] %v1793_v24 }
 0x2ad   : > { %v1762_v13 = vpop.trf.xlu0  ;;  %v1794_v28 = vpop.trf.xlu1 }
 0x2ae   : > { %3293 = vst [vmem:[%s4990_s14 + $0x220] sm:$0xff] %v1762_v13  ;;  %3309 = vst [vmem:[%s4990_s14 + $0x2a0] sm:$0xff] %v1794_v28  ;;  %v2778_v13 = vld [vmem:[%s4990_s14] sm:$0xff] (%p5624_p8)  ;;  %v2780_v28 = vld [vmem:[%s4990_s14 + $0x8] sm:$0xff] (%p5624_p8) }
 0x2af   : > { %2779 = vst [vmem:[%s5199_s28] sm:$0xff] (%p5624_p8), %v2778_v13  ;;  %2781 = vst [vmem:[%s5199_s28 + $0x8] sm:$0xff] (%p5624_p8), %v2780_v28  ;;  %v2906_v13 = vld [vmem:[%s4990_s14 + $0x200] sm:$0xff] (%p5624_p8)  ;;  %v2908_v28 = vld [vmem:[%s4990_s14 + $0x208] sm:$0xff] (%p5624_p8) }
 0x2b0   : > { %2907 = vst [vmem:[%s5199_s28 + $0x400] sm:$0xff] (%p5624_p8), %v2906_v13  ;;  %2909 = vst [vmem:[%s5199_s28 + $0x408] sm:$0xff] (%p5624_p8), %v2908_v28 }
 0x2b1   : > { %v1763_v47 = vpop.trf.xlu0  ;;  %v1795_v54 = vpop.trf.xlu1 }
 0x2b2   : > { %3294 = vst [vmem:[%s4990_s14 + $0x228] sm:$0xff] %v1763_v47  ;;  %3310 = vst [vmem:[%s4990_s14 + $0x2a8] sm:$0xff] %v1795_v54  ;;  %v2782_v47 = vld [vmem:[%s4990_s14 + $0x10] sm:$0xff] (%p5624_p8)  ;;  %v2784_v54 = vld [vmem:[%s4990_s14 + $0x18] sm:$0xff] (%p5624_p8) }
 0x2b3   : > { %2783 = vst [vmem:[%s5199_s28 + $0x10] sm:$0xff] (%p5624_p8), %v2782_v47  ;;  %2785 = vst [vmem:[%s5199_s28 + $0x18] sm:$0xff] (%p5624_p8), %v2784_v54  ;;  %v2910_v47 = vld [vmem:[%s4990_s14 + $0x210] sm:$0xff] (%p5624_p8)  ;;  %v2912_v54 = vld [vmem:[%s4990_s14 + $0x218] sm:$0xff] (%p5624_p8) }
 0x2b4   : > { %2911 = vst [vmem:[%s5199_s28 + $0x410] sm:$0xff] (%p5624_p8), %v2910_v47  ;;  %2913 = vst [vmem:[%s5199_s28 + $0x418] sm:$0xff] (%p5624_p8), %v2912_v54 }
 0x2b5   : > { %v1764_v49 = vpop.trf.xlu0  ;;  %v1796_v17 = vpop.trf.xlu1 }
 0x2b6   : > { %3295 = vst [vmem:[%s4990_s14 + $0x230] sm:$0xff] %v1764_v49  ;;  %3311 = vst [vmem:[%s4990_s14 + $0x2b0] sm:$0xff] %v1796_v17  ;;  %v2786_v49 = vld [vmem:[%s4990_s14 + $0x20] sm:$0xff] (%p5624_p8)  ;;  %v2788_v17 = vld [vmem:[%s4990_s14 + $0x28] sm:$0xff] (%p5624_p8) }
 0x2b7   : > { %2787 = vst [vmem:[%s5199_s28 + $0x20] sm:$0xff] (%p5624_p8), %v2786_v49  ;;  %2789 = vst [vmem:[%s5199_s28 + $0x28] sm:$0xff] (%p5624_p8), %v2788_v17  ;;  %v2914_v49 = vld [vmem:[%s4990_s14 + $0x220] sm:$0xff] (%p5624_p8) }
 0x2b8   : > { %2915 = vst [vmem:[%s5199_s28 + $0x420] sm:$0xff] (%p5624_p8), %v2914_v49 }
 0x2b9   : > { %v1765_v27 = vpop.trf.xlu0  ;;  %v1797_v62 = vpop.trf.xlu1  ;;  %v2916_v17 = vld [vmem:[%s4990_s14 + $0x228] sm:$0xff] (%p5624_p8) }
 0x2ba   : > { %3296 = vst [vmem:[%s4990_s14 + $0x238] sm:$0xff] %v1765_v27  ;;  %3312 = vst [vmem:[%s4990_s14 + $0x2b8] sm:$0xff] %v1797_v62  ;;  %v2790_v27 = vld [vmem:[%s4990_s14 + $0x30] sm:$0xff] (%p5624_p8)  ;;  %v2792_v62 = vld [vmem:[%s4990_s14 + $0x38] sm:$0xff] (%p5624_p8) }
 0x2bb   : > { %2791 = vst [vmem:[%s5199_s28 + $0x30] sm:$0xff] (%p5624_p8), %v2790_v27  ;;  %2793 = vst [vmem:[%s5199_s28 + $0x38] sm:$0xff] (%p5624_p8), %v2792_v62 }
 0x2bc   : > { %2917 = vst [vmem:[%s5199_s28 + $0x428] sm:$0xff] (%p5624_p8), %v2916_v17 }
 0x2bd   : > { %v1766_v43 = vpop.trf.xlu0  ;;  %v1798_v48 = vpop.trf.xlu1  ;;  %v2918_v27 = vld [vmem:[%s4990_s14 + $0x230] sm:$0xff] (%p5624_p8) }
 0x2be   : > { %3297 = vst [vmem:[%s4990_s14 + $0x240] sm:$0xff] %v1766_v43  ;;  %3313 = vst [vmem:[%s4990_s14 + $0x2c0] sm:$0xff] %v1798_v48  ;;  %v2794_v43 = vld [vmem:[%s4990_s14 + $0x40] sm:$0xff] (%p5624_p8)  ;;  %v2796_v48 = vld [vmem:[%s4990_s14 + $0x48] sm:$0xff] (%p5624_p8) }
 0x2bf   : > { %2795 = vst [vmem:[%s5199_s28 + $0x40] sm:$0xff] (%p5624_p8), %v2794_v43  ;;  %2797 = vst [vmem:[%s5199_s28 + $0x48] sm:$0xff] (%p5624_p8), %v2796_v48 }
 0x2c0   : > { %2919 = vst [vmem:[%s5199_s28 + $0x430] sm:$0xff] (%p5624_p8), %v2918_v27 }
 0x2c1   : > { %v1767_v18 = vpop.trf.xlu0  ;;  %v1799_v42 = vpop.trf.xlu1  ;;  %v2920_v62 = vld [vmem:[%s4990_s14 + $0x238] sm:$0xff] (%p5624_p8) }
 0x2c2   : > { %3298 = vst [vmem:[%s4990_s14 + $0x248] sm:$0xff] %v1767_v18  ;;  %3314 = vst [vmem:[%s4990_s14 + $0x2c8] sm:$0xff] %v1799_v42  ;;  %v2798_v18 = vld [vmem:[%s4990_s14 + $0x50] sm:$0xff] (%p5624_p8)  ;;  %v2800_v42 = vld [vmem:[%s4990_s14 + $0x58] sm:$0xff] (%p5624_p8) }
 0x2c3   : > { %2799 = vst [vmem:[%s5199_s28 + $0x50] sm:$0xff] (%p5624_p8), %v2798_v18  ;;  %2801 = vst [vmem:[%s5199_s28 + $0x58] sm:$0xff] (%p5624_p8), %v2800_v42 }
 0x2c4   : > { %2921 = vst [vmem:[%s5199_s28 + $0x438] sm:$0xff] (%p5624_p8), %v2920_v62 }
 0x2c5   : > { %v1768_v6 = vpop.trf.xlu0  ;;  %v1800_v31 = vpop.trf.xlu1  ;;  %v2922_v43 = vld [vmem:[%s4990_s14 + $0x240] sm:$0xff] (%p5624_p8) }
 0x2c6   : > { %3299 = vst [vmem:[%s4990_s14 + $0x250] sm:$0xff] %v1768_v6  ;;  %3315 = vst [vmem:[%s4990_s14 + $0x2d0] sm:$0xff] %v1800_v31  ;;  %v2802_v6 = vld [vmem:[%s4990_s14 + $0x60] sm:$0xff] (%p5624_p8)  ;;  %v2804_v31 = vld [vmem:[%s4990_s14 + $0x68] sm:$0xff] (%p5624_p8) }
 0x2c7   : > { %2803 = vst [vmem:[%s5199_s28 + $0x60] sm:$0xff] (%p5624_p8), %v2802_v6  ;;  %2805 = vst [vmem:[%s5199_s28 + $0x68] sm:$0xff] (%p5624_p8), %v2804_v31 }
 0x2c8   : > { %2923 = vst [vmem:[%s5199_s28 + $0x440] sm:$0xff] (%p5624_p8), %v2922_v43 }
 0x2c9   : > { %v1769_v5 = vpop.trf.xlu0  ;;  %v1801_v59 = vpop.trf.xlu1  ;;  %v2924_v48 = vld [vmem:[%s4990_s14 + $0x248] sm:$0xff] (%p5624_p8) }
 0x2ca   : > { %3300 = vst [vmem:[%s4990_s14 + $0x258] sm:$0xff] %v1769_v5  ;;  %3316 = vst [vmem:[%s4990_s14 + $0x2d8] sm:$0xff] %v1801_v59  ;;  %v2806_v5 = vld [vmem:[%s4990_s14 + $0x70] sm:$0xff] (%p5624_p8)  ;;  %v2808_v59 = vld [vmem:[%s4990_s14 + $0x78] sm:$0xff] (%p5624_p8) }
 0x2cb   : > { %2807 = vst [vmem:[%s5199_s28 + $0x70] sm:$0xff] (%p5624_p8), %v2806_v5  ;;  %2809 = vst [vmem:[%s5199_s28 + $0x78] sm:$0xff] (%p5624_p8), %v2808_v59 }
 0x2cc   : > { %2925 = vst [vmem:[%s5199_s28 + $0x448] sm:$0xff] (%p5624_p8), %v2924_v48 }
 0x2cd   : > { %v1770_v10 = vpop.trf.xlu0  ;;  %v1802_v1 = vpop.trf.xlu1  ;;  %v2926_v18 = vld [vmem:[%s4990_s14 + $0x250] sm:$0xff] (%p5624_p8) }
 0x2ce   : > { %3301 = vst [vmem:[%s4990_s14 + $0x260] sm:$0xff] %v1770_v10  ;;  %3317 = vst [vmem:[%s4990_s14 + $0x2e0] sm:$0xff] %v1802_v1  ;;  %v2810_v10 = vld [vmem:[%s4990_s14 + $0x80] sm:$0xff] (%p5624_p8)  ;;  %v2812_v1 = vld [vmem:[%s4990_s14 + $0x88] sm:$0xff] (%p5624_p8) }
 0x2cf   : > { %2811 = vst [vmem:[%s5199_s28 + $0x80] sm:$0xff] (%p5624_p8), %v2810_v10  ;;  %2813 = vst [vmem:[%s5199_s28 + $0x88] sm:$0xff] (%p5624_p8), %v2812_v1  ;;  %v2938_v10 = vld [vmem:[%s4990_s14 + $0x280] sm:$0xff] (%p5624_p8)  ;;  %v2940_v1 = vld [vmem:[%s4990_s14 + $0x288] sm:$0xff] (%p5624_p8) }
 0x2d0   : > { %2927 = vst [vmem:[%s5199_s28 + $0x450] sm:$0xff] (%p5624_p8), %v2926_v18  ;;  %2939 = vst [vmem:[%s5199_s28 + $0x480] sm:$0xff] (%p5624_p8), %v2938_v10 }
 0x2d1   : > { %v1771_v25 = vpop.trf.xlu0  ;;  %v1803_v60 = vpop.trf.xlu1  ;;  %v2928_v42 = vld [vmem:[%s4990_s14 + $0x258] sm:$0xff] (%p5624_p8)  ;;  %2941 = vst [vmem:[%s5199_s28 + $0x488] sm:$0xff] (%p5624_p8), %v2940_v1 }
 0x2d2   : > { %3302 = vst [vmem:[%s4990_s14 + $0x268] sm:$0xff] %v1771_v25  ;;  %3318 = vst [vmem:[%s4990_s14 + $0x2e8] sm:$0xff] %v1803_v60  ;;  %v2814_v25 = vld [vmem:[%s4990_s14 + $0x90] sm:$0xff] (%p5624_p8)  ;;  %v2816_v60 = vld [vmem:[%s4990_s14 + $0x98] sm:$0xff] (%p5624_p8) }
 0x2d3   : > { %2815 = vst [vmem:[%s5199_s28 + $0x90] sm:$0xff] (%p5624_p8), %v2814_v25  ;;  %2817 = vst [vmem:[%s5199_s28 + $0x98] sm:$0xff] (%p5624_p8), %v2816_v60  ;;  %v2942_v25 = vld [vmem:[%s4990_s14 + $0x290] sm:$0xff] (%p5624_p8)  ;;  %v2944_v60 = vld [vmem:[%s4990_s14 + $0x298] sm:$0xff] (%p5624_p8) }
 0x2d4   : > { %2929 = vst [vmem:[%s5199_s28 + $0x458] sm:$0xff] (%p5624_p8), %v2928_v42  ;;  %2943 = vst [vmem:[%s5199_s28 + $0x490] sm:$0xff] (%p5624_p8), %v2942_v25 }
 0x2d5   : > { %v1772_v9 = vpop.trf.xlu0  ;;  %v1804_v37 = vpop.trf.xlu1  ;;  %v2930_v6 = vld [vmem:[%s4990_s14 + $0x260] sm:$0xff] (%p5624_p8)  ;;  %2945 = vst [vmem:[%s5199_s28 + $0x498] sm:$0xff] (%p5624_p8), %v2944_v60 }
 0x2d6   : > { %3303 = vst [vmem:[%s4990_s14 + $0x270] sm:$0xff] %v1772_v9  ;;  %3319 = vst [vmem:[%s4990_s14 + $0x2f0] sm:$0xff] %v1804_v37  ;;  %v2818_v9 = vld [vmem:[%s4990_s14 + $0xa0] sm:$0xff] (%p5624_p8)  ;;  %v2820_v37 = vld [vmem:[%s4990_s14 + $0xa8] sm:$0xff] (%p5624_p8) }
 0x2d7   : > { %2819 = vst [vmem:[%s5199_s28 + $0xa0] sm:$0xff] (%p5624_p8), %v2818_v9  ;;  %2821 = vst [vmem:[%s5199_s28 + $0xa8] sm:$0xff] (%p5624_p8), %v2820_v37  ;;  %v2946_v9 = vld [vmem:[%s4990_s14 + $0x2a0] sm:$0xff] (%p5624_p8)  ;;  %v2948_v37 = vld [vmem:[%s4990_s14 + $0x2a8] sm:$0xff] (%p5624_p8) }
 0x2d8   : > { %2931 = vst [vmem:[%s5199_s28 + $0x460] sm:$0xff] (%p5624_p8), %v2930_v6  ;;  %2947 = vst [vmem:[%s5199_s28 + $0x4a0] sm:$0xff] (%p5624_p8), %v2946_v9 }
 0x2d9   : > { %v1773_v8 = vpop.trf.xlu0  ;;  %v1805_v0 = vpop.trf.xlu1  ;;  %v2932_v31 = vld [vmem:[%s4990_s14 + $0x268] sm:$0xff] (%p5624_p8)  ;;  %2949 = vst [vmem:[%s5199_s28 + $0x4a8] sm:$0xff] (%p5624_p8), %v2948_v37 }
 0x2da   : > { %3304 = vst [vmem:[%s4990_s14 + $0x278] sm:$0xff] %v1773_v8  ;;  %3320 = vst [vmem:[%s4990_s14 + $0x2f8] sm:$0xff] %v1805_v0  ;;  %v2822_v8 = vld [vmem:[%s4990_s14 + $0xb0] sm:$0xff] (%p5624_p8)  ;;  %v2824_v0 = vld [vmem:[%s4990_s14 + $0xb8] sm:$0xff] (%p5624_p8) }
 0x2db   : > { %2823 = vst [vmem:[%s5199_s28 + $0xb0] sm:$0xff] (%p5624_p8), %v2822_v8  ;;  %2825 = vst [vmem:[%s5199_s28 + $0xb8] sm:$0xff] (%p5624_p8), %v2824_v0  ;;  %v2950_v8 = vld [vmem:[%s4990_s14 + $0x2b0] sm:$0xff] (%p5624_p8)  ;;  %v2952_v0 = vld [vmem:[%s4990_s14 + $0x2b8] sm:$0xff] (%p5624_p8) }
 0x2dc   : > { %2933 = vst [vmem:[%s5199_s28 + $0x468] sm:$0xff] (%p5624_p8), %v2932_v31  ;;  %2951 = vst [vmem:[%s5199_s28 + $0x4b0] sm:$0xff] (%p5624_p8), %v2950_v8 }
 0x2dd   : > { %v1822_v41 = vpop.trf.xlu0  ;;  %v1854_v2 = vpop.trf.xlu1  ;;  %v2934_v5 = vld [vmem:[%s4990_s14 + $0x270] sm:$0xff] (%p5624_p8)  ;;  %2953 = vst [vmem:[%s5199_s28 + $0x4b8] sm:$0xff] (%p5624_p8), %v2952_v0 }
 0x2de   : > { %3321 = vst [vmem:[%s4990_s14 + $0x300] sm:$0xff] %v1822_v41  ;;  %3337 = vst [vmem:[%s4990_s14 + $0x380] sm:$0xff] %v1854_v2  ;;  %v3464_v61 = vpop.f32.mrb[66].mxu0  ;;  %v3499_v23 = vpop.f32.mrb[66].mxu1  ;;  %v2826_v41 = vld [vmem:[%s4990_s14 + $0xc0] sm:$0xff] (%p5624_p8)  ;;  %v2828_v2 = vld [vmem:[%s4990_s14 + $0xc8] sm:$0xff] (%p5624_p8) }
 0x2df   : > { %v3465_v12 = vpop.f32.mrb[67].mxu0  ;;  %v3500_v34 = vpop.f32.mrb[67].mxu1  ;;  %2827 = vst [vmem:[%s5199_s28 + $0xc0] sm:$0xff] (%p5624_p8), %v2826_v41  ;;  %2829 = vst [vmem:[%s5199_s28 + $0xc8] sm:$0xff] (%p5624_p8), %v2828_v2  ;;  %v2954_v41 = vld [vmem:[%s4990_s14 + $0x2c0] sm:$0xff] (%p5624_p8)  ;;  %v2956_v2 = vld [vmem:[%s4990_s14 + $0x2c8] sm:$0xff] (%p5624_p8) }
 0x2e0   : > { %v3466_v52 = vadd.f32 %v3465_v12, %v3464_v61  ;;  %v3501_v3 = vadd.f32 %v3500_v34, %v3499_v23  ;;  %v2830_v61 = vld [vmem:[%s4990_s14 + $0xd0] sm:$0xff] (%p5624_p8)  ;;  %v2832_v23 = vld [vmem:[%s4990_s14 + $0xd8] sm:$0xff] (%p5624_p8)  ;;  %v2834_v12 = vld [vmem:[%s4990_s14 + $0xe0] sm:$0xff] (%p5624_p8)  ;;  %2935 = vst [vmem:[%s5199_s28 + $0x470] sm:$0xff] (%p5624_p8), %v2934_v5 }
 0x2e1   : > { %v1823_v16 = vpop.trf.xlu0  ;;  %v1855_v51 = vpop.trf.xlu1  ;;  %2831 = vst [vmem:[%s5199_s28 + $0xd0] sm:$0xff] (%p5624_p8), %v2830_v61  ;;  %2833 = vst [vmem:[%s5199_s28 + $0xd8] sm:$0xff] (%p5624_p8), %v2832_v23  ;;  %v2838_v34 = vld [vmem:[%s4990_s14 + $0xf0] sm:$0xff] (%p5624_p8)  ;;  %v2936_v59 = vld [vmem:[%s4990_s14 + $0x278] sm:$0xff] (%p5624_p8) }
 0x2e2   : > { %3322 = vst [vmem:[%s4990_s14 + $0x308] sm:$0xff] %v1823_v16  ;;  %v2399_v46 = vadd.f32 %v3466_v52, %v5122_v19  ;;  %3338 = vst [vmem:[%s4990_s14 + $0x388] sm:$0xff] %v1855_v51  ;;  %v2836_v52 = vld [vmem:[%s4990_s14 + $0xe8] sm:$0xff] (%p5624_p8)  ;;  %v2840_v16 = vld [vmem:[%s4990_s14 + $0xf8] sm:$0xff] (%p5624_p8) }
 0x2e3   : > { %2835 = vst [vmem:[%s5199_s28 + $0xe0] sm:$0xff] (%p5624_p8), %v2834_v12  ;;  %2837 = vst [vmem:[%s5199_s28 + $0xe8] sm:$0xff] (%p5624_p8), %v2836_v52  ;;  %v2844_v51 = vld [vmem:[%s4990_s14 + $0x108] sm:$0xff] (%p5624_p8)  ;;  %v2958_v61 = vld [vmem:[%s4990_s14 + $0x2d0] sm:$0xff] (%p5624_p8) }
 0x2e4   : > { %v2469_v29 = vadd.f32 %v3501_v3, %v2399_v46  ;;  %v2842_v3 = vld [vmem:[%s4990_s14 + $0x100] sm:$0xff] (%p5624_p8)  ;;  %2839 = vst [vmem:[%s5199_s28 + $0xf0] sm:$0xff] (%p5624_p8), %v2838_v34  ;;  %2841 = vst [vmem:[%s5199_s28 + $0xf8] sm:$0xff] (%p5624_p8), %v2840_v16  ;;  %v2846_v46 = vld [vmem:[%s4990_s14 + $0x110] sm:$0xff] (%p5624_p8) }
 0x2e5   : > { %v1824_v39 = vpop.trf.xlu0  ;;  %v1856_v36 = vpop.trf.xlu1  ;;  %2843 = vst [vmem:[%s5199_s28 + $0x100] sm:$0xff] (%p5624_p8), %v2842_v3  ;;  %2845 = vst [vmem:[%s5199_s28 + $0x108] sm:$0xff] (%p5624_p8), %v2844_v51  ;;  %v2960_v23 = vld [vmem:[%s4990_s14 + $0x2d8] sm:$0xff] (%p5624_p8)  ;;  %v2962_v12 = vld [vmem:[%s4990_s14 + $0x2e0] sm:$0xff] (%p5624_p8) }
 0x2e6   : > { %3323 = vst [vmem:[%s4990_s14 + $0x310] sm:$0xff] %v1824_v39  ;;  %2473 = vst.msk [vmem:[%s500_s10] sm:$0x3] %vm2472_vm1, %v2469_v29  ;;  %v2848_v29 = vld [vmem:[%s4990_s14 + $0x118] sm:$0xff] (%p5624_p8)  ;;  %v2850_v39 = vld [vmem:[%s4990_s14 + $0x120] sm:$0xff] (%p5624_p8) }
 0x2e7   : > { %3339 = vst [vmem:[%s4990_s14 + $0x390] sm:$0xff] %v1856_v36  ;;  %2847 = vst [vmem:[%s5199_s28 + $0x110] sm:$0xff] (%p5624_p8), %v2846_v46  ;;  %v2852_v36 = vld [vmem:[%s4990_s14 + $0x128] sm:$0xff] (%p5624_p8)  ;;  %v2966_v34 = vld [vmem:[%s4990_s14 + $0x2f0] sm:$0xff] (%p5624_p8) }
 0x2e8   : > { %2849 = vst [vmem:[%s5199_s28 + $0x118] sm:$0xff] (%p5624_p8), %v2848_v29  ;;  %2851 = vst [vmem:[%s5199_s28 + $0x120] sm:$0xff] (%p5624_p8), %v2850_v39  ;;  %v2964_v52 = vld [vmem:[%s4990_s14 + $0x2e8] sm:$0xff] (%p5624_p8)  ;;  %v2968_v16 = vld [vmem:[%s4990_s14 + $0x2f8] sm:$0xff] (%p5624_p8) }
 0x2e9   : > { %v1825_v53 = vpop.trf.xlu0  ;;  %v1857_v21 = vpop.trf.xlu1  ;;  %2853 = vst [vmem:[%s5199_s28 + $0x128] sm:$0xff] (%p5624_p8), %v2852_v36  ;;  %2937 = vst [vmem:[%s5199_s28 + $0x478] sm:$0xff] (%p5624_p8), %v2936_v59  ;;  %v2970_v3 = vld [vmem:[%s4990_s14 + $0x300] sm:$0xff] (%p5624_p8)  ;;  %v2972_v51 = vld [vmem:[%s4990_s14 + $0x308] sm:$0xff] (%p5624_p8) }
 0x2ea   : > { %3324 = vst [vmem:[%s4990_s14 + $0x318] sm:$0xff] %v1825_v53  ;;  %3340 = vst [vmem:[%s4990_s14 + $0x398] sm:$0xff] %v1857_v21  ;;  %v2854_v53 = vld [vmem:[%s4990_s14 + $0x130] sm:$0xff] (%p5624_p8)  ;;  %v2856_v21 = vld [vmem:[%s4990_s14 + $0x138] sm:$0xff] (%p5624_p8) }
 0x2eb   : > { %2855 = vst [vmem:[%s5199_s28 + $0x130] sm:$0xff] (%p5624_p8), %v2854_v53  ;;  %2857 = vst [vmem:[%s5199_s28 + $0x138] sm:$0xff] (%p5624_p8), %v2856_v21 }
 0x2ec   : > { %2955 = vst [vmem:[%s5199_s28 + $0x4c0] sm:$0xff] (%p5624_p8), %v2954_v41  ;;  %2957 = vst [vmem:[%s5199_s28 + $0x4c8] sm:$0xff] (%p5624_p8), %v2956_v2 }
 0x2ed   : > { %v1826_v15 = vpop.trf.xlu0  ;;  %v1858_v7 = vpop.trf.xlu1  ;;  %2959 = vst [vmem:[%s5199_s28 + $0x4d0] sm:$0xff] (%p5624_p8), %v2958_v61  ;;  %2961 = vst [vmem:[%s5199_s28 + $0x4d8] sm:$0xff] (%p5624_p8), %v2960_v23  ;;  %v2974_v46 = vld [vmem:[%s4990_s14 + $0x310] sm:$0xff] (%p5624_p8) }
 0x2ee   : > { %3325 = vst [vmem:[%s4990_s14 + $0x320] sm:$0xff] %v1826_v15  ;;  %3341 = vst [vmem:[%s4990_s14 + $0x3a0] sm:$0xff] %v1858_v7  ;;  %v2858_v15 = vld [vmem:[%s4990_s14 + $0x140] sm:$0xff] (%p5624_p8)  ;;  %v2860_v7 = vld [vmem:[%s4990_s14 + $0x148] sm:$0xff] (%p5624_p8) }
 0x2ef   : > { %2859 = vst [vmem:[%s5199_s28 + $0x140] sm:$0xff] (%p5624_p8), %v2858_v15  ;;  %2861 = vst [vmem:[%s5199_s28 + $0x148] sm:$0xff] (%p5624_p8), %v2860_v7 }
 0x2f0   : > { %2963 = vst [vmem:[%s5199_s28 + $0x4e0] sm:$0xff] (%p5624_p8), %v2962_v12  ;;  %2965 = vst [vmem:[%s5199_s28 + $0x4e8] sm:$0xff] (%p5624_p8), %v2964_v52 }
 0x2f1   : > { %v1827_v30 = vpop.trf.xlu0  ;;  %v1859_v56 = vpop.trf.xlu1  ;;  %2967 = vst [vmem:[%s5199_s28 + $0x4f0] sm:$0xff] (%p5624_p8), %v2966_v34  ;;  %2969 = vst [vmem:[%s5199_s28 + $0x4f8] sm:$0xff] (%p5624_p8), %v2968_v16  ;;  %v2976_v29 = vld [vmem:[%s4990_s14 + $0x318] sm:$0xff] (%p5624_p8) }
 0x2f2   : > { %3326 = vst [vmem:[%s4990_s14 + $0x328] sm:$0xff] %v1827_v30  ;;  %3342 = vst [vmem:[%s4990_s14 + $0x3a8] sm:$0xff] %v1859_v56  ;;  %v2862_v30 = vld [vmem:[%s4990_s14 + $0x150] sm:$0xff] (%p5624_p8)  ;;  %v2864_v56 = vld [vmem:[%s4990_s14 + $0x158] sm:$0xff] (%p5624_p8) }
 0x2f3   : > { %2863 = vst [vmem:[%s5199_s28 + $0x150] sm:$0xff] (%p5624_p8), %v2862_v30  ;;  %2865 = vst [vmem:[%s5199_s28 + $0x158] sm:$0xff] (%p5624_p8), %v2864_v56 }
 0x2f4   : > { %2971 = vst [vmem:[%s5199_s28 + $0x500] sm:$0xff] (%p5624_p8), %v2970_v3  ;;  %2973 = vst [vmem:[%s5199_s28 + $0x508] sm:$0xff] (%p5624_p8), %v2972_v51 }
 0x2f5   : > { %v1828_v11 = vpop.trf.xlu0  ;;  %v1860_v57 = vpop.trf.xlu1  ;;  %2975 = vst [vmem:[%s5199_s28 + $0x510] sm:$0xff] (%p5624_p8), %v2974_v46  ;;  %v2978_v39 = vld [vmem:[%s4990_s14 + $0x320] sm:$0xff] (%p5624_p8)  ;;  %2977 = vst [vmem:[%s5199_s28 + $0x518] sm:$0xff] (%p5624_p8), %v2976_v29 }
 0x2f6   : > { %3327 = vst [vmem:[%s4990_s14 + $0x330] sm:$0xff] %v1828_v11  ;;  %3343 = vst [vmem:[%s4990_s14 + $0x3b0] sm:$0xff] %v1860_v57  ;;  %v2866_v11 = vld [vmem:[%s4990_s14 + $0x160] sm:$0xff] (%p5624_p8)  ;;  %v2868_v57 = vld [vmem:[%s4990_s14 + $0x168] sm:$0xff] (%p5624_p8) }
 0x2f7   : > { %2867 = vst [vmem:[%s5199_s28 + $0x160] sm:$0xff] (%p5624_p8), %v2866_v11  ;;  %2869 = vst [vmem:[%s5199_s28 + $0x168] sm:$0xff] (%p5624_p8), %v2868_v57 }
 0x2f8   : > { %2979 = vst [vmem:[%s5199_s28 + $0x520] sm:$0xff] (%p5624_p8), %v2978_v39 }
 0x2f9   : > { %v1829_v14 = vpop.trf.xlu0  ;;  %v1861_v32 = vpop.trf.xlu1  ;;  %v2980_v36 = vld [vmem:[%s4990_s14 + $0x328] sm:$0xff] (%p5624_p8) }
 0x2fa   : > { %3328 = vst [vmem:[%s4990_s14 + $0x338] sm:$0xff] %v1829_v14  ;;  %3344 = vst [vmem:[%s4990_s14 + $0x3b8] sm:$0xff] %v1861_v32  ;;  %v2870_v14 = vld [vmem:[%s4990_s14 + $0x170] sm:$0xff] (%p5624_p8)  ;;  %v2872_v32 = vld [vmem:[%s4990_s14 + $0x178] sm:$0xff] (%p5624_p8) }
 0x2fb   : > { %2871 = vst [vmem:[%s5199_s28 + $0x170] sm:$0xff] (%p5624_p8), %v2870_v14  ;;  %2873 = vst [vmem:[%s5199_s28 + $0x178] sm:$0xff] (%p5624_p8), %v2872_v32 }
 0x2fc   : > { %2981 = vst [vmem:[%s5199_s28 + $0x528] sm:$0xff] (%p5624_p8), %v2980_v36 }
 0x2fd   : > { %v1830_v26 = vpop.trf.xlu0  ;;  %v1862_v63 = vpop.trf.xlu1  ;;  %v2982_v53 = vld [vmem:[%s4990_s14 + $0x330] sm:$0xff] (%p5624_p8) }
 0x2fe   : > { %3329 = vst [vmem:[%s4990_s14 + $0x340] sm:$0xff] %v1830_v26  ;;  %3345 = vst [vmem:[%s4990_s14 + $0x3c0] sm:$0xff] %v1862_v63  ;;  %v2874_v26 = vld [vmem:[%s4990_s14 + $0x180] sm:$0xff] (%p5624_p8)  ;;  %v2876_v63 = vld [vmem:[%s4990_s14 + $0x188] sm:$0xff] (%p5624_p8) }
 0x2ff   : > { %2875 = vst [vmem:[%s5199_s28 + $0x180] sm:$0xff] (%p5624_p8), %v2874_v26  ;;  %2877 = vst [vmem:[%s5199_s28 + $0x188] sm:$0xff] (%p5624_p8), %v2876_v63  ;;  %v3002_v26 = vld [vmem:[%s4990_s14 + $0x380] sm:$0xff] (%p5624_p8)  ;;  %v3004_v63 = vld [vmem:[%s4990_s14 + $0x388] sm:$0xff] (%p5624_p8) }
 0x300   : > { %2983 = vst [vmem:[%s5199_s28 + $0x530] sm:$0xff] (%p5624_p8), %v2982_v53  ;;  %3003 = vst [vmem:[%s5199_s28 + $0x580] sm:$0xff] (%p5624_p8), %v3002_v26 }
 0x301   : > { %v1831_v38 = vpop.trf.xlu0  ;;  %v1863_v55 = vpop.trf.xlu1  ;;  %v2984_v21 = vld [vmem:[%s4990_s14 + $0x338] sm:$0xff] (%p5624_p8)  ;;  %3005 = vst [vmem:[%s5199_s28 + $0x588] sm:$0xff] (%p5624_p8), %v3004_v63 }
 0x302   : > { %3330 = vst [vmem:[%s4990_s14 + $0x348] sm:$0xff] %v1831_v38  ;;  %3346 = vst [vmem:[%s4990_s14 + $0x3c8] sm:$0xff] %v1863_v55  ;;  %v2878_v38 = vld [vmem:[%s4990_s14 + $0x190] sm:$0xff] (%p5624_p8)  ;;  %v2880_v55 = vld [vmem:[%s4990_s14 + $0x198] sm:$0xff] (%p5624_p8) }
 0x303   : > { %2879 = vst [vmem:[%s5199_s28 + $0x190] sm:$0xff] (%p5624_p8), %v2878_v38  ;;  %2881 = vst [vmem:[%s5199_s28 + $0x198] sm:$0xff] (%p5624_p8), %v2880_v55  ;;  %v3006_v38 = vld [vmem:[%s4990_s14 + $0x390] sm:$0xff] (%p5624_p8)  ;;  %v3008_v55 = vld [vmem:[%s4990_s14 + $0x398] sm:$0xff] (%p5624_p8) }
 0x304   : > { %2985 = vst [vmem:[%s5199_s28 + $0x538] sm:$0xff] (%p5624_p8), %v2984_v21  ;;  %3007 = vst [vmem:[%s5199_s28 + $0x590] sm:$0xff] (%p5624_p8), %v3006_v38 }
 0x305   : > { %v1832_v20 = vpop.trf.xlu0  ;;  %v1864_v50 = vpop.trf.xlu1  ;;  %v2986_v15 = vld [vmem:[%s4990_s14 + $0x340] sm:$0xff] (%p5624_p8)  ;;  %3009 = vst [vmem:[%s5199_s28 + $0x598] sm:$0xff] (%p5624_p8), %v3008_v55 }
 0x306   : > { %3331 = vst [vmem:[%s4990_s14 + $0x350] sm:$0xff] %v1832_v20  ;;  %3347 = vst [vmem:[%s4990_s14 + $0x3d0] sm:$0xff] %v1864_v50  ;;  %v2882_v20 = vld [vmem:[%s4990_s14 + $0x1a0] sm:$0xff] (%p5624_p8)  ;;  %v2884_v50 = vld [vmem:[%s4990_s14 + $0x1a8] sm:$0xff] (%p5624_p8) }
 0x307   : > { %2883 = vst [vmem:[%s5199_s28 + $0x1a0] sm:$0xff] (%p5624_p8), %v2882_v20  ;;  %2885 = vst [vmem:[%s5199_s28 + $0x1a8] sm:$0xff] (%p5624_p8), %v2884_v50  ;;  %v3010_v20 = vld [vmem:[%s4990_s14 + $0x3a0] sm:$0xff] (%p5624_p8)  ;;  %v3012_v50 = vld [vmem:[%s4990_s14 + $0x3a8] sm:$0xff] (%p5624_p8) }
 0x308   : > { %2987 = vst [vmem:[%s5199_s28 + $0x540] sm:$0xff] (%p5624_p8), %v2986_v15  ;;  %3011 = vst [vmem:[%s5199_s28 + $0x5a0] sm:$0xff] (%p5624_p8), %v3010_v20 }
 0x309   : > { %v1833_v35 = vpop.trf.xlu0  ;;  %v1865_v44 = vpop.trf.xlu1  ;;  %v2988_v7 = vld [vmem:[%s4990_s14 + $0x348] sm:$0xff] (%p5624_p8)  ;;  %3013 = vst [vmem:[%s5199_s28 + $0x5a8] sm:$0xff] (%p5624_p8), %v3012_v50 }
 0x30a   : > { %3332 = vst [vmem:[%s4990_s14 + $0x358] sm:$0xff] %v1833_v35  ;;  %3348 = vst [vmem:[%s4990_s14 + $0x3d8] sm:$0xff] %v1865_v44  ;;  %v2886_v35 = vld [vmem:[%s4990_s14 + $0x1b0] sm:$0xff] (%p5624_p8)  ;;  %v2888_v44 = vld [vmem:[%s4990_s14 + $0x1b8] sm:$0xff] (%p5624_p8) }
 0x30b   : > { %2887 = vst [vmem:[%s5199_s28 + $0x1b0] sm:$0xff] (%p5624_p8), %v2886_v35  ;;  %2889 = vst [vmem:[%s5199_s28 + $0x1b8] sm:$0xff] (%p5624_p8), %v2888_v44  ;;  %v3014_v35 = vld [vmem:[%s4990_s14 + $0x3b0] sm:$0xff] (%p5624_p8)  ;;  %v3016_v44 = vld [vmem:[%s4990_s14 + $0x3b8] sm:$0xff] (%p5624_p8) }
 0x30c   : > { %2989 = vst [vmem:[%s5199_s28 + $0x548] sm:$0xff] (%p5624_p8), %v2988_v7  ;;  %3015 = vst [vmem:[%s5199_s28 + $0x5b0] sm:$0xff] (%p5624_p8), %v3014_v35 }
 0x30d   : > { %v1834_v45 = vpop.trf.xlu0  ;;  %v1866_v4 = vpop.trf.xlu1  ;;  %v2990_v30 = vld [vmem:[%s4990_s14 + $0x350] sm:$0xff] (%p5624_p8)  ;;  %3017 = vst [vmem:[%s5199_s28 + $0x5b8] sm:$0xff] (%p5624_p8), %v3016_v44 }
 0x30e   : > { %3333 = vst [vmem:[%s4990_s14 + $0x360] sm:$0xff] %v1834_v45  ;;  %3349 = vst [vmem:[%s4990_s14 + $0x3e0] sm:$0xff] %v1866_v4  ;;  %v2890_v45 = vld [vmem:[%s4990_s14 + $0x1c0] sm:$0xff] (%p5624_p8)  ;;  %v2892_v4 = vld [vmem:[%s4990_s14 + $0x1c8] sm:$0xff] (%p5624_p8) }
 0x30f   : > { %2891 = vst [vmem:[%s5199_s28 + $0x1c0] sm:$0xff] (%p5624_p8), %v2890_v45  ;;  %2893 = vst [vmem:[%s5199_s28 + $0x1c8] sm:$0xff] (%p5624_p8), %v2892_v4  ;;  %v3018_v45 = vld [vmem:[%s4990_s14 + $0x3c0] sm:$0xff] (%p5624_p8)  ;;  %v3020_v4 = vld [vmem:[%s4990_s14 + $0x3c8] sm:$0xff] (%p5624_p8) }
 0x310   : > { %2991 = vst [vmem:[%s5199_s28 + $0x550] sm:$0xff] (%p5624_p8), %v2990_v30  ;;  %3019 = vst [vmem:[%s5199_s28 + $0x5c0] sm:$0xff] (%p5624_p8), %v3018_v45 }
 0x311   : > { %v1835_v33 = vpop.trf.xlu0  ;;  %v1867_v19 = vpop.trf.xlu1  ;;  %v2992_v56 = vld [vmem:[%s4990_s14 + $0x358] sm:$0xff] (%p5624_p8)  ;;  %3021 = vst [vmem:[%s5199_s28 + $0x5c8] sm:$0xff] (%p5624_p8), %v3020_v4 }
 0x312   : > { %3334 = vst [vmem:[%s4990_s14 + $0x368] sm:$0xff] %v1835_v33  ;;  %3350 = vst [vmem:[%s4990_s14 + $0x3e8] sm:$0xff] %v1867_v19  ;;  %v2894_v33 = vld [vmem:[%s4990_s14 + $0x1d0] sm:$0xff] (%p5624_p8)  ;;  %v2896_v19 = vld [vmem:[%s4990_s14 + $0x1d8] sm:$0xff] (%p5624_p8) }
 0x313   : > { %2895 = vst [vmem:[%s5199_s28 + $0x1d0] sm:$0xff] (%p5624_p8), %v2894_v33  ;;  %2897 = vst [vmem:[%s5199_s28 + $0x1d8] sm:$0xff] (%p5624_p8), %v2896_v19  ;;  %v3022_v33 = vld [vmem:[%s4990_s14 + $0x3d0] sm:$0xff] (%p5624_p8)  ;;  %v3024_v19 = vld [vmem:[%s4990_s14 + $0x3d8] sm:$0xff] (%p5624_p8) }
 0x314   : > { %2490 = sbr.rel (!%p5624_p8) target bundleno = 804 (0x324), region = 75  ;;  %2993 = vst [vmem:[%s5199_s28 + $0x558] sm:$0xff] (%p5624_p8), %v2992_v56  ;;  %3023 = vst [vmem:[%s5199_s28 + $0x5d0] sm:$0xff] (%p5624_p8), %v3022_v33 }
 0x315   : > { %v1836_v40 = vpop.trf.xlu0  ;;  %v1868_v22 = vpop.trf.xlu1  ;;  %v2994_v11 = vld [vmem:[%s4990_s14 + $0x360] sm:$0xff] (%p5624_p8)  ;;  %3025 = vst [vmem:[%s5199_s28 + $0x5d8] sm:$0xff] (%p5624_p8), %v3024_v19 }
 0x316   : > { %3335 = vst [vmem:[%s4990_s14 + $0x370] sm:$0xff] %v1836_v40  ;;  %3351 = vst [vmem:[%s4990_s14 + $0x3f0] sm:$0xff] %v1868_v22  ;;  %v2898_v40 = vld [vmem:[%s4990_s14 + $0x1e0] sm:$0xff] (%p5624_p8)  ;;  %v2900_v22 = vld [vmem:[%s4990_s14 + $0x1e8] sm:$0xff] (%p5624_p8) }
 0x317   : > { %2899 = vst [vmem:[%s5199_s28 + $0x1e0] sm:$0xff] (%p5624_p8), %v2898_v40  ;;  %2901 = vst [vmem:[%s5199_s28 + $0x1e8] sm:$0xff] (%p5624_p8), %v2900_v22  ;;  %v3026_v40 = vld [vmem:[%s4990_s14 + $0x3e0] sm:$0xff] (%p5624_p8) }
 0x318   : > { %2995 = vst [vmem:[%s5199_s28 + $0x560] sm:$0xff] (%p5624_p8), %v2994_v11  ;;  %3027 = vst [vmem:[%s5199_s28 + $0x5e0] sm:$0xff] (%p5624_p8), %v3026_v40 }
 0x319   : > { %v1837_v58 = vpop.trf.xlu0  ;;  %v1869_v24 = vpop.trf.xlu1  ;;  %v2996_v57 = vld [vmem:[%s4990_s14 + $0x368] sm:$0xff] (%p5624_p8) }
 0x31a   : > { %3336 = vst [vmem:[%s4990_s14 + $0x378] sm:$0xff] %v1837_v58  ;;  %3352 = vst [vmem:[%s4990_s14 + $0x3f8] sm:$0xff] %v1869_v24  ;;  %v2902_v58 = vld [vmem:[%s4990_s14 + $0x1f0] sm:$0xff] (%p5624_p8)  ;;  %v2904_v24 = vld [vmem:[%s4990_s14 + $0x1f8] sm:$0xff] (%p5624_p8) }
 0x31b   : > { %2903 = vst [vmem:[%s5199_s28 + $0x1f0] sm:$0xff] %v2902_v58  ;;  %2905 = vst [vmem:[%s5199_s28 + $0x1f8] sm:$0xff] %v2904_v24  ;;  %v3028_v22 = vld [vmem:[%s4990_s14 + $0x3e8] sm:$0xff] }
 0x31c   : > { %2997 = vst [vmem:[%s5199_s28 + $0x568] sm:$0xff] %v2996_v57  ;;  %3029 = vst [vmem:[%s5199_s28 + $0x5e8] sm:$0xff] %v3028_v22 }
 0x31d   : > { %v2998_v14 = vld [vmem:[%s4990_s14 + $0x370] sm:$0xff] }
 0x31e   : > { %2999 = vst [vmem:[%s5199_s28 + $0x570] sm:$0xff] %v2998_v14  ;;  %v3030_v58 = vld [vmem:[%s4990_s14 + $0x3f0] sm:$0xff] }
 0x31f   : > { %3031 = vst [vmem:[%s5199_s28 + $0x5f0] sm:$0xff] %v3030_v58 }
 0x321   : > { %v3000_v32 = vld [vmem:[%s4990_s14 + $0x378] sm:$0xff] }
 0x322   : > { %3001 = vst [vmem:[%s5199_s28 + $0x578] sm:$0xff] %v3000_v32  ;;  %v3032_v24 = vld [vmem:[%s4990_s14 + $0x3f8] sm:$0xff] }
 0x323   : > { %3033 = vst [vmem:[%s5199_s28 + $0x5f8] sm:$0xff] %v3032_v24 }
 0x324 PF: > { %s22_s23 = sadd.s32 1, %s3803_s23   ;;  %s5625_s18 = smov %s3787_s19 }
 0x325   : > { %p19_p10 = scmp.ge.s32.totalorder %s22_s23, 4   ;;  %s5626_s19 = smov %s3791_s20 }
 0x326   : > { %s5627_s20 = smov %s3888_s30  ;;  %s5628_s21 = smov %s3799_s22 }
 0x327   : > { %s5629_s22 = smov %s5631_s25  ;;  %21 = sbr.rel (!%p19_p10) target bundleno = 6 (0x6), region = 174 }
 0x32e   :  { %3059 = vsyncpa [#allocation4], 1 }
 0x32f   :  { %3061 = vsyncpa [#allocation4 + $0x1], 1 }
 0x330   :  { %3062 = vsyncpa [#allocation6], 1 }
 0x331   :  { %3064 = vsyncpa [#allocation6 + $0x1], 1 }

</bundles_post_ra>
